<compile_context>
chip_gen: v6e
topology: v6e:2x2x1
jax: 0.10.0
libtpu: 0.0.40
codegen_flags: <defaults>
</compile_context>

<pallas_src>
import functools
import itertools

import numpy as np

import jax
import jax.numpy as jnp
from jax.experimental import pallas as pl
from jax.experimental.pallas import tpu as pltpu


# ---------------------------------------------------------------------------
# setup helpers (host-side, trace-time)
# ---------------------------------------------------------------------------
def _dw_shift_table(H, W, ksize):
    """Per-tap lane shift + validity mask for a 'same'-padded ksize x ksize depthwise
    conv on a row-major flattened H*W grid.  Tap t = ti*ksize + tj (cross-corr)."""
    pad = ksize // 2
    ys, xs = np.meshgrid(np.arange(H), np.arange(W), indexing="ij")
    ys = ys.reshape(-1)
    xs = xs.reshape(-1)
    shifts, masks = [], []
    for t in range(ksize * ksize):
        dy, dx = t // ksize - pad, t % ksize - pad
        valid = ((ys + dy >= 0) & (ys + dy < H) &
                 (xs + dx >= 0) & (xs + dx < W))
        shifts.append(int(dy * W + dx))
        masks.append(valid.astype(np.float32))
    return tuple(shifts), np.stack(masks)           # (kk,), (kk, N)


def _pick_tb(batch, n, lane_target=128, min_grid=4):
    """Images packed per grid step: make lanes >= lane_target while keeping at least
    min_grid grid steps (2 per v7x TensorCore) when the batch allows."""
    tb = min(batch, max(1, -(-lane_target // n)))
    while tb > 1 and (batch % tb != 0 or batch // tb < min(min_grid, batch)):
        tb -= 1
    return tb


# ---------------------------------------------------------------------------
# kernel: one grid step = TB lane-packed images, all heads fused
# ---------------------------------------------------------------------------
def _cga_kernel(x_ref, wqkv_ref, bqkv_ref, wm_ref, bdw_ref, ab_ref,
                wprojh_ref, bproj_ref, o_ref, *,
                num_heads, key_dim, d, scale, shifts, mxu_dtype):
    """
    x_ref      : (1, C, L)              L = TB*N lane-packed input slab
    wqkv_ref   : (heads, 2*kd + d, d)   folded qkv 1x1 conv weights (mxu dtype)
    bqkv_ref   : (heads, 2*kd + d, 1)   folded qkv biases               (f32)
    wm_ref     : (heads*kk_max, kd, L)  dw tap weight x edge mask       (f32)
    bdw_ref    : (heads, kd, 1)         depthwise conv biases           (f32)
    ab_ref     : (heads, L, L)          block-diag rel-pos attention bias (f32)
    wprojh_ref : (heads, C, d)          per-head slice of folded proj conv (mxu dtype)
    bproj_ref  : (C, 1)                 proj bias                       (f32)
    o_ref      : (1, C, L)
    """
    f32 = jnp.float32
    L = x_ref.shape[-1]
    taps_stride = wm_ref.shape[0] // num_heads
    x = x_ref[0].astype(f32)                                   # (C, L)

    def mm(a, b, dims):
        return jax.lax.dot_general(a.astype(mxu_dtype), b.astype(mxu_dtype),
                                   dims, preferred_element_type=f32)

    acc = None          # projection accumulator (C, L), f32
    prev = None         # cascade carry (d, L), f32
    for i in range(num_heads):
        chunk = x[i * d:(i + 1) * d, :]                        # (d, L)
        feat = chunk if i == 0 else prev + chunk               # cascade carry

        # fused qkv 1x1 conv (MXU, f32 accumulation)
        qkv = mm(wqkv_ref[i], feat, (((1,), (0,)), ((), ()))) + bqkv_ref[i]
        q = qkv[:key_dim, :]
        k = qkv[key_dim:2 * key_dim, :]
        v = qkv[2 * key_dim:, :]

        # depthwise conv on q: XLU lane rolls + VPU FMA against precombined
        # (tap weight x zero-pad edge mask).  No MXU, no dense shift matrices.
        qd = None
        for t, s in enumerate(shifts[i]):
            src = q if s == 0 else pltpu.roll(q, (-s) % L, 1)  # out[n] = q[n + s]
            term = wm_ref[i * taps_stride + t] * src
            qd = term if qd is None else qd + term
        qd = qd + bdw_ref[i]                                   # (kd, L)

        # attention over the packed slab; ab carries the per-image rel-pos bias on
        # diagonal blocks and -1e9 off-diagonal so packed images never mix.
        attn = mm(qd, k, (((0,), (0,)), ((), ()))) * scale + ab_ref[i]   # (L, L)
        m = jnp.max(attn, axis=-1, keepdims=True)
        e = jnp.exp(attn - m)
        p = e * pl.reciprocal(jnp.sum(e, axis=-1, keepdims=True), approx=True)

        fo = mm(v, p, (((1,), (1,)), ((), ())))                # (d, L)
        prev = fo

        # per-head projection accumulation (replaces concat + epilogue matmul)
        contrib = mm(wprojh_ref[i], jnp.maximum(fo, 0.0), (((1,), (0,)), ((), ())))
        acc = contrib if acc is None else acc + contrib

    o_ref[0] = (acc + bproj_ref[...]).astype(o_ref.dtype)


# ---------------------------------------------------------------------------
# wrapper
# ---------------------------------------------------------------------------
def cascaded_group_attention(x, params, *, num_heads, key_dim, kernels,
                             mxu_dtype=jnp.bfloat16):
    """x: (B, C, H, W) NCHW. params: folded (eval-mode) Conv2d_BN weights."""
    B, C, H, W = x.shape
    assert C % num_heads == 0, "dim must be divisible by num_heads"
    d = C // num_heads
    N = H * W
    tb = _pick_tb(B, N)
    G = B // tb
    L = tb * N
    scale = float(key_dim) ** -0.5
    f32 = jnp.float32

    # ---- constants (DMA'd once, VMEM resident across grid steps) -------------
    wqkv = params["wqkv"].astype(mxu_dtype)                       # (heads, 2kd+d, d)
    bqkv = params["bqkv"].astype(f32)                             # (heads, 2kd+d, 1)
    bdw = params["bdw"].astype(f32)                               # (heads, kd, 1)
    wproj = params["wproj"].astype(mxu_dtype)                     # (C, C)
    wprojh = wproj.reshape(C, num_heads, d).transpose(1, 0, 2)    # (heads, C, d)
    bproj = params["bproj"].astype(f32)                           # (C, 1)

    # depthwise conv -> per-tap lane shift + (tap weight x edge mask); zero-pad to
    # the largest tap count so heterogeneous per-head kernel sizes are supported.
    kk_max = max(ks * ks for ks in kernels)
    shifts, wm_list = [], []
    for i, ksize in enumerate(kernels):
        s_i, m_i = _dw_shift_table(H, W, ksize)
        shifts.append(s_i)
        m_i = np.tile(m_i, (1, tb))                               # (kk_i, L)
        w_i = params["wdw"][i].astype(f32)                        # (kk_i, kd)
        wm_i = w_i[:, :, None] * jnp.asarray(m_i)[:, None, :]     # (kk_i, kd, L)
        if wm_i.shape[0] < kk_max:
            wm_i = jnp.pad(wm_i, ((0, kk_max - wm_i.shape[0]), (0, 0), (0, 0)))
        wm_list.append(wm_i)
    wm = jnp.concatenate(wm_list, axis=0)                         # (heads*kk_max, kd, L)
    shifts = tuple(shifts)

    # block-diagonal attention bias: rel-pos bias on per-image blocks, -1e9 off them.
    ab = params["ab"].astype(f32)                                 # (heads, N, N)
    abp = jnp.full((num_heads, L, L), -1e9, f32)
    for b in range(tb):
        abp = abp.at[:, b * N:(b + 1) * N, b * N:(b + 1) * N].set(ab)

    # ---- lane-pack the input: tb images side by side on the lane axis --------
    xp = x.reshape(G, tb, C, N).transpose(0, 2, 1, 3).reshape(G, C, L)

    kernel = functools.partial(
        _cga_kernel, num_heads=num_heads, key_dim=key_dim, d=d,
        scale=scale, shifts=shifts, mxu_dtype=mxu_dtype)

    def const_spec(a):
        nd = a.ndim
        return pl.BlockSpec(a.shape, lambda g, _nd=nd: (0,) * _nd)

    consts = (wqkv, bqkv, wm, bdw, abp, wprojh, bproj)

    # VMEM budget derived from the actual footprint (constants x2 buffers,
    # in/out blocks x2 buffers, + headroom for intermediates), not a blanket 48 MiB.
    bytes_consts = sum(int(np.prod(a.shape)) * a.dtype.itemsize for a in consts)
    bytes_block = C * L * xp.dtype.itemsize
    vmem_limit = int(min(64 * 2 ** 20,
                         2 * bytes_consts + 4 * bytes_block + 8 * 2 ** 20))

    out = pl.pallas_call(
        kernel,
        out_shape=jax.ShapeDtypeStruct((G, C, L), x.dtype),
        grid_spec=pltpu.PrefetchScalarGridSpec(
            num_scalar_prefetch=0,
            grid=(G,),
            in_specs=[pl.BlockSpec((1, C, L), lambda g: (g, 0, 0))]
                     + [const_spec(a) for a in consts],
            out_specs=pl.BlockSpec((1, C, L), lambda g: (g, 0, 0)),
        ),
        compiler_params=pltpu.CompilerParams(
            dimension_semantics=("parallel",),
            vmem_limit_bytes=vmem_limit,
        ),
    )(xp, *consts)

    # unpack back to NCHW
    return out.reshape(G, C, tb, N).transpose(0, 2, 1, 3).reshape(B, C, H, W)


# ---------------------------------------------------------------------------
# pure-JAX reference (transcription of the PyTorch forward)
# ---------------------------------------------------------------------------
def _reference(x, params, *, num_heads, key_dim, kernels):
    B, C, H, W = x.shape
    d = C // num_heads
    N = H * W
    scale = float(key_dim) ** -0.5
    hp = jax.lax.Precision.HIGHEST

    wqkv, bqkv = params["wqkv"], params["bqkv"]
    wdw, bdw = params["wdw"], params["bdw"]
    ab, wproj, bproj = params["ab"], params["wproj"], params["bproj"]

    feats_in = jnp.split(x.astype(jnp.float32), num_heads, axis=1)
    feat = feats_in[0]
    outs = []
    for i in range(num_heads):
        if i > 0:
            feat = feat + feats_in[i]
        f = feat.reshape(B, d, N)
        qkv = jnp.einsum("od,bdn->bon", wqkv[i], f, precision=hp) + bqkv[i][None]
        q = qkv[:, :key_dim]
        k_ = qkv[:, key_dim:2 * key_dim]
        v = qkv[:, 2 * key_dim:]
        ks = kernels[i]
        p = ks // 2
        wd = jnp.transpose(wdw[i]).reshape(key_dim, 1, ks, ks)   # taps row-major
        qc = jax.lax.conv_general_dilated(
            q.reshape(B, key_dim, H, W), wd, window_strides=(1, 1),
            padding=[(p, p), (p, p)], feature_group_count=key_dim,
            dimension_numbers=("NCHW", "OIHW", "NCHW"), precision=hp)
        qc = qc + bdw[i].reshape(1, key_dim, 1, 1)
        attn = jnp.einsum("bcq,bck->bqk", qc.reshape(B, key_dim, N), k_,
                          precision=hp) * scale + ab[i][None]
        attn = jax.nn.softmax(attn, axis=-1)
        fo = jnp.einsum("bck,bqk->bcq", v, attn, precision=hp)
        feat = fo.reshape(B, d, H, W)
        outs.append(feat)
    cat = jnp.maximum(jnp.concatenate(outs, axis=1).reshape(B, C, N), 0.0)
    out = jnp.einsum("oc,bcn->bon", wproj, cat, precision=hp) + bproj[None]
    return out.reshape(B, C, H, W).astype(x.dtype)


# ---------------------------------------------------------------------------
if __name__ == "__main__":
    B, dim, H, W = 8, 32, 8, 8                 # resolution = 8 -> N = 64 per image
    num_heads, key_dim = 4, 8
    kernels = [5, 5, 5, 5]
    d = dim // num_heads
    N = H * W

    # relative-position attention-bias index table, exactly as in the module
    points = list(itertools.product(range(H), range(W)))
    attention_offsets, idxs = {}, []
    for p1 in points:
        for p2 in points:
            off = (abs(p1[0] - p2[0]), abs(p1[1] - p2[1]))
            if off not in attention_offsets:
                attention_offsets[off] = len(attention_offsets)
            idxs.append(attention_offsets[off])
    idxs = np.asarray(idxs, dtype=np.int32).reshape(N, N)

    key = jax.random.PRNGKey(0)
    ks = jax.random.split(key, 12)
    x = jax.random.normal(ks[0], (B, dim, H, W), dtype=jnp.float32)
    # Conv2d_BN blocks = eval-mode folded conv weight + bias.  The module zero-inits
    # attention_biases and the proj BN gamma (which would trivialize parts of the
    # path), so small random values are used to exercise it fully.
    wdw = [0.2 * jax.random.normal(ks[3 + i], (kk * kk, key_dim), jnp.float32)
           for i, kk in enumerate(kernels)]
    params = dict(
        wqkv=0.3 * jax.random.normal(ks[1], (num_heads, 2 * key_dim + d, d), jnp.float32),
        bqkv=0.1 * jax.random.normal(ks[2], (num_heads, 2 * key_dim + d, 1), jnp.float32),
        wdw=wdw,
        bdw=0.1 * jax.random.normal(ks[7], (num_heads, key_dim, 1), jnp.float32),
        ab=(0.5 * jax.random.normal(ks[8], (num_heads, len(attention_offsets)),
                                    jnp.float32))[:, idxs],
        wproj=0.2 * jax.random.normal(ks[9], (dim, dim), jnp.float32),
        bproj=0.1 * jax.random.normal(ks[10], (dim, 1), jnp.float32),
    )

    ref = _reference(x, params, num_heads=num_heads, key_dim=key_dim, kernels=kernels)

    # exact-math path (f32 MXU operands): tight structural-correctness check
    out_f32 = cascaded_group_attention(x, params, num_heads=num_heads, key_dim=key_dim,
                                       kernels=kernels, mxu_dtype=jnp.float32)
    out_f32 = jax.block_until_ready(out_f32)
    assert out_f32.shape == (B, dim, H, W)
    err_f32 = float(jnp.max(jnp.abs(out_f32 - ref)))
    assert jnp.allclose(out_f32, ref, atol=2e-2, rtol=2e-2), \
        f"f32-path mismatch vs reference (max abs err {err_f32})"

    # fast path (bf16 MXU operands, f32 accumulation + approx reciprocal): loose
    # sanity check relative to the output scale (structural check done above).
    out_bf16 = cascaded_group_attention(x, params, num_heads=num_heads, key_dim=key_dim,
                                        kernels=kernels, mxu_dtype=jnp.bfloat16)
    out_bf16 = jax.block_until_ready(out_bf16)
    ref_scale = float(jnp.max(jnp.abs(ref)))
    err_bf16 = float(jnp.max(jnp.abs(out_bf16 - ref)))
    assert err_bf16 < 0.1 * max(ref_scale, 1.0), \
        f"bf16-path mismatch vs reference (max abs err {err_bf16}, scale {ref_scale})"

    print("KERNEL_OK")
</pallas_src>

<mosaic_0001>
module attributes {stable_mosaic.version = 11 : i64} {
  func.func @_cga_kernel(%arg0: i32, %arg1: memref<1x32x128xf32, #tpu.memory_space<vmem>>, %arg2: memref<4x24x8xf32, #tpu.memory_space<vmem>>, %arg3: memref<4x24x1xf32, #tpu.memory_space<vmem>>, %arg4: memref<100x8x128xf32, #tpu.memory_space<vmem>>, %arg5: memref<4x8x1xf32, #tpu.memory_space<vmem>>, %arg6: memref<4x128x128xf32, #tpu.memory_space<vmem>>, %arg7: memref<4x32x8xf32, #tpu.memory_space<vmem>>, %arg8: memref<32x1xf32, #tpu.memory_space<vmem>>, %arg9: memref<1x32x128xf32, #tpu.memory_space<vmem>>) attributes {dimension_semantics = [#tpu.dimension_semantics<parallel>], iteration_bounds = array<i64: 4>, scalar_prefetch = 0 : i64, scratch_operands = 0 : i64, tpu.core_type = #tpu.core_type<tc>, window_params = [{transform_indices = @transform_0, window_bounds = array<i64: 1, 32, 128>}, {pipeline_mode = #tpu.pipeline_mode<synchronous>, transform_indices = @transform_1, window_bounds = array<i64: 4, 24, 8>}, {pipeline_mode = #tpu.pipeline_mode<synchronous>, transform_indices = @transform_2, window_bounds = array<i64: 4, 24, 1>}, {pipeline_mode = #tpu.pipeline_mode<synchronous>, transform_indices = @transform_3, window_bounds = array<i64: 100, 8, 128>}, {pipeline_mode = #tpu.pipeline_mode<synchronous>, transform_indices = @transform_4, window_bounds = array<i64: 4, 8, 1>}, {pipeline_mode = #tpu.pipeline_mode<synchronous>, transform_indices = @transform_5, window_bounds = array<i64: 4, 128, 128>}, {pipeline_mode = #tpu.pipeline_mode<synchronous>, transform_indices = @transform_6, window_bounds = array<i64: 4, 32, 8>}, {pipeline_mode = #tpu.pipeline_mode<synchronous>, transform_indices = @transform_7, window_bounds = array<i64: 32, 1>}, {transform_indices = @transform_8, window_bounds = array<i64: 1, 32, 128>}]} {
    %c0 = arith.constant 0 : index
    %c0_0 = arith.constant 0 : index
    %c0_1 = arith.constant 0 : index
    %0 = vector.load %arg1[%c0, %c0_0, %c0_1] : memref<1x32x128xf32, #tpu.memory_space<vmem>>, vector<1x32x128xf32>
    %1 = vector.shape_cast %0 : vector<1x32x128xf32> to vector<32x128xf32>
    %2 = vector.extract_strided_slice %1 {offsets = [0, 0], sizes = [8, 128], strides = [1, 1]} : vector<32x128xf32> to vector<8x128xf32>
    %c0_2 = arith.constant 0 : index
    %c0_3 = arith.constant 0 : index
    %c0_4 = arith.constant 0 : index
    %3 = vector.load %arg2[%c0_2, %c0_3, %c0_4] : memref<4x24x8xf32, #tpu.memory_space<vmem>>, vector<1x24x8xf32>
    %4 = vector.shape_cast %3 : vector<1x24x8xf32> to vector<24x8xf32>
    %cst = arith.constant dense<0.000000e+00> : vector<24x128xf32>
    %5 = tpu.matmul %4, %2, %cst {dimension_numbers = #tpu.dot_dimension_numbers<[1], [0], [0], [1], [0, 0, 1, 1], [], []>} : vector<24x8xf32>, vector<8x128xf32>, vector<24x128xf32> -> vector<24x128xf32>
    %c0_5 = arith.constant 0 : index
    %c0_6 = arith.constant 0 : index
    %c0_7 = arith.constant 0 : index
    %6 = vector.load %arg3[%c0_5, %c0_6, %c0_7] : memref<4x24x1xf32, #tpu.memory_space<vmem>>, vector<1x24x1xf32>
    %7 = vector.shape_cast %6 : vector<1x24x1xf32> to vector<24x1xf32>
    %8 = vector.broadcast %7 : vector<24x1xf32> to vector<24x128xf32>
    %9 = arith.addf %5, %8 : vector<24x128xf32>
    %10 = vector.extract_strided_slice %9 {offsets = [0, 0], sizes = [8, 128], strides = [1, 1]} : vector<24x128xf32> to vector<8x128xf32>
    %11 = vector.extract_strided_slice %9 {offsets = [8, 0], sizes = [8, 128], strides = [1, 1]} : vector<24x128xf32> to vector<8x128xf32>
    %12 = vector.extract_strided_slice %9 {offsets = [16, 0], sizes = [8, 128], strides = [1, 1]} : vector<24x128xf32> to vector<8x128xf32>
    %c18_i32 = arith.constant 18 : i32
    %13 = tpu.dynamic_rotate %10 by %c18_i32 dim 1 : vector<8x128xf32>, i32 -> vector<8x128xf32>
    %c0_8 = arith.constant 0 : index
    %c0_9 = arith.constant 0 : index
    %c0_10 = arith.constant 0 : index
    %14 = vector.load %arg4[%c0_8, %c0_9, %c0_10] : memref<100x8x128xf32, #tpu.memory_space<vmem>>, vector<1x8x128xf32>
    %15 = vector.shape_cast %14 : vector<1x8x128xf32> to vector<8x128xf32>
    %16 = arith.mulf %15, %13 : vector<8x128xf32>
    %c17_i32 = arith.constant 17 : i32
    %17 = tpu.dynamic_rotate %10 by %c17_i32 dim 1 : vector<8x128xf32>, i32 -> vector<8x128xf32>
    %c1 = arith.constant 1 : index
    %c0_11 = arith.constant 0 : index
    %c0_12 = arith.constant 0 : index
    %18 = vector.load %arg4[%c1, %c0_11, %c0_12] : memref<100x8x128xf32, #tpu.memory_space<vmem>>, vector<1x8x128xf32>
    %19 = vector.shape_cast %18 : vector<1x8x128xf32> to vector<8x128xf32>
    %20 = arith.mulf %19, %17 : vector<8x128xf32>
    %21 = arith.addf %16, %20 : vector<8x128xf32>
    %c16_i32 = arith.constant 16 : i32
    %22 = tpu.dynamic_rotate %10 by %c16_i32 dim 1 : vector<8x128xf32>, i32 -> vector<8x128xf32>
    %c2 = arith.constant 2 : index
    %c0_13 = arith.constant 0 : index
    %c0_14 = arith.constant 0 : index
    %23 = vector.load %arg4[%c2, %c0_13, %c0_14] : memref<100x8x128xf32, #tpu.memory_space<vmem>>, vector<1x8x128xf32>
    %24 = vector.shape_cast %23 : vector<1x8x128xf32> to vector<8x128xf32>
    %25 = arith.mulf %24, %22 : vector<8x128xf32>
    %26 = arith.addf %21, %25 : vector<8x128xf32>
    %c15_i32 = arith.constant 15 : i32
    %27 = tpu.dynamic_rotate %10 by %c15_i32 dim 1 : vector<8x128xf32>, i32 -> vector<8x128xf32>
    %c3 = arith.constant 3 : index
    %c0_15 = arith.constant 0 : index
    %c0_16 = arith.constant 0 : index
    %28 = vector.load %arg4[%c3, %c0_15, %c0_16] : memref<100x8x128xf32, #tpu.memory_space<vmem>>, vector<1x8x128xf32>
    %29 = vector.shape_cast %28 : vector<1x8x128xf32> to vector<8x128xf32>
    %30 = arith.mulf %29, %27 : vector<8x128xf32>
    %31 = arith.addf %26, %30 : vector<8x128xf32>
    %c14_i32 = arith.constant 14 : i32
    %32 = tpu.dynamic_rotate %10 by %c14_i32 dim 1 : vector<8x128xf32>, i32 -> vector<8x128xf32>
    %c4 = arith.constant 4 : index
    %c0_17 = arith.constant 0 : index
    %c0_18 = arith.constant 0 : index
    %33 = vector.load %arg4[%c4, %c0_17, %c0_18] : memref<100x8x128xf32, #tpu.memory_space<vmem>>, vector<1x8x128xf32>
    %34 = vector.shape_cast %33 : vector<1x8x128xf32> to vector<8x128xf32>
    %35 = arith.mulf %34, %32 : vector<8x128xf32>
    %36 = arith.addf %31, %35 : vector<8x128xf32>
    %c10_i32 = arith.constant 10 : i32
    %37 = tpu.dynamic_rotate %10 by %c10_i32 dim 1 : vector<8x128xf32>, i32 -> vector<8x128xf32>
    %c5 = arith.constant 5 : index
    %c0_19 = arith.constant 0 : index
    %c0_20 = arith.constant 0 : index
    %38 = vector.load %arg4[%c5, %c0_19, %c0_20] : memref<100x8x128xf32, #tpu.memory_space<vmem>>, vector<1x8x128xf32>
    %39 = vector.shape_cast %38 : vector<1x8x128xf32> to vector<8x128xf32>
    %40 = arith.mulf %39, %37 : vector<8x128xf32>
    %41 = arith.addf %36, %40 : vector<8x128xf32>
    %c9_i32 = arith.constant 9 : i32
    %42 = tpu.dynamic_rotate %10 by %c9_i32 dim 1 : vector<8x128xf32>, i32 -> vector<8x128xf32>
    %c6 = arith.constant 6 : index
    %c0_21 = arith.constant 0 : index
    %c0_22 = arith.constant 0 : index
    %43 = vector.load %arg4[%c6, %c0_21, %c0_22] : memref<100x8x128xf32, #tpu.memory_space<vmem>>, vector<1x8x128xf32>
    %44 = vector.shape_cast %43 : vector<1x8x128xf32> to vector<8x128xf32>
    %45 = arith.mulf %44, %42 : vector<8x128xf32>
    %46 = arith.addf %41, %45 : vector<8x128xf32>
    %c8_i32 = arith.constant 8 : i32
    %47 = tpu.dynamic_rotate %10 by %c8_i32 dim 1 : vector<8x128xf32>, i32 -> vector<8x128xf32>
    %c7 = arith.constant 7 : index
    %c0_23 = arith.constant 0 : index
    %c0_24 = arith.constant 0 : index
    %48 = vector.load %arg4[%c7, %c0_23, %c0_24] : memref<100x8x128xf32, #tpu.memory_space<vmem>>, vector<1x8x128xf32>
    %49 = vector.shape_cast %48 : vector<1x8x128xf32> to vector<8x128xf32>
    %50 = arith.mulf %49, %47 : vector<8x128xf32>
    %51 = arith.addf %46, %50 : vector<8x128xf32>
    %c7_i32 = arith.constant 7 : i32
    %52 = tpu.dynamic_rotate %10 by %c7_i32 dim 1 : vector<8x128xf32>, i32 -> vector<8x128xf32>
    %c8 = arith.constant 8 : index
    %c0_25 = arith.constant 0 : index
    %c0_26 = arith.constant 0 : index
    %53 = vector.load %arg4[%c8, %c0_25, %c0_26] : memref<100x8x128xf32, #tpu.memory_space<vmem>>, vector<1x8x128xf32>
    %54 = vector.shape_cast %53 : vector<1x8x128xf32> to vector<8x128xf32>
    %55 = arith.mulf %54, %52 : vector<8x128xf32>
    %56 = arith.addf %51, %55 : vector<8x128xf32>
    %c6_i32 = arith.constant 6 : i32
    %57 = tpu.dynamic_rotate %10 by %c6_i32 dim 1 : vector<8x128xf32>, i32 -> vector<8x128xf32>
    %c9 = arith.constant 9 : index
    %c0_27 = arith.constant 0 : index
    %c0_28 = arith.constant 0 : index
    %58 = vector.load %arg4[%c9, %c0_27, %c0_28] : memref<100x8x128xf32, #tpu.memory_space<vmem>>, vector<1x8x128xf32>
    %59 = vector.shape_cast %58 : vector<1x8x128xf32> to vector<8x128xf32>
    %60 = arith.mulf %59, %57 : vector<8x128xf32>
    %61 = arith.addf %56, %60 : vector<8x128xf32>
    %c2_i32 = arith.constant 2 : i32
    %62 = tpu.dynamic_rotate %10 by %c2_i32 dim 1 : vector<8x128xf32>, i32 -> vector<8x128xf32>
    %c10 = arith.constant 10 : index
    %c0_29 = arith.constant 0 : index
    %c0_30 = arith.constant 0 : index
    %63 = vector.load %arg4[%c10, %c0_29, %c0_30] : memref<100x8x128xf32, #tpu.memory_space<vmem>>, vector<1x8x128xf32>
    %64 = vector.shape_cast %63 : vector<1x8x128xf32> to vector<8x128xf32>
    %65 = arith.mulf %64, %62 : vector<8x128xf32>
    %66 = arith.addf %61, %65 : vector<8x128xf32>
    %c1_i32 = arith.constant 1 : i32
    %67 = tpu.dynamic_rotate %10 by %c1_i32 dim 1 : vector<8x128xf32>, i32 -> vector<8x128xf32>
    %c11 = arith.constant 11 : index
    %c0_31 = arith.constant 0 : index
    %c0_32 = arith.constant 0 : index
    %68 = vector.load %arg4[%c11, %c0_31, %c0_32] : memref<100x8x128xf32, #tpu.memory_space<vmem>>, vector<1x8x128xf32>
    %69 = vector.shape_cast %68 : vector<1x8x128xf32> to vector<8x128xf32>
    %70 = arith.mulf %69, %67 : vector<8x128xf32>
    %71 = arith.addf %66, %70 : vector<8x128xf32>
    %c12 = arith.constant 12 : index
    %c0_33 = arith.constant 0 : index
    %c0_34 = arith.constant 0 : index
    %72 = vector.load %arg4[%c12, %c0_33, %c0_34] : memref<100x8x128xf32, #tpu.memory_space<vmem>>, vector<1x8x128xf32>
    %73 = vector.shape_cast %72 : vector<1x8x128xf32> to vector<8x128xf32>
    %74 = arith.mulf %73, %10 : vector<8x128xf32>
    %75 = arith.addf %71, %74 : vector<8x128xf32>
    %c127_i32 = arith.constant 127 : i32
    %76 = tpu.dynamic_rotate %10 by %c127_i32 dim 1 : vector<8x128xf32>, i32 -> vector<8x128xf32>
    %c13 = arith.constant 13 : index
    %c0_35 = arith.constant 0 : index
    %c0_36 = arith.constant 0 : index
    %77 = vector.load %arg4[%c13, %c0_35, %c0_36] : memref<100x8x128xf32, #tpu.memory_space<vmem>>, vector<1x8x128xf32>
    %78 = vector.shape_cast %77 : vector<1x8x128xf32> to vector<8x128xf32>
    %79 = arith.mulf %78, %76 : vector<8x128xf32>
    %80 = arith.addf %75, %79 : vector<8x128xf32>
    %c126_i32 = arith.constant 126 : i32
    %81 = tpu.dynamic_rotate %10 by %c126_i32 dim 1 : vector<8x128xf32>, i32 -> vector<8x128xf32>
    %c14 = arith.constant 14 : index
    %c0_37 = arith.constant 0 : index
    %c0_38 = arith.constant 0 : index
    %82 = vector.load %arg4[%c14, %c0_37, %c0_38] : memref<100x8x128xf32, #tpu.memory_space<vmem>>, vector<1x8x128xf32>
    %83 = vector.shape_cast %82 : vector<1x8x128xf32> to vector<8x128xf32>
    %84 = arith.mulf %83, %81 : vector<8x128xf32>
    %85 = arith.addf %80, %84 : vector<8x128xf32>
    %c122_i32 = arith.constant 122 : i32
    %86 = tpu.dynamic_rotate %10 by %c122_i32 dim 1 : vector<8x128xf32>, i32 -> vector<8x128xf32>
    %c15 = arith.constant 15 : index
    %c0_39 = arith.constant 0 : index
    %c0_40 = arith.constant 0 : index
    %87 = vector.load %arg4[%c15, %c0_39, %c0_40] : memref<100x8x128xf32, #tpu.memory_space<vmem>>, vector<1x8x128xf32>
    %88 = vector.shape_cast %87 : vector<1x8x128xf32> to vector<8x128xf32>
    %89 = arith.mulf %88, %86 : vector<8x128xf32>
    %90 = arith.addf %85, %89 : vector<8x128xf32>
    %c121_i32 = arith.constant 121 : i32
    %91 = tpu.dynamic_rotate %10 by %c121_i32 dim 1 : vector<8x128xf32>, i32 -> vector<8x128xf32>
    %c16 = arith.constant 16 : index
    %c0_41 = arith.constant 0 : index
    %c0_42 = arith.constant 0 : index
    %92 = vector.load %arg4[%c16, %c0_41, %c0_42] : memref<100x8x128xf32, #tpu.memory_space<vmem>>, vector<1x8x128xf32>
    %93 = vector.shape_cast %92 : vector<1x8x128xf32> to vector<8x128xf32>
    %94 = arith.mulf %93, %91 : vector<8x128xf32>
    %95 = arith.addf %90, %94 : vector<8x128xf32>
    %c120_i32 = arith.constant 120 : i32
    %96 = tpu.dynamic_rotate %10 by %c120_i32 dim 1 : vector<8x128xf32>, i32 -> vector<8x128xf32>
    %c17 = arith.constant 17 : index
    %c0_43 = arith.constant 0 : index
    %c0_44 = arith.constant 0 : index
    %97 = vector.load %arg4[%c17, %c0_43, %c0_44] : memref<100x8x128xf32, #tpu.memory_space<vmem>>, vector<1x8x128xf32>
    %98 = vector.shape_cast %97 : vector<1x8x128xf32> to vector<8x128xf32>
    %99 = arith.mulf %98, %96 : vector<8x128xf32>
    %100 = arith.addf %95, %99 : vector<8x128xf32>
    %c119_i32 = arith.constant 119 : i32
    %101 = tpu.dynamic_rotate %10 by %c119_i32 dim 1 : vector<8x128xf32>, i32 -> vector<8x128xf32>
    %c18 = arith.constant 18 : index
    %c0_45 = arith.constant 0 : index
    %c0_46 = arith.constant 0 : index
    %102 = vector.load %arg4[%c18, %c0_45, %c0_46] : memref<100x8x128xf32, #tpu.memory_space<vmem>>, vector<1x8x128xf32>
    %103 = vector.shape_cast %102 : vector<1x8x128xf32> to vector<8x128xf32>
    %104 = arith.mulf %103, %101 : vector<8x128xf32>
    %105 = arith.addf %100, %104 : vector<8x128xf32>
    %c118_i32 = arith.constant 118 : i32
    %106 = tpu.dynamic_rotate %10 by %c118_i32 dim 1 : vector<8x128xf32>, i32 -> vector<8x128xf32>
    %c19 = arith.constant 19 : index
    %c0_47 = arith.constant 0 : index
    %c0_48 = arith.constant 0 : index
    %107 = vector.load %arg4[%c19, %c0_47, %c0_48] : memref<100x8x128xf32, #tpu.memory_space<vmem>>, vector<1x8x128xf32>
    %108 = vector.shape_cast %107 : vector<1x8x128xf32> to vector<8x128xf32>
    %109 = arith.mulf %108, %106 : vector<8x128xf32>
    %110 = arith.addf %105, %109 : vector<8x128xf32>
    %c114_i32 = arith.constant 114 : i32
    %111 = tpu.dynamic_rotate %10 by %c114_i32 dim 1 : vector<8x128xf32>, i32 -> vector<8x128xf32>
    %c20 = arith.constant 20 : index
    %c0_49 = arith.constant 0 : index
    %c0_50 = arith.constant 0 : index
    %112 = vector.load %arg4[%c20, %c0_49, %c0_50] : memref<100x8x128xf32, #tpu.memory_space<vmem>>, vector<1x8x128xf32>
    %113 = vector.shape_cast %112 : vector<1x8x128xf32> to vector<8x128xf32>
    %114 = arith.mulf %113, %111 : vector<8x128xf32>
    %115 = arith.addf %110, %114 : vector<8x128xf32>
    %c113_i32 = arith.constant 113 : i32
    %116 = tpu.dynamic_rotate %10 by %c113_i32 dim 1 : vector<8x128xf32>, i32 -> vector<8x128xf32>
    %c21 = arith.constant 21 : index
    %c0_51 = arith.constant 0 : index
    %c0_52 = arith.constant 0 : index
    %117 = vector.load %arg4[%c21, %c0_51, %c0_52] : memref<100x8x128xf32, #tpu.memory_space<vmem>>, vector<1x8x128xf32>
    %118 = vector.shape_cast %117 : vector<1x8x128xf32> to vector<8x128xf32>
    %119 = arith.mulf %118, %116 : vector<8x128xf32>
    %120 = arith.addf %115, %119 : vector<8x128xf32>
    %c112_i32 = arith.constant 112 : i32
    %121 = tpu.dynamic_rotate %10 by %c112_i32 dim 1 : vector<8x128xf32>, i32 -> vector<8x128xf32>
    %c22 = arith.constant 22 : index
    %c0_53 = arith.constant 0 : index
    %c0_54 = arith.constant 0 : index
    %122 = vector.load %arg4[%c22, %c0_53, %c0_54] : memref<100x8x128xf32, #tpu.memory_space<vmem>>, vector<1x8x128xf32>
    %123 = vector.shape_cast %122 : vector<1x8x128xf32> to vector<8x128xf32>
    %124 = arith.mulf %123, %121 : vector<8x128xf32>
    %125 = arith.addf %120, %124 : vector<8x128xf32>
    %c111_i32 = arith.constant 111 : i32
    %126 = tpu.dynamic_rotate %10 by %c111_i32 dim 1 : vector<8x128xf32>, i32 -> vector<8x128xf32>
    %c23 = arith.constant 23 : index
    %c0_55 = arith.constant 0 : index
    %c0_56 = arith.constant 0 : index
    %127 = vector.load %arg4[%c23, %c0_55, %c0_56] : memref<100x8x128xf32, #tpu.memory_space<vmem>>, vector<1x8x128xf32>
    %128 = vector.shape_cast %127 : vector<1x8x128xf32> to vector<8x128xf32>
    %129 = arith.mulf %128, %126 : vector<8x128xf32>
    %130 = arith.addf %125, %129 : vector<8x128xf32>
    %c110_i32 = arith.constant 110 : i32
    %131 = tpu.dynamic_rotate %10 by %c110_i32 dim 1 : vector<8x128xf32>, i32 -> vector<8x128xf32>
    %c24 = arith.constant 24 : index
    %c0_57 = arith.constant 0 : index
    %c0_58 = arith.constant 0 : index
    %132 = vector.load %arg4[%c24, %c0_57, %c0_58] : memref<100x8x128xf32, #tpu.memory_space<vmem>>, vector<1x8x128xf32>
    %133 = vector.shape_cast %132 : vector<1x8x128xf32> to vector<8x128xf32>
    %134 = arith.mulf %133, %131 : vector<8x128xf32>
    %135 = arith.addf %130, %134 : vector<8x128xf32>
    %c0_59 = arith.constant 0 : index
    %c0_60 = arith.constant 0 : index
    %c0_61 = arith.constant 0 : index
    %136 = vector.load %arg5[%c0_59, %c0_60, %c0_61] : memref<4x8x1xf32, #tpu.memory_space<vmem>>, vector<1x8x1xf32>
    %137 = vector.shape_cast %136 : vector<1x8x1xf32> to vector<8x1xf32>
    %138 = vector.broadcast %137 : vector<8x1xf32> to vector<8x128xf32>
    %139 = arith.addf %135, %138 : vector<8x128xf32>
    %cst_62 = arith.constant dense<0.000000e+00> : vector<128x128xf32>
    %140 = tpu.matmul %139, %11, %cst_62 {dimension_numbers = #tpu.dot_dimension_numbers<[0], [0], [1], [1], [0, 1, 1, 1], [], []>} : vector<8x128xf32>, vector<8x128xf32>, vector<128x128xf32> -> vector<128x128xf32>
    %cst_63 = arith.constant 0.353553385 : f32
    %141 = vector.broadcast %cst_63 : f32 to vector<128x128xf32>
    %142 = arith.mulf %140, %141 : vector<128x128xf32>
    %c0_64 = arith.constant 0 : index
    %c0_65 = arith.constant 0 : index
    %c0_66 = arith.constant 0 : index
    %143 = vector.load %arg6[%c0_64, %c0_65, %c0_66] : memref<4x128x128xf32, #tpu.memory_space<vmem>>, vector<1x128x128xf32>
    %144 = vector.shape_cast %143 : vector<1x128x128xf32> to vector<128x128xf32>
    %145 = arith.addf %142, %144 : vector<128x128xf32>
    %cst_67 = arith.constant dense<0xFF800000> : vector<128xf32>
    %146 = vector.multi_reduction <maximumf>, %145, %cst_67 [1] : vector<128x128xf32> to vector<128xf32>
    %147 = vector.shape_cast %146 : vector<128xf32> to vector<128x1xf32>
    %148 = vector.broadcast %147 : vector<128x1xf32> to vector<128x128xf32>
    %149 = arith.subf %145, %148 : vector<128x128xf32>
    %150 = math.exp %149 : vector<128x128xf32>
    %cst_68 = arith.constant dense<0.000000e+00> : vector<128xf32>
    %151 = vector.multi_reduction <add>, %150, %cst_68 [1] : vector<128x128xf32> to vector<128xf32>
    %152 = vector.shape_cast %151 : vector<128xf32> to vector<128x1xf32>
    %153 = tpu.reciprocal %152 {approx = true} : vector<128x1xf32> -> vector<128x1xf32>
    %154 = vector.broadcast %153 : vector<128x1xf32> to vector<128x128xf32>
    %155 = arith.mulf %150, %154 : vector<128x128xf32>
    %cst_69 = arith.constant dense<0.000000e+00> : vector<8x128xf32>
    %156 = tpu.matmul %12, %155, %cst_69 {dimension_numbers = #tpu.dot_dimension_numbers<[1], [1], [0], [0], [0, 0, 1, 0], [], []>} : vector<8x128xf32>, vector<128x128xf32>, vector<8x128xf32> -> vector<8x128xf32>
    %c0_70 = arith.constant 0 : index
    %c0_71 = arith.constant 0 : index
    %c0_72 = arith.constant 0 : index
    %157 = vector.load %arg7[%c0_70, %c0_71, %c0_72] : memref<4x32x8xf32, #tpu.memory_space<vmem>>, vector<1x32x8xf32>
    %158 = vector.shape_cast %157 : vector<1x32x8xf32> to vector<32x8xf32>
    %cst_73 = arith.constant 0.000000e+00 : f32
    %159 = vector.broadcast %cst_73 : f32 to vector<8x128xf32>
    %160 = arith.maximumf %156, %159 : vector<8x128xf32>
    %cst_74 = arith.constant dense<0.000000e+00> : vector<32x128xf32>
    %161 = tpu.matmul %158, %160, %cst_74 {dimension_numbers = #tpu.dot_dimension_numbers<[1], [0], [0], [1], [0, 0, 1, 1], [], []>} : vector<32x8xf32>, vector<8x128xf32>, vector<32x128xf32> -> vector<32x128xf32>
    %162 = vector.extract_strided_slice %1 {offsets = [8, 0], sizes = [8, 128], strides = [1, 1]} : vector<32x128xf32> to vector<8x128xf32>
    %163 = arith.addf %156, %162 : vector<8x128xf32>
    %c1_75 = arith.constant 1 : index
    %c0_76 = arith.constant 0 : index
    %c0_77 = arith.constant 0 : index
    %164 = vector.load %arg2[%c1_75, %c0_76, %c0_77] : memref<4x24x8xf32, #tpu.memory_space<vmem>>, vector<1x24x8xf32>
    %165 = vector.shape_cast %164 : vector<1x24x8xf32> to vector<24x8xf32>
    %cst_78 = arith.constant dense<0.000000e+00> : vector<24x128xf32>
    %166 = tpu.matmul %165, %163, %cst_78 {dimension_numbers = #tpu.dot_dimension_numbers<[1], [0], [0], [1], [0, 0, 1, 1], [], []>} : vector<24x8xf32>, vector<8x128xf32>, vector<24x128xf32> -> vector<24x128xf32>
    %c1_79 = arith.constant 1 : index
    %c0_80 = arith.constant 0 : index
    %c0_81 = arith.constant 0 : index
    %167 = vector.load %arg3[%c1_79, %c0_80, %c0_81] : memref<4x24x1xf32, #tpu.memory_space<vmem>>, vector<1x24x1xf32>
    %168 = vector.shape_cast %167 : vector<1x24x1xf32> to vector<24x1xf32>
    %169 = vector.broadcast %168 : vector<24x1xf32> to vector<24x128xf32>
    %170 = arith.addf %166, %169 : vector<24x128xf32>
    %171 = vector.extract_strided_slice %170 {offsets = [0, 0], sizes = [8, 128], strides = [1, 1]} : vector<24x128xf32> to vector<8x128xf32>
    %172 = vector.extract_strided_slice %170 {offsets = [8, 0], sizes = [8, 128], strides = [1, 1]} : vector<24x128xf32> to vector<8x128xf32>
    %173 = vector.extract_strided_slice %170 {offsets = [16, 0], sizes = [8, 128], strides = [1, 1]} : vector<24x128xf32> to vector<8x128xf32>
    %c18_i32_82 = arith.constant 18 : i32
    %174 = tpu.dynamic_rotate %171 by %c18_i32_82 dim 1 : vector<8x128xf32>, i32 -> vector<8x128xf32>
    %c25 = arith.constant 25 : index
    %c0_83 = arith.constant 0 : index
    %c0_84 = arith.constant 0 : index
    %175 = vector.load %arg4[%c25, %c0_83, %c0_84] : memref<100x8x128xf32, #tpu.memory_space<vmem>>, vector<1x8x128xf32>
    %176 = vector.shape_cast %175 : vector<1x8x128xf32> to vector<8x128xf32>
    %177 = arith.mulf %176, %174 : vector<8x128xf32>
    %c17_i32_85 = arith.constant 17 : i32
    %178 = tpu.dynamic_rotate %171 by %c17_i32_85 dim 1 : vector<8x128xf32>, i32 -> vector<8x128xf32>
    %c26 = arith.constant 26 : index
    %c0_86 = arith.constant 0 : index
    %c0_87 = arith.constant 0 : index
    %179 = vector.load %arg4[%c26, %c0_86, %c0_87] : memref<100x8x128xf32, #tpu.memory_space<vmem>>, vector<1x8x128xf32>
    %180 = vector.shape_cast %179 : vector<1x8x128xf32> to vector<8x128xf32>
    %181 = arith.mulf %180, %178 : vector<8x128xf32>
    %182 = arith.addf %177, %181 : vector<8x128xf32>
    %c16_i32_88 = arith.constant 16 : i32
    %183 = tpu.dynamic_rotate %171 by %c16_i32_88 dim 1 : vector<8x128xf32>, i32 -> vector<8x128xf32>
    %c27 = arith.constant 27 : index
    %c0_89 = arith.constant 0 : index
    %c0_90 = arith.constant 0 : index
    %184 = vector.load %arg4[%c27, %c0_89, %c0_90] : memref<100x8x128xf32, #tpu.memory_space<vmem>>, vector<1x8x128xf32>
    %185 = vector.shape_cast %184 : vector<1x8x128xf32> to vector<8x128xf32>
    %186 = arith.mulf %185, %183 : vector<8x128xf32>
    %187 = arith.addf %182, %186 : vector<8x128xf32>
    %c15_i32_91 = arith.constant 15 : i32
    %188 = tpu.dynamic_rotate %171 by %c15_i32_91 dim 1 : vector<8x128xf32>, i32 -> vector<8x128xf32>
    %c28 = arith.constant 28 : index
    %c0_92 = arith.constant 0 : index
    %c0_93 = arith.constant 0 : index
    %189 = vector.load %arg4[%c28, %c0_92, %c0_93] : memref<100x8x128xf32, #tpu.memory_space<vmem>>, vector<1x8x128xf32>
    %190 = vector.shape_cast %189 : vector<1x8x128xf32> to vector<8x128xf32>
    %191 = arith.mulf %190, %188 : vector<8x128xf32>
    %192 = arith.addf %187, %191 : vector<8x128xf32>
    %c14_i32_94 = arith.constant 14 : i32
    %193 = tpu.dynamic_rotate %171 by %c14_i32_94 dim 1 : vector<8x128xf32>, i32 -> vector<8x128xf32>
    %c29 = arith.constant 29 : index
    %c0_95 = arith.constant 0 : index
    %c0_96 = arith.constant 0 : index
    %194 = vector.load %arg4[%c29, %c0_95, %c0_96] : memref<100x8x128xf32, #tpu.memory_space<vmem>>, vector<1x8x128xf32>
    %195 = vector.shape_cast %194 : vector<1x8x128xf32> to vector<8x128xf32>
    %196 = arith.mulf %195, %193 : vector<8x128xf32>
    %197 = arith.addf %192, %196 : vector<8x128xf32>
    %c10_i32_97 = arith.constant 10 : i32
    %198 = tpu.dynamic_rotate %171 by %c10_i32_97 dim 1 : vector<8x128xf32>, i32 -> vector<8x128xf32>
    %c30 = arith.constant 30 : index
    %c0_98 = arith.constant 0 : index
    %c0_99 = arith.constant 0 : index
    %199 = vector.load %arg4[%c30, %c0_98, %c0_99] : memref<100x8x128xf32, #tpu.memory_space<vmem>>, vector<1x8x128xf32>
    %200 = vector.shape_cast %199 : vector<1x8x128xf32> to vector<8x128xf32>
    %201 = arith.mulf %200, %198 : vector<8x128xf32>
    %202 = arith.addf %197, %201 : vector<8x128xf32>
    %c9_i32_100 = arith.constant 9 : i32
    %203 = tpu.dynamic_rotate %171 by %c9_i32_100 dim 1 : vector<8x128xf32>, i32 -> vector<8x128xf32>
    %c31 = arith.constant 31 : index
    %c0_101 = arith.constant 0 : index
    %c0_102 = arith.constant 0 : index
    %204 = vector.load %arg4[%c31, %c0_101, %c0_102] : memref<100x8x128xf32, #tpu.memory_space<vmem>>, vector<1x8x128xf32>
    %205 = vector.shape_cast %204 : vector<1x8x128xf32> to vector<8x128xf32>
    %206 = arith.mulf %205, %203 : vector<8x128xf32>
    %207 = arith.addf %202, %206 : vector<8x128xf32>
    %c8_i32_103 = arith.constant 8 : i32
    %208 = tpu.dynamic_rotate %171 by %c8_i32_103 dim 1 : vector<8x128xf32>, i32 -> vector<8x128xf32>
    %c32 = arith.constant 32 : index
    %c0_104 = arith.constant 0 : index
    %c0_105 = arith.constant 0 : index
    %209 = vector.load %arg4[%c32, %c0_104, %c0_105] : memref<100x8x128xf32, #tpu.memory_space<vmem>>, vector<1x8x128xf32>
    %210 = vector.shape_cast %209 : vector<1x8x128xf32> to vector<8x128xf32>
    %211 = arith.mulf %210, %208 : vector<8x128xf32>
    %212 = arith.addf %207, %211 : vector<8x128xf32>
    %c7_i32_106 = arith.constant 7 : i32
    %213 = tpu.dynamic_rotate %171 by %c7_i32_106 dim 1 : vector<8x128xf32>, i32 -> vector<8x128xf32>
    %c33 = arith.constant 33 : index
    %c0_107 = arith.constant 0 : index
    %c0_108 = arith.constant 0 : index
    %214 = vector.load %arg4[%c33, %c0_107, %c0_108] : memref<100x8x128xf32, #tpu.memory_space<vmem>>, vector<1x8x128xf32>
    %215 = vector.shape_cast %214 : vector<1x8x128xf32> to vector<8x128xf32>
    %216 = arith.mulf %215, %213 : vector<8x128xf32>
    %217 = arith.addf %212, %216 : vector<8x128xf32>
    %c6_i32_109 = arith.constant 6 : i32
    %218 = tpu.dynamic_rotate %171 by %c6_i32_109 dim 1 : vector<8x128xf32>, i32 -> vector<8x128xf32>
    %c34 = arith.constant 34 : index
    %c0_110 = arith.constant 0 : index
    %c0_111 = arith.constant 0 : index
    %219 = vector.load %arg4[%c34, %c0_110, %c0_111] : memref<100x8x128xf32, #tpu.memory_space<vmem>>, vector<1x8x128xf32>
    %220 = vector.shape_cast %219 : vector<1x8x128xf32> to vector<8x128xf32>
    %221 = arith.mulf %220, %218 : vector<8x128xf32>
    %222 = arith.addf %217, %221 : vector<8x128xf32>
    %c2_i32_112 = arith.constant 2 : i32
    %223 = tpu.dynamic_rotate %171 by %c2_i32_112 dim 1 : vector<8x128xf32>, i32 -> vector<8x128xf32>
    %c35 = arith.constant 35 : index
    %c0_113 = arith.constant 0 : index
    %c0_114 = arith.constant 0 : index
    %224 = vector.load %arg4[%c35, %c0_113, %c0_114] : memref<100x8x128xf32, #tpu.memory_space<vmem>>, vector<1x8x128xf32>
    %225 = vector.shape_cast %224 : vector<1x8x128xf32> to vector<8x128xf32>
    %226 = arith.mulf %225, %223 : vector<8x128xf32>
    %227 = arith.addf %222, %226 : vector<8x128xf32>
    %c1_i32_115 = arith.constant 1 : i32
    %228 = tpu.dynamic_rotate %171 by %c1_i32_115 dim 1 : vector<8x128xf32>, i32 -> vector<8x128xf32>
    %c36 = arith.constant 36 : index
    %c0_116 = arith.constant 0 : index
    %c0_117 = arith.constant 0 : index
    %229 = vector.load %arg4[%c36, %c0_116, %c0_117] : memref<100x8x128xf32, #tpu.memory_space<vmem>>, vector<1x8x128xf32>
    %230 = vector.shape_cast %229 : vector<1x8x128xf32> to vector<8x128xf32>
    %231 = arith.mulf %230, %228 : vector<8x128xf32>
    %232 = arith.addf %227, %231 : vector<8x128xf32>
    %c37 = arith.constant 37 : index
    %c0_118 = arith.constant 0 : index
    %c0_119 = arith.constant 0 : index
    %233 = vector.load %arg4[%c37, %c0_118, %c0_119] : memref<100x8x128xf32, #tpu.memory_space<vmem>>, vector<1x8x128xf32>
    %234 = vector.shape_cast %233 : vector<1x8x128xf32> to vector<8x128xf32>
    %235 = arith.mulf %234, %171 : vector<8x128xf32>
    %236 = arith.addf %232, %235 : vector<8x128xf32>
    %c127_i32_120 = arith.constant 127 : i32
    %237 = tpu.dynamic_rotate %171 by %c127_i32_120 dim 1 : vector<8x128xf32>, i32 -> vector<8x128xf32>
    %c38 = arith.constant 38 : index
    %c0_121 = arith.constant 0 : index
    %c0_122 = arith.constant 0 : index
    %238 = vector.load %arg4[%c38, %c0_121, %c0_122] : memref<100x8x128xf32, #tpu.memory_space<vmem>>, vector<1x8x128xf32>
    %239 = vector.shape_cast %238 : vector<1x8x128xf32> to vector<8x128xf32>
    %240 = arith.mulf %239, %237 : vector<8x128xf32>
    %241 = arith.addf %236, %240 : vector<8x128xf32>
    %c126_i32_123 = arith.constant 126 : i32
    %242 = tpu.dynamic_rotate %171 by %c126_i32_123 dim 1 : vector<8x128xf32>, i32 -> vector<8x128xf32>
    %c39 = arith.constant 39 : index
    %c0_124 = arith.constant 0 : index
    %c0_125 = arith.constant 0 : index
    %243 = vector.load %arg4[%c39, %c0_124, %c0_125] : memref<100x8x128xf32, #tpu.memory_space<vmem>>, vector<1x8x128xf32>
    %244 = vector.shape_cast %243 : vector<1x8x128xf32> to vector<8x128xf32>
    %245 = arith.mulf %244, %242 : vector<8x128xf32>
    %246 = arith.addf %241, %245 : vector<8x128xf32>
    %c122_i32_126 = arith.constant 122 : i32
    %247 = tpu.dynamic_rotate %171 by %c122_i32_126 dim 1 : vector<8x128xf32>, i32 -> vector<8x128xf32>
    %c40 = arith.constant 40 : index
    %c0_127 = arith.constant 0 : index
    %c0_128 = arith.constant 0 : index
    %248 = vector.load %arg4[%c40, %c0_127, %c0_128] : memref<100x8x128xf32, #tpu.memory_space<vmem>>, vector<1x8x128xf32>
    %249 = vector.shape_cast %248 : vector<1x8x128xf32> to vector<8x128xf32>
    %250 = arith.mulf %249, %247 : vector<8x128xf32>
    %251 = arith.addf %246, %250 : vector<8x128xf32>
    %c121_i32_129 = arith.constant 121 : i32
    %252 = tpu.dynamic_rotate %171 by %c121_i32_129 dim 1 : vector<8x128xf32>, i32 -> vector<8x128xf32>
    %c41 = arith.constant 41 : index
    %c0_130 = arith.constant 0 : index
    %c0_131 = arith.constant 0 : index
    %253 = vector.load %arg4[%c41, %c0_130, %c0_131] : memref<100x8x128xf32, #tpu.memory_space<vmem>>, vector<1x8x128xf32>
    %254 = vector.shape_cast %253 : vector<1x8x128xf32> to vector<8x128xf32>
    %255 = arith.mulf %254, %252 : vector<8x128xf32>
    %256 = arith.addf %251, %255 : vector<8x128xf32>
    %c120_i32_132 = arith.constant 120 : i32
    %257 = tpu.dynamic_rotate %171 by %c120_i32_132 dim 1 : vector<8x128xf32>, i32 -> vector<8x128xf32>
    %c42 = arith.constant 42 : index
    %c0_133 = arith.constant 0 : index
    %c0_134 = arith.constant 0 : index
    %258 = vector.load %arg4[%c42, %c0_133, %c0_134] : memref<100x8x128xf32, #tpu.memory_space<vmem>>, vector<1x8x128xf32>
    %259 = vector.shape_cast %258 : vector<1x8x128xf32> to vector<8x128xf32>
    %260 = arith.mulf %259, %257 : vector<8x128xf32>
    %261 = arith.addf %256, %260 : vector<8x128xf32>
    %c119_i32_135 = arith.constant 119 : i32
    %262 = tpu.dynamic_rotate %171 by %c119_i32_135 dim 1 : vector<8x128xf32>, i32 -> vector<8x128xf32>
    %c43 = arith.constant 43 : index
    %c0_136 = arith.constant 0 : index
    %c0_137 = arith.constant 0 : index
    %263 = vector.load %arg4[%c43, %c0_136, %c0_137] : memref<100x8x128xf32, #tpu.memory_space<vmem>>, vector<1x8x128xf32>
    %264 = vector.shape_cast %263 : vector<1x8x128xf32> to vector<8x128xf32>
    %265 = arith.mulf %264, %262 : vector<8x128xf32>
    %266 = arith.addf %261, %265 : vector<8x128xf32>
    %c118_i32_138 = arith.constant 118 : i32
    %267 = tpu.dynamic_rotate %171 by %c118_i32_138 dim 1 : vector<8x128xf32>, i32 -> vector<8x128xf32>
    %c44 = arith.constant 44 : index
    %c0_139 = arith.constant 0 : index
    %c0_140 = arith.constant 0 : index
    %268 = vector.load %arg4[%c44, %c0_139, %c0_140] : memref<100x8x128xf32, #tpu.memory_space<vmem>>, vector<1x8x128xf32>
    %269 = vector.shape_cast %268 : vector<1x8x128xf32> to vector<8x128xf32>
    %270 = arith.mulf %269, %267 : vector<8x128xf32>
    %271 = arith.addf %266, %270 : vector<8x128xf32>
    %c114_i32_141 = arith.constant 114 : i32
    %272 = tpu.dynamic_rotate %171 by %c114_i32_141 dim 1 : vector<8x128xf32>, i32 -> vector<8x128xf32>
    %c45 = arith.constant 45 : index
    %c0_142 = arith.constant 0 : index
    %c0_143 = arith.constant 0 : index
    %273 = vector.load %arg4[%c45, %c0_142, %c0_143] : memref<100x8x128xf32, #tpu.memory_space<vmem>>, vector<1x8x128xf32>
    %274 = vector.shape_cast %273 : vector<1x8x128xf32> to vector<8x128xf32>
    %275 = arith.mulf %274, %272 : vector<8x128xf32>
    %276 = arith.addf %271, %275 : vector<8x128xf32>
    %c113_i32_144 = arith.constant 113 : i32
    %277 = tpu.dynamic_rotate %171 by %c113_i32_144 dim 1 : vector<8x128xf32>, i32 -> vector<8x128xf32>
    %c46 = arith.constant 46 : index
    %c0_145 = arith.constant 0 : index
    %c0_146 = arith.constant 0 : index
    %278 = vector.load %arg4[%c46, %c0_145, %c0_146] : memref<100x8x128xf32, #tpu.memory_space<vmem>>, vector<1x8x128xf32>
    %279 = vector.shape_cast %278 : vector<1x8x128xf32> to vector<8x128xf32>
    %280 = arith.mulf %279, %277 : vector<8x128xf32>
    %281 = arith.addf %276, %280 : vector<8x128xf32>
    %c112_i32_147 = arith.constant 112 : i32
    %282 = tpu.dynamic_rotate %171 by %c112_i32_147 dim 1 : vector<8x128xf32>, i32 -> vector<8x128xf32>
    %c47 = arith.constant 47 : index
    %c0_148 = arith.constant 0 : index
    %c0_149 = arith.constant 0 : index
    %283 = vector.load %arg4[%c47, %c0_148, %c0_149] : memref<100x8x128xf32, #tpu.memory_space<vmem>>, vector<1x8x128xf32>
    %284 = vector.shape_cast %283 : vector<1x8x128xf32> to vector<8x128xf32>
    %285 = arith.mulf %284, %282 : vector<8x128xf32>
    %286 = arith.addf %281, %285 : vector<8x128xf32>
    %c111_i32_150 = arith.constant 111 : i32
    %287 = tpu.dynamic_rotate %171 by %c111_i32_150 dim 1 : vector<8x128xf32>, i32 -> vector<8x128xf32>
    %c48 = arith.constant 48 : index
    %c0_151 = arith.constant 0 : index
    %c0_152 = arith.constant 0 : index
    %288 = vector.load %arg4[%c48, %c0_151, %c0_152] : memref<100x8x128xf32, #tpu.memory_space<vmem>>, vector<1x8x128xf32>
    %289 = vector.shape_cast %288 : vector<1x8x128xf32> to vector<8x128xf32>
    %290 = arith.mulf %289, %287 : vector<8x128xf32>
    %291 = arith.addf %286, %290 : vector<8x128xf32>
    %c110_i32_153 = arith.constant 110 : i32
    %292 = tpu.dynamic_rotate %171 by %c110_i32_153 dim 1 : vector<8x128xf32>, i32 -> vector<8x128xf32>
    %c49 = arith.constant 49 : index
    %c0_154 = arith.constant 0 : index
    %c0_155 = arith.constant 0 : index
    %293 = vector.load %arg4[%c49, %c0_154, %c0_155] : memref<100x8x128xf32, #tpu.memory_space<vmem>>, vector<1x8x128xf32>
    %294 = vector.shape_cast %293 : vector<1x8x128xf32> to vector<8x128xf32>
    %295 = arith.mulf %294, %292 : vector<8x128xf32>
    %296 = arith.addf %291, %295 : vector<8x128xf32>
    %c1_156 = arith.constant 1 : index
    %c0_157 = arith.constant 0 : index
    %c0_158 = arith.constant 0 : index
    %297 = vector.load %arg5[%c1_156, %c0_157, %c0_158] : memref<4x8x1xf32, #tpu.memory_space<vmem>>, vector<1x8x1xf32>
    %298 = vector.shape_cast %297 : vector<1x8x1xf32> to vector<8x1xf32>
    %299 = vector.broadcast %298 : vector<8x1xf32> to vector<8x128xf32>
    %300 = arith.addf %296, %299 : vector<8x128xf32>
    %cst_159 = arith.constant dense<0.000000e+00> : vector<128x128xf32>
    %301 = tpu.matmul %300, %172, %cst_159 {dimension_numbers = #tpu.dot_dimension_numbers<[0], [0], [1], [1], [0, 1, 1, 1], [], []>} : vector<8x128xf32>, vector<8x128xf32>, vector<128x128xf32> -> vector<128x128xf32>
    %cst_160 = arith.constant 0.353553385 : f32
    %302 = vector.broadcast %cst_160 : f32 to vector<128x128xf32>
    %303 = arith.mulf %301, %302 : vector<128x128xf32>
    %c1_161 = arith.constant 1 : index
    %c0_162 = arith.constant 0 : index
    %c0_163 = arith.constant 0 : index
    %304 = vector.load %arg6[%c1_161, %c0_162, %c0_163] : memref<4x128x128xf32, #tpu.memory_space<vmem>>, vector<1x128x128xf32>
    %305 = vector.shape_cast %304 : vector<1x128x128xf32> to vector<128x128xf32>
    %306 = arith.addf %303, %305 : vector<128x128xf32>
    %cst_164 = arith.constant dense<0xFF800000> : vector<128xf32>
    %307 = vector.multi_reduction <maximumf>, %306, %cst_164 [1] : vector<128x128xf32> to vector<128xf32>
    %308 = vector.shape_cast %307 : vector<128xf32> to vector<128x1xf32>
    %309 = vector.broadcast %308 : vector<128x1xf32> to vector<128x128xf32>
    %310 = arith.subf %306, %309 : vector<128x128xf32>
    %311 = math.exp %310 : vector<128x128xf32>
    %cst_165 = arith.constant dense<0.000000e+00> : vector<128xf32>
    %312 = vector.multi_reduction <add>, %311, %cst_165 [1] : vector<128x128xf32> to vector<128xf32>
    %313 = vector.shape_cast %312 : vector<128xf32> to vector<128x1xf32>
    %314 = tpu.reciprocal %313 {approx = true} : vector<128x1xf32> -> vector<128x1xf32>
    %315 = vector.broadcast %314 : vector<128x1xf32> to vector<128x128xf32>
    %316 = arith.mulf %311, %315 : vector<128x128xf32>
    %cst_166 = arith.constant dense<0.000000e+00> : vector<8x128xf32>
    %317 = tpu.matmul %173, %316, %cst_166 {dimension_numbers = #tpu.dot_dimension_numbers<[1], [1], [0], [0], [0, 0, 1, 0], [], []>} : vector<8x128xf32>, vector<128x128xf32>, vector<8x128xf32> -> vector<8x128xf32>
    %c1_167 = arith.constant 1 : index
    %c0_168 = arith.constant 0 : index
    %c0_169 = arith.constant 0 : index
    %318 = vector.load %arg7[%c1_167, %c0_168, %c0_169] : memref<4x32x8xf32, #tpu.memory_space<vmem>>, vector<1x32x8xf32>
    %319 = vector.shape_cast %318 : vector<1x32x8xf32> to vector<32x8xf32>
    %cst_170 = arith.constant 0.000000e+00 : f32
    %320 = vector.broadcast %cst_170 : f32 to vector<8x128xf32>
    %321 = arith.maximumf %317, %320 : vector<8x128xf32>
    %cst_171 = arith.constant dense<0.000000e+00> : vector<32x128xf32>
    %322 = tpu.matmul %319, %321, %cst_171 {dimension_numbers = #tpu.dot_dimension_numbers<[1], [0], [0], [1], [0, 0, 1, 1], [], []>} : vector<32x8xf32>, vector<8x128xf32>, vector<32x128xf32> -> vector<32x128xf32>
    %323 = arith.addf %161, %322 : vector<32x128xf32>
    %324 = vector.extract_strided_slice %1 {offsets = [16, 0], sizes = [8, 128], strides = [1, 1]} : vector<32x128xf32> to vector<8x128xf32>
    %325 = arith.addf %317, %324 : vector<8x128xf32>
    %c2_172 = arith.constant 2 : index
    %c0_173 = arith.constant 0 : index
    %c0_174 = arith.constant 0 : index
    %326 = vector.load %arg2[%c2_172, %c0_173, %c0_174] : memref<4x24x8xf32, #tpu.memory_space<vmem>>, vector<1x24x8xf32>
    %327 = vector.shape_cast %326 : vector<1x24x8xf32> to vector<24x8xf32>
    %cst_175 = arith.constant dense<0.000000e+00> : vector<24x128xf32>
    %328 = tpu.matmul %327, %325, %cst_175 {dimension_numbers = #tpu.dot_dimension_numbers<[1], [0], [0], [1], [0, 0, 1, 1], [], []>} : vector<24x8xf32>, vector<8x128xf32>, vector<24x128xf32> -> vector<24x128xf32>
    %c2_176 = arith.constant 2 : index
    %c0_177 = arith.constant 0 : index
    %c0_178 = arith.constant 0 : index
    %329 = vector.load %arg3[%c2_176, %c0_177, %c0_178] : memref<4x24x1xf32, #tpu.memory_space<vmem>>, vector<1x24x1xf32>
    %330 = vector.shape_cast %329 : vector<1x24x1xf32> to vector<24x1xf32>
    %331 = vector.broadcast %330 : vector<24x1xf32> to vector<24x128xf32>
    %332 = arith.addf %328, %331 : vector<24x128xf32>
    %333 = vector.extract_strided_slice %332 {offsets = [0, 0], sizes = [8, 128], strides = [1, 1]} : vector<24x128xf32> to vector<8x128xf32>
    %334 = vector.extract_strided_slice %332 {offsets = [8, 0], sizes = [8, 128], strides = [1, 1]} : vector<24x128xf32> to vector<8x128xf32>
    %335 = vector.extract_strided_slice %332 {offsets = [16, 0], sizes = [8, 128], strides = [1, 1]} : vector<24x128xf32> to vector<8x128xf32>
    %c18_i32_179 = arith.constant 18 : i32
    %336 = tpu.dynamic_rotate %333 by %c18_i32_179 dim 1 : vector<8x128xf32>, i32 -> vector<8x128xf32>
    %c50 = arith.constant 50 : index
    %c0_180 = arith.constant 0 : index
    %c0_181 = arith.constant 0 : index
    %337 = vector.load %arg4[%c50, %c0_180, %c0_181] : memref<100x8x128xf32, #tpu.memory_space<vmem>>, vector<1x8x128xf32>
    %338 = vector.shape_cast %337 : vector<1x8x128xf32> to vector<8x128xf32>
    %339 = arith.mulf %338, %336 : vector<8x128xf32>
    %c17_i32_182 = arith.constant 17 : i32
    %340 = tpu.dynamic_rotate %333 by %c17_i32_182 dim 1 : vector<8x128xf32>, i32 -> vector<8x128xf32>
    %c51 = arith.constant 51 : index
    %c0_183 = arith.constant 0 : index
    %c0_184 = arith.constant 0 : index
    %341 = vector.load %arg4[%c51, %c0_183, %c0_184] : memref<100x8x128xf32, #tpu.memory_space<vmem>>, vector<1x8x128xf32>
    %342 = vector.shape_cast %341 : vector<1x8x128xf32> to vector<8x128xf32>
    %343 = arith.mulf %342, %340 : vector<8x128xf32>
    %344 = arith.addf %339, %343 : vector<8x128xf32>
    %c16_i32_185 = arith.constant 16 : i32
    %345 = tpu.dynamic_rotate %333 by %c16_i32_185 dim 1 : vector<8x128xf32>, i32 -> vector<8x128xf32>
    %c52 = arith.constant 52 : index
    %c0_186 = arith.constant 0 : index
    %c0_187 = arith.constant 0 : index
    %346 = vector.load %arg4[%c52, %c0_186, %c0_187] : memref<100x8x128xf32, #tpu.memory_space<vmem>>, vector<1x8x128xf32>
    %347 = vector.shape_cast %346 : vector<1x8x128xf32> to vector<8x128xf32>
    %348 = arith.mulf %347, %345 : vector<8x128xf32>
    %349 = arith.addf %344, %348 : vector<8x128xf32>
    %c15_i32_188 = arith.constant 15 : i32
    %350 = tpu.dynamic_rotate %333 by %c15_i32_188 dim 1 : vector<8x128xf32>, i32 -> vector<8x128xf32>
    %c53 = arith.constant 53 : index
    %c0_189 = arith.constant 0 : index
    %c0_190 = arith.constant 0 : index
    %351 = vector.load %arg4[%c53, %c0_189, %c0_190] : memref<100x8x128xf32, #tpu.memory_space<vmem>>, vector<1x8x128xf32>
    %352 = vector.shape_cast %351 : vector<1x8x128xf32> to vector<8x128xf32>
    %353 = arith.mulf %352, %350 : vector<8x128xf32>
    %354 = arith.addf %349, %353 : vector<8x128xf32>
    %c14_i32_191 = arith.constant 14 : i32
    %355 = tpu.dynamic_rotate %333 by %c14_i32_191 dim 1 : vector<8x128xf32>, i32 -> vector<8x128xf32>
    %c54 = arith.constant 54 : index
    %c0_192 = arith.constant 0 : index
    %c0_193 = arith.constant 0 : index
    %356 = vector.load %arg4[%c54, %c0_192, %c0_193] : memref<100x8x128xf32, #tpu.memory_space<vmem>>, vector<1x8x128xf32>
    %357 = vector.shape_cast %356 : vector<1x8x128xf32> to vector<8x128xf32>
    %358 = arith.mulf %357, %355 : vector<8x128xf32>
    %359 = arith.addf %354, %358 : vector<8x128xf32>
    %c10_i32_194 = arith.constant 10 : i32
    %360 = tpu.dynamic_rotate %333 by %c10_i32_194 dim 1 : vector<8x128xf32>, i32 -> vector<8x128xf32>
    %c55 = arith.constant 55 : index
    %c0_195 = arith.constant 0 : index
    %c0_196 = arith.constant 0 : index
    %361 = vector.load %arg4[%c55, %c0_195, %c0_196] : memref<100x8x128xf32, #tpu.memory_space<vmem>>, vector<1x8x128xf32>
    %362 = vector.shape_cast %361 : vector<1x8x128xf32> to vector<8x128xf32>
    %363 = arith.mulf %362, %360 : vector<8x128xf32>
    %364 = arith.addf %359, %363 : vector<8x128xf32>
    %c9_i32_197 = arith.constant 9 : i32
    %365 = tpu.dynamic_rotate %333 by %c9_i32_197 dim 1 : vector<8x128xf32>, i32 -> vector<8x128xf32>
    %c56 = arith.constant 56 : index
    %c0_198 = arith.constant 0 : index
    %c0_199 = arith.constant 0 : index
    %366 = vector.load %arg4[%c56, %c0_198, %c0_199] : memref<100x8x128xf32, #tpu.memory_space<vmem>>, vector<1x8x128xf32>
    %367 = vector.shape_cast %366 : vector<1x8x128xf32> to vector<8x128xf32>
    %368 = arith.mulf %367, %365 : vector<8x128xf32>
    %369 = arith.addf %364, %368 : vector<8x128xf32>
    %c8_i32_200 = arith.constant 8 : i32
    %370 = tpu.dynamic_rotate %333 by %c8_i32_200 dim 1 : vector<8x128xf32>, i32 -> vector<8x128xf32>
    %c57 = arith.constant 57 : index
    %c0_201 = arith.constant 0 : index
    %c0_202 = arith.constant 0 : index
    %371 = vector.load %arg4[%c57, %c0_201, %c0_202] : memref<100x8x128xf32, #tpu.memory_space<vmem>>, vector<1x8x128xf32>
    %372 = vector.shape_cast %371 : vector<1x8x128xf32> to vector<8x128xf32>
    %373 = arith.mulf %372, %370 : vector<8x128xf32>
    %374 = arith.addf %369, %373 : vector<8x128xf32>
    %c7_i32_203 = arith.constant 7 : i32
    %375 = tpu.dynamic_rotate %333 by %c7_i32_203 dim 1 : vector<8x128xf32>, i32 -> vector<8x128xf32>
    %c58 = arith.constant 58 : index
    %c0_204 = arith.constant 0 : index
    %c0_205 = arith.constant 0 : index
    %376 = vector.load %arg4[%c58, %c0_204, %c0_205] : memref<100x8x128xf32, #tpu.memory_space<vmem>>, vector<1x8x128xf32>
    %377 = vector.shape_cast %376 : vector<1x8x128xf32> to vector<8x128xf32>
    %378 = arith.mulf %377, %375 : vector<8x128xf32>
    %379 = arith.addf %374, %378 : vector<8x128xf32>
    %c6_i32_206 = arith.constant 6 : i32
    %380 = tpu.dynamic_rotate %333 by %c6_i32_206 dim 1 : vector<8x128xf32>, i32 -> vector<8x128xf32>
    %c59 = arith.constant 59 : index
    %c0_207 = arith.constant 0 : index
    %c0_208 = arith.constant 0 : index
    %381 = vector.load %arg4[%c59, %c0_207, %c0_208] : memref<100x8x128xf32, #tpu.memory_space<vmem>>, vector<1x8x128xf32>
    %382 = vector.shape_cast %381 : vector<1x8x128xf32> to vector<8x128xf32>
    %383 = arith.mulf %382, %380 : vector<8x128xf32>
    %384 = arith.addf %379, %383 : vector<8x128xf32>
    %c2_i32_209 = arith.constant 2 : i32
    %385 = tpu.dynamic_rotate %333 by %c2_i32_209 dim 1 : vector<8x128xf32>, i32 -> vector<8x128xf32>
    %c60 = arith.constant 60 : index
    %c0_210 = arith.constant 0 : index
    %c0_211 = arith.constant 0 : index
    %386 = vector.load %arg4[%c60, %c0_210, %c0_211] : memref<100x8x128xf32, #tpu.memory_space<vmem>>, vector<1x8x128xf32>
    %387 = vector.shape_cast %386 : vector<1x8x128xf32> to vector<8x128xf32>
    %388 = arith.mulf %387, %385 : vector<8x128xf32>
    %389 = arith.addf %384, %388 : vector<8x128xf32>
    %c1_i32_212 = arith.constant 1 : i32
    %390 = tpu.dynamic_rotate %333 by %c1_i32_212 dim 1 : vector<8x128xf32>, i32 -> vector<8x128xf32>
    %c61 = arith.constant 61 : index
    %c0_213 = arith.constant 0 : index
    %c0_214 = arith.constant 0 : index
    %391 = vector.load %arg4[%c61, %c0_213, %c0_214] : memref<100x8x128xf32, #tpu.memory_space<vmem>>, vector<1x8x128xf32>
    %392 = vector.shape_cast %391 : vector<1x8x128xf32> to vector<8x128xf32>
    %393 = arith.mulf %392, %390 : vector<8x128xf32>
    %394 = arith.addf %389, %393 : vector<8x128xf32>
    %c62 = arith.constant 62 : index
    %c0_215 = arith.constant 0 : index
    %c0_216 = arith.constant 0 : index
    %395 = vector.load %arg4[%c62, %c0_215, %c0_216] : memref<100x8x128xf32, #tpu.memory_space<vmem>>, vector<1x8x128xf32>
    %396 = vector.shape_cast %395 : vector<1x8x128xf32> to vector<8x128xf32>
    %397 = arith.mulf %396, %333 : vector<8x128xf32>
    %398 = arith.addf %394, %397 : vector<8x128xf32>
    %c127_i32_217 = arith.constant 127 : i32
    %399 = tpu.dynamic_rotate %333 by %c127_i32_217 dim 1 : vector<8x128xf32>, i32 -> vector<8x128xf32>
    %c63 = arith.constant 63 : index
    %c0_218 = arith.constant 0 : index
    %c0_219 = arith.constant 0 : index
    %400 = vector.load %arg4[%c63, %c0_218, %c0_219] : memref<100x8x128xf32, #tpu.memory_space<vmem>>, vector<1x8x128xf32>
    %401 = vector.shape_cast %400 : vector<1x8x128xf32> to vector<8x128xf32>
    %402 = arith.mulf %401, %399 : vector<8x128xf32>
    %403 = arith.addf %398, %402 : vector<8x128xf32>
    %c126_i32_220 = arith.constant 126 : i32
    %404 = tpu.dynamic_rotate %333 by %c126_i32_220 dim 1 : vector<8x128xf32>, i32 -> vector<8x128xf32>
    %c64 = arith.constant 64 : index
    %c0_221 = arith.constant 0 : index
    %c0_222 = arith.constant 0 : index
    %405 = vector.load %arg4[%c64, %c0_221, %c0_222] : memref<100x8x128xf32, #tpu.memory_space<vmem>>, vector<1x8x128xf32>
    %406 = vector.shape_cast %405 : vector<1x8x128xf32> to vector<8x128xf32>
    %407 = arith.mulf %406, %404 : vector<8x128xf32>
    %408 = arith.addf %403, %407 : vector<8x128xf32>
    %c122_i32_223 = arith.constant 122 : i32
    %409 = tpu.dynamic_rotate %333 by %c122_i32_223 dim 1 : vector<8x128xf32>, i32 -> vector<8x128xf32>
    %c65 = arith.constant 65 : index
    %c0_224 = arith.constant 0 : index
    %c0_225 = arith.constant 0 : index
    %410 = vector.load %arg4[%c65, %c0_224, %c0_225] : memref<100x8x128xf32, #tpu.memory_space<vmem>>, vector<1x8x128xf32>
    %411 = vector.shape_cast %410 : vector<1x8x128xf32> to vector<8x128xf32>
    %412 = arith.mulf %411, %409 : vector<8x128xf32>
    %413 = arith.addf %408, %412 : vector<8x128xf32>
    %c121_i32_226 = arith.constant 121 : i32
    %414 = tpu.dynamic_rotate %333 by %c121_i32_226 dim 1 : vector<8x128xf32>, i32 -> vector<8x128xf32>
    %c66 = arith.constant 66 : index
    %c0_227 = arith.constant 0 : index
    %c0_228 = arith.constant 0 : index
    %415 = vector.load %arg4[%c66, %c0_227, %c0_228] : memref<100x8x128xf32, #tpu.memory_space<vmem>>, vector<1x8x128xf32>
    %416 = vector.shape_cast %415 : vector<1x8x128xf32> to vector<8x128xf32>
    %417 = arith.mulf %416, %414 : vector<8x128xf32>
    %418 = arith.addf %413, %417 : vector<8x128xf32>
    %c120_i32_229 = arith.constant 120 : i32
    %419 = tpu.dynamic_rotate %333 by %c120_i32_229 dim 1 : vector<8x128xf32>, i32 -> vector<8x128xf32>
    %c67 = arith.constant 67 : index
    %c0_230 = arith.constant 0 : index
    %c0_231 = arith.constant 0 : index
    %420 = vector.load %arg4[%c67, %c0_230, %c0_231] : memref<100x8x128xf32, #tpu.memory_space<vmem>>, vector<1x8x128xf32>
    %421 = vector.shape_cast %420 : vector<1x8x128xf32> to vector<8x128xf32>
    %422 = arith.mulf %421, %419 : vector<8x128xf32>
    %423 = arith.addf %418, %422 : vector<8x128xf32>
    %c119_i32_232 = arith.constant 119 : i32
    %424 = tpu.dynamic_rotate %333 by %c119_i32_232 dim 1 : vector<8x128xf32>, i32 -> vector<8x128xf32>
    %c68 = arith.constant 68 : index
    %c0_233 = arith.constant 0 : index
    %c0_234 = arith.constant 0 : index
    %425 = vector.load %arg4[%c68, %c0_233, %c0_234] : memref<100x8x128xf32, #tpu.memory_space<vmem>>, vector<1x8x128xf32>
    %426 = vector.shape_cast %425 : vector<1x8x128xf32> to vector<8x128xf32>
    %427 = arith.mulf %426, %424 : vector<8x128xf32>
    %428 = arith.addf %423, %427 : vector<8x128xf32>
    %c118_i32_235 = arith.constant 118 : i32
    %429 = tpu.dynamic_rotate %333 by %c118_i32_235 dim 1 : vector<8x128xf32>, i32 -> vector<8x128xf32>
    %c69 = arith.constant 69 : index
    %c0_236 = arith.constant 0 : index
    %c0_237 = arith.constant 0 : index
    %430 = vector.load %arg4[%c69, %c0_236, %c0_237] : memref<100x8x128xf32, #tpu.memory_space<vmem>>, vector<1x8x128xf32>
    %431 = vector.shape_cast %430 : vector<1x8x128xf32> to vector<8x128xf32>
    %432 = arith.mulf %431, %429 : vector<8x128xf32>
    %433 = arith.addf %428, %432 : vector<8x128xf32>
    %c114_i32_238 = arith.constant 114 : i32
    %434 = tpu.dynamic_rotate %333 by %c114_i32_238 dim 1 : vector<8x128xf32>, i32 -> vector<8x128xf32>
    %c70 = arith.constant 70 : index
    %c0_239 = arith.constant 0 : index
    %c0_240 = arith.constant 0 : index
    %435 = vector.load %arg4[%c70, %c0_239, %c0_240] : memref<100x8x128xf32, #tpu.memory_space<vmem>>, vector<1x8x128xf32>
    %436 = vector.shape_cast %435 : vector<1x8x128xf32> to vector<8x128xf32>
    %437 = arith.mulf %436, %434 : vector<8x128xf32>
    %438 = arith.addf %433, %437 : vector<8x128xf32>
    %c113_i32_241 = arith.constant 113 : i32
    %439 = tpu.dynamic_rotate %333 by %c113_i32_241 dim 1 : vector<8x128xf32>, i32 -> vector<8x128xf32>
    %c71 = arith.constant 71 : index
    %c0_242 = arith.constant 0 : index
    %c0_243 = arith.constant 0 : index
    %440 = vector.load %arg4[%c71, %c0_242, %c0_243] : memref<100x8x128xf32, #tpu.memory_space<vmem>>, vector<1x8x128xf32>
    %441 = vector.shape_cast %440 : vector<1x8x128xf32> to vector<8x128xf32>
    %442 = arith.mulf %441, %439 : vector<8x128xf32>
    %443 = arith.addf %438, %442 : vector<8x128xf32>
    %c112_i32_244 = arith.constant 112 : i32
    %444 = tpu.dynamic_rotate %333 by %c112_i32_244 dim 1 : vector<8x128xf32>, i32 -> vector<8x128xf32>
    %c72 = arith.constant 72 : index
    %c0_245 = arith.constant 0 : index
    %c0_246 = arith.constant 0 : index
    %445 = vector.load %arg4[%c72, %c0_245, %c0_246] : memref<100x8x128xf32, #tpu.memory_space<vmem>>, vector<1x8x128xf32>
    %446 = vector.shape_cast %445 : vector<1x8x128xf32> to vector<8x128xf32>
    %447 = arith.mulf %446, %444 : vector<8x128xf32>
    %448 = arith.addf %443, %447 : vector<8x128xf32>
    %c111_i32_247 = arith.constant 111 : i32
    %449 = tpu.dynamic_rotate %333 by %c111_i32_247 dim 1 : vector<8x128xf32>, i32 -> vector<8x128xf32>
    %c73 = arith.constant 73 : index
    %c0_248 = arith.constant 0 : index
    %c0_249 = arith.constant 0 : index
    %450 = vector.load %arg4[%c73, %c0_248, %c0_249] : memref<100x8x128xf32, #tpu.memory_space<vmem>>, vector<1x8x128xf32>
    %451 = vector.shape_cast %450 : vector<1x8x128xf32> to vector<8x128xf32>
    %452 = arith.mulf %451, %449 : vector<8x128xf32>
    %453 = arith.addf %448, %452 : vector<8x128xf32>
    %c110_i32_250 = arith.constant 110 : i32
    %454 = tpu.dynamic_rotate %333 by %c110_i32_250 dim 1 : vector<8x128xf32>, i32 -> vector<8x128xf32>
    %c74 = arith.constant 74 : index
    %c0_251 = arith.constant 0 : index
    %c0_252 = arith.constant 0 : index
    %455 = vector.load %arg4[%c74, %c0_251, %c0_252] : memref<100x8x128xf32, #tpu.memory_space<vmem>>, vector<1x8x128xf32>
    %456 = vector.shape_cast %455 : vector<1x8x128xf32> to vector<8x128xf32>
    %457 = arith.mulf %456, %454 : vector<8x128xf32>
    %458 = arith.addf %453, %457 : vector<8x128xf32>
    %c2_253 = arith.constant 2 : index
    %c0_254 = arith.constant 0 : index
    %c0_255 = arith.constant 0 : index
    %459 = vector.load %arg5[%c2_253, %c0_254, %c0_255] : memref<4x8x1xf32, #tpu.memory_space<vmem>>, vector<1x8x1xf32>
    %460 = vector.shape_cast %459 : vector<1x8x1xf32> to vector<8x1xf32>
    %461 = vector.broadcast %460 : vector<8x1xf32> to vector<8x128xf32>
    %462 = arith.addf %458, %461 : vector<8x128xf32>
    %cst_256 = arith.constant dense<0.000000e+00> : vector<128x128xf32>
    %463 = tpu.matmul %462, %334, %cst_256 {dimension_numbers = #tpu.dot_dimension_numbers<[0], [0], [1], [1], [0, 1, 1, 1], [], []>} : vector<8x128xf32>, vector<8x128xf32>, vector<128x128xf32> -> vector<128x128xf32>
    %cst_257 = arith.constant 0.353553385 : f32
    %464 = vector.broadcast %cst_257 : f32 to vector<128x128xf32>
    %465 = arith.mulf %463, %464 : vector<128x128xf32>
    %c2_258 = arith.constant 2 : index
    %c0_259 = arith.constant 0 : index
    %c0_260 = arith.constant 0 : index
    %466 = vector.load %arg6[%c2_258, %c0_259, %c0_260] : memref<4x128x128xf32, #tpu.memory_space<vmem>>, vector<1x128x128xf32>
    %467 = vector.shape_cast %466 : vector<1x128x128xf32> to vector<128x128xf32>
    %468 = arith.addf %465, %467 : vector<128x128xf32>
    %cst_261 = arith.constant dense<0xFF800000> : vector<128xf32>
    %469 = vector.multi_reduction <maximumf>, %468, %cst_261 [1] : vector<128x128xf32> to vector<128xf32>
    %470 = vector.shape_cast %469 : vector<128xf32> to vector<128x1xf32>
    %471 = vector.broadcast %470 : vector<128x1xf32> to vector<128x128xf32>
    %472 = arith.subf %468, %471 : vector<128x128xf32>
    %473 = math.exp %472 : vector<128x128xf32>
    %cst_262 = arith.constant dense<0.000000e+00> : vector<128xf32>
    %474 = vector.multi_reduction <add>, %473, %cst_262 [1] : vector<128x128xf32> to vector<128xf32>
    %475 = vector.shape_cast %474 : vector<128xf32> to vector<128x1xf32>
    %476 = tpu.reciprocal %475 {approx = true} : vector<128x1xf32> -> vector<128x1xf32>
    %477 = vector.broadcast %476 : vector<128x1xf32> to vector<128x128xf32>
    %478 = arith.mulf %473, %477 : vector<128x128xf32>
    %cst_263 = arith.constant dense<0.000000e+00> : vector<8x128xf32>
    %479 = tpu.matmul %335, %478, %cst_263 {dimension_numbers = #tpu.dot_dimension_numbers<[1], [1], [0], [0], [0, 0, 1, 0], [], []>} : vector<8x128xf32>, vector<128x128xf32>, vector<8x128xf32> -> vector<8x128xf32>
    %c2_264 = arith.constant 2 : index
    %c0_265 = arith.constant 0 : index
    %c0_266 = arith.constant 0 : index
    %480 = vector.load %arg7[%c2_264, %c0_265, %c0_266] : memref<4x32x8xf32, #tpu.memory_space<vmem>>, vector<1x32x8xf32>
    %481 = vector.shape_cast %480 : vector<1x32x8xf32> to vector<32x8xf32>
    %cst_267 = arith.constant 0.000000e+00 : f32
    %482 = vector.broadcast %cst_267 : f32 to vector<8x128xf32>
    %483 = arith.maximumf %479, %482 : vector<8x128xf32>
    %cst_268 = arith.constant dense<0.000000e+00> : vector<32x128xf32>
    %484 = tpu.matmul %481, %483, %cst_268 {dimension_numbers = #tpu.dot_dimension_numbers<[1], [0], [0], [1], [0, 0, 1, 1], [], []>} : vector<32x8xf32>, vector<8x128xf32>, vector<32x128xf32> -> vector<32x128xf32>
    %485 = arith.addf %323, %484 : vector<32x128xf32>
    %486 = vector.extract_strided_slice %1 {offsets = [24, 0], sizes = [8, 128], strides = [1, 1]} : vector<32x128xf32> to vector<8x128xf32>
    %487 = arith.addf %479, %486 : vector<8x128xf32>
    %c3_269 = arith.constant 3 : index
    %c0_270 = arith.constant 0 : index
    %c0_271 = arith.constant 0 : index
    %488 = vector.load %arg2[%c3_269, %c0_270, %c0_271] : memref<4x24x8xf32, #tpu.memory_space<vmem>>, vector<1x24x8xf32>
    %489 = vector.shape_cast %488 : vector<1x24x8xf32> to vector<24x8xf32>
    %cst_272 = arith.constant dense<0.000000e+00> : vector<24x128xf32>
    %490 = tpu.matmul %489, %487, %cst_272 {dimension_numbers = #tpu.dot_dimension_numbers<[1], [0], [0], [1], [0, 0, 1, 1], [], []>} : vector<24x8xf32>, vector<8x128xf32>, vector<24x128xf32> -> vector<24x128xf32>
    %c3_273 = arith.constant 3 : index
    %c0_274 = arith.constant 0 : index
    %c0_275 = arith.constant 0 : index
    %491 = vector.load %arg3[%c3_273, %c0_274, %c0_275] : memref<4x24x1xf32, #tpu.memory_space<vmem>>, vector<1x24x1xf32>
    %492 = vector.shape_cast %491 : vector<1x24x1xf32> to vector<24x1xf32>
    %493 = vector.broadcast %492 : vector<24x1xf32> to vector<24x128xf32>
    %494 = arith.addf %490, %493 : vector<24x128xf32>
    %495 = vector.extract_strided_slice %494 {offsets = [0, 0], sizes = [8, 128], strides = [1, 1]} : vector<24x128xf32> to vector<8x128xf32>
    %496 = vector.extract_strided_slice %494 {offsets = [8, 0], sizes = [8, 128], strides = [1, 1]} : vector<24x128xf32> to vector<8x128xf32>
    %497 = vector.extract_strided_slice %494 {offsets = [16, 0], sizes = [8, 128], strides = [1, 1]} : vector<24x128xf32> to vector<8x128xf32>
    %c18_i32_276 = arith.constant 18 : i32
    %498 = tpu.dynamic_rotate %495 by %c18_i32_276 dim 1 : vector<8x128xf32>, i32 -> vector<8x128xf32>
    %c75 = arith.constant 75 : index
    %c0_277 = arith.constant 0 : index
    %c0_278 = arith.constant 0 : index
    %499 = vector.load %arg4[%c75, %c0_277, %c0_278] : memref<100x8x128xf32, #tpu.memory_space<vmem>>, vector<1x8x128xf32>
    %500 = vector.shape_cast %499 : vector<1x8x128xf32> to vector<8x128xf32>
    %501 = arith.mulf %500, %498 : vector<8x128xf32>
    %c17_i32_279 = arith.constant 17 : i32
    %502 = tpu.dynamic_rotate %495 by %c17_i32_279 dim 1 : vector<8x128xf32>, i32 -> vector<8x128xf32>
    %c76 = arith.constant 76 : index
    %c0_280 = arith.constant 0 : index
    %c0_281 = arith.constant 0 : index
    %503 = vector.load %arg4[%c76, %c0_280, %c0_281] : memref<100x8x128xf32, #tpu.memory_space<vmem>>, vector<1x8x128xf32>
    %504 = vector.shape_cast %503 : vector<1x8x128xf32> to vector<8x128xf32>
    %505 = arith.mulf %504, %502 : vector<8x128xf32>
    %506 = arith.addf %501, %505 : vector<8x128xf32>
    %c16_i32_282 = arith.constant 16 : i32
    %507 = tpu.dynamic_rotate %495 by %c16_i32_282 dim 1 : vector<8x128xf32>, i32 -> vector<8x128xf32>
    %c77 = arith.constant 77 : index
    %c0_283 = arith.constant 0 : index
    %c0_284 = arith.constant 0 : index
    %508 = vector.load %arg4[%c77, %c0_283, %c0_284] : memref<100x8x128xf32, #tpu.memory_space<vmem>>, vector<1x8x128xf32>
    %509 = vector.shape_cast %508 : vector<1x8x128xf32> to vector<8x128xf32>
    %510 = arith.mulf %509, %507 : vector<8x128xf32>
    %511 = arith.addf %506, %510 : vector<8x128xf32>
    %c15_i32_285 = arith.constant 15 : i32
    %512 = tpu.dynamic_rotate %495 by %c15_i32_285 dim 1 : vector<8x128xf32>, i32 -> vector<8x128xf32>
    %c78 = arith.constant 78 : index
    %c0_286 = arith.constant 0 : index
    %c0_287 = arith.constant 0 : index
    %513 = vector.load %arg4[%c78, %c0_286, %c0_287] : memref<100x8x128xf32, #tpu.memory_space<vmem>>, vector<1x8x128xf32>
    %514 = vector.shape_cast %513 : vector<1x8x128xf32> to vector<8x128xf32>
    %515 = arith.mulf %514, %512 : vector<8x128xf32>
    %516 = arith.addf %511, %515 : vector<8x128xf32>
    %c14_i32_288 = arith.constant 14 : i32
    %517 = tpu.dynamic_rotate %495 by %c14_i32_288 dim 1 : vector<8x128xf32>, i32 -> vector<8x128xf32>
    %c79 = arith.constant 79 : index
    %c0_289 = arith.constant 0 : index
    %c0_290 = arith.constant 0 : index
    %518 = vector.load %arg4[%c79, %c0_289, %c0_290] : memref<100x8x128xf32, #tpu.memory_space<vmem>>, vector<1x8x128xf32>
    %519 = vector.shape_cast %518 : vector<1x8x128xf32> to vector<8x128xf32>
    %520 = arith.mulf %519, %517 : vector<8x128xf32>
    %521 = arith.addf %516, %520 : vector<8x128xf32>
    %c10_i32_291 = arith.constant 10 : i32
    %522 = tpu.dynamic_rotate %495 by %c10_i32_291 dim 1 : vector<8x128xf32>, i32 -> vector<8x128xf32>
    %c80 = arith.constant 80 : index
    %c0_292 = arith.constant 0 : index
    %c0_293 = arith.constant 0 : index
    %523 = vector.load %arg4[%c80, %c0_292, %c0_293] : memref<100x8x128xf32, #tpu.memory_space<vmem>>, vector<1x8x128xf32>
    %524 = vector.shape_cast %523 : vector<1x8x128xf32> to vector<8x128xf32>
    %525 = arith.mulf %524, %522 : vector<8x128xf32>
    %526 = arith.addf %521, %525 : vector<8x128xf32>
    %c9_i32_294 = arith.constant 9 : i32
    %527 = tpu.dynamic_rotate %495 by %c9_i32_294 dim 1 : vector<8x128xf32>, i32 -> vector<8x128xf32>
    %c81 = arith.constant 81 : index
    %c0_295 = arith.constant 0 : index
    %c0_296 = arith.constant 0 : index
    %528 = vector.load %arg4[%c81, %c0_295, %c0_296] : memref<100x8x128xf32, #tpu.memory_space<vmem>>, vector<1x8x128xf32>
    %529 = vector.shape_cast %528 : vector<1x8x128xf32> to vector<8x128xf32>
    %530 = arith.mulf %529, %527 : vector<8x128xf32>
    %531 = arith.addf %526, %530 : vector<8x128xf32>
    %c8_i32_297 = arith.constant 8 : i32
    %532 = tpu.dynamic_rotate %495 by %c8_i32_297 dim 1 : vector<8x128xf32>, i32 -> vector<8x128xf32>
    %c82 = arith.constant 82 : index
    %c0_298 = arith.constant 0 : index
    %c0_299 = arith.constant 0 : index
    %533 = vector.load %arg4[%c82, %c0_298, %c0_299] : memref<100x8x128xf32, #tpu.memory_space<vmem>>, vector<1x8x128xf32>
    %534 = vector.shape_cast %533 : vector<1x8x128xf32> to vector<8x128xf32>
    %535 = arith.mulf %534, %532 : vector<8x128xf32>
    %536 = arith.addf %531, %535 : vector<8x128xf32>
    %c7_i32_300 = arith.constant 7 : i32
    %537 = tpu.dynamic_rotate %495 by %c7_i32_300 dim 1 : vector<8x128xf32>, i32 -> vector<8x128xf32>
    %c83 = arith.constant 83 : index
    %c0_301 = arith.constant 0 : index
    %c0_302 = arith.constant 0 : index
    %538 = vector.load %arg4[%c83, %c0_301, %c0_302] : memref<100x8x128xf32, #tpu.memory_space<vmem>>, vector<1x8x128xf32>
    %539 = vector.shape_cast %538 : vector<1x8x128xf32> to vector<8x128xf32>
    %540 = arith.mulf %539, %537 : vector<8x128xf32>
    %541 = arith.addf %536, %540 : vector<8x128xf32>
    %c6_i32_303 = arith.constant 6 : i32
    %542 = tpu.dynamic_rotate %495 by %c6_i32_303 dim 1 : vector<8x128xf32>, i32 -> vector<8x128xf32>
    %c84 = arith.constant 84 : index
    %c0_304 = arith.constant 0 : index
    %c0_305 = arith.constant 0 : index
    %543 = vector.load %arg4[%c84, %c0_304, %c0_305] : memref<100x8x128xf32, #tpu.memory_space<vmem>>, vector<1x8x128xf32>
    %544 = vector.shape_cast %543 : vector<1x8x128xf32> to vector<8x128xf32>
    %545 = arith.mulf %544, %542 : vector<8x128xf32>
    %546 = arith.addf %541, %545 : vector<8x128xf32>
    %c2_i32_306 = arith.constant 2 : i32
    %547 = tpu.dynamic_rotate %495 by %c2_i32_306 dim 1 : vector<8x128xf32>, i32 -> vector<8x128xf32>
    %c85 = arith.constant 85 : index
    %c0_307 = arith.constant 0 : index
    %c0_308 = arith.constant 0 : index
    %548 = vector.load %arg4[%c85, %c0_307, %c0_308] : memref<100x8x128xf32, #tpu.memory_space<vmem>>, vector<1x8x128xf32>
    %549 = vector.shape_cast %548 : vector<1x8x128xf32> to vector<8x128xf32>
    %550 = arith.mulf %549, %547 : vector<8x128xf32>
    %551 = arith.addf %546, %550 : vector<8x128xf32>
    %c1_i32_309 = arith.constant 1 : i32
    %552 = tpu.dynamic_rotate %495 by %c1_i32_309 dim 1 : vector<8x128xf32>, i32 -> vector<8x128xf32>
    %c86 = arith.constant 86 : index
    %c0_310 = arith.constant 0 : index
    %c0_311 = arith.constant 0 : index
    %553 = vector.load %arg4[%c86, %c0_310, %c0_311] : memref<100x8x128xf32, #tpu.memory_space<vmem>>, vector<1x8x128xf32>
    %554 = vector.shape_cast %553 : vector<1x8x128xf32> to vector<8x128xf32>
    %555 = arith.mulf %554, %552 : vector<8x128xf32>
    %556 = arith.addf %551, %555 : vector<8x128xf32>
    %c87 = arith.constant 87 : index
    %c0_312 = arith.constant 0 : index
    %c0_313 = arith.constant 0 : index
    %557 = vector.load %arg4[%c87, %c0_312, %c0_313] : memref<100x8x128xf32, #tpu.memory_space<vmem>>, vector<1x8x128xf32>
    %558 = vector.shape_cast %557 : vector<1x8x128xf32> to vector<8x128xf32>
    %559 = arith.mulf %558, %495 : vector<8x128xf32>
    %560 = arith.addf %556, %559 : vector<8x128xf32>
    %c127_i32_314 = arith.constant 127 : i32
    %561 = tpu.dynamic_rotate %495 by %c127_i32_314 dim 1 : vector<8x128xf32>, i32 -> vector<8x128xf32>
    %c88 = arith.constant 88 : index
    %c0_315 = arith.constant 0 : index
    %c0_316 = arith.constant 0 : index
    %562 = vector.load %arg4[%c88, %c0_315, %c0_316] : memref<100x8x128xf32, #tpu.memory_space<vmem>>, vector<1x8x128xf32>
    %563 = vector.shape_cast %562 : vector<1x8x128xf32> to vector<8x128xf32>
    %564 = arith.mulf %563, %561 : vector<8x128xf32>
    %565 = arith.addf %560, %564 : vector<8x128xf32>
    %c126_i32_317 = arith.constant 126 : i32
    %566 = tpu.dynamic_rotate %495 by %c126_i32_317 dim 1 : vector<8x128xf32>, i32 -> vector<8x128xf32>
    %c89 = arith.constant 89 : index
    %c0_318 = arith.constant 0 : index
    %c0_319 = arith.constant 0 : index
    %567 = vector.load %arg4[%c89, %c0_318, %c0_319] : memref<100x8x128xf32, #tpu.memory_space<vmem>>, vector<1x8x128xf32>
    %568 = vector.shape_cast %567 : vector<1x8x128xf32> to vector<8x128xf32>
    %569 = arith.mulf %568, %566 : vector<8x128xf32>
    %570 = arith.addf %565, %569 : vector<8x128xf32>
    %c122_i32_320 = arith.constant 122 : i32
    %571 = tpu.dynamic_rotate %495 by %c122_i32_320 dim 1 : vector<8x128xf32>, i32 -> vector<8x128xf32>
    %c90 = arith.constant 90 : index
    %c0_321 = arith.constant 0 : index
    %c0_322 = arith.constant 0 : index
    %572 = vector.load %arg4[%c90, %c0_321, %c0_322] : memref<100x8x128xf32, #tpu.memory_space<vmem>>, vector<1x8x128xf32>
    %573 = vector.shape_cast %572 : vector<1x8x128xf32> to vector<8x128xf32>
    %574 = arith.mulf %573, %571 : vector<8x128xf32>
    %575 = arith.addf %570, %574 : vector<8x128xf32>
    %c121_i32_323 = arith.constant 121 : i32
    %576 = tpu.dynamic_rotate %495 by %c121_i32_323 dim 1 : vector<8x128xf32>, i32 -> vector<8x128xf32>
    %c91 = arith.constant 91 : index
    %c0_324 = arith.constant 0 : index
    %c0_325 = arith.constant 0 : index
    %577 = vector.load %arg4[%c91, %c0_324, %c0_325] : memref<100x8x128xf32, #tpu.memory_space<vmem>>, vector<1x8x128xf32>
    %578 = vector.shape_cast %577 : vector<1x8x128xf32> to vector<8x128xf32>
    %579 = arith.mulf %578, %576 : vector<8x128xf32>
    %580 = arith.addf %575, %579 : vector<8x128xf32>
    %c120_i32_326 = arith.constant 120 : i32
    %581 = tpu.dynamic_rotate %495 by %c120_i32_326 dim 1 : vector<8x128xf32>, i32 -> vector<8x128xf32>
    %c92 = arith.constant 92 : index
    %c0_327 = arith.constant 0 : index
    %c0_328 = arith.constant 0 : index
    %582 = vector.load %arg4[%c92, %c0_327, %c0_328] : memref<100x8x128xf32, #tpu.memory_space<vmem>>, vector<1x8x128xf32>
    %583 = vector.shape_cast %582 : vector<1x8x128xf32> to vector<8x128xf32>
    %584 = arith.mulf %583, %581 : vector<8x128xf32>
    %585 = arith.addf %580, %584 : vector<8x128xf32>
    %c119_i32_329 = arith.constant 119 : i32
    %586 = tpu.dynamic_rotate %495 by %c119_i32_329 dim 1 : vector<8x128xf32>, i32 -> vector<8x128xf32>
    %c93 = arith.constant 93 : index
    %c0_330 = arith.constant 0 : index
    %c0_331 = arith.constant 0 : index
    %587 = vector.load %arg4[%c93, %c0_330, %c0_331] : memref<100x8x128xf32, #tpu.memory_space<vmem>>, vector<1x8x128xf32>
    %588 = vector.shape_cast %587 : vector<1x8x128xf32> to vector<8x128xf32>
    %589 = arith.mulf %588, %586 : vector<8x128xf32>
    %590 = arith.addf %585, %589 : vector<8x128xf32>
    %c118_i32_332 = arith.constant 118 : i32
    %591 = tpu.dynamic_rotate %495 by %c118_i32_332 dim 1 : vector<8x128xf32>, i32 -> vector<8x128xf32>
    %c94 = arith.constant 94 : index
    %c0_333 = arith.constant 0 : index
    %c0_334 = arith.constant 0 : index
    %592 = vector.load %arg4[%c94, %c0_333, %c0_334] : memref<100x8x128xf32, #tpu.memory_space<vmem>>, vector<1x8x128xf32>
    %593 = vector.shape_cast %592 : vector<1x8x128xf32> to vector<8x128xf32>
    %594 = arith.mulf %593, %591 : vector<8x128xf32>
    %595 = arith.addf %590, %594 : vector<8x128xf32>
    %c114_i32_335 = arith.constant 114 : i32
    %596 = tpu.dynamic_rotate %495 by %c114_i32_335 dim 1 : vector<8x128xf32>, i32 -> vector<8x128xf32>
    %c95 = arith.constant 95 : index
    %c0_336 = arith.constant 0 : index
    %c0_337 = arith.constant 0 : index
    %597 = vector.load %arg4[%c95, %c0_336, %c0_337] : memref<100x8x128xf32, #tpu.memory_space<vmem>>, vector<1x8x128xf32>
    %598 = vector.shape_cast %597 : vector<1x8x128xf32> to vector<8x128xf32>
    %599 = arith.mulf %598, %596 : vector<8x128xf32>
    %600 = arith.addf %595, %599 : vector<8x128xf32>
    %c113_i32_338 = arith.constant 113 : i32
    %601 = tpu.dynamic_rotate %495 by %c113_i32_338 dim 1 : vector<8x128xf32>, i32 -> vector<8x128xf32>
    %c96 = arith.constant 96 : index
    %c0_339 = arith.constant 0 : index
    %c0_340 = arith.constant 0 : index
    %602 = vector.load %arg4[%c96, %c0_339, %c0_340] : memref<100x8x128xf32, #tpu.memory_space<vmem>>, vector<1x8x128xf32>
    %603 = vector.shape_cast %602 : vector<1x8x128xf32> to vector<8x128xf32>
    %604 = arith.mulf %603, %601 : vector<8x128xf32>
    %605 = arith.addf %600, %604 : vector<8x128xf32>
    %c112_i32_341 = arith.constant 112 : i32
    %606 = tpu.dynamic_rotate %495 by %c112_i32_341 dim 1 : vector<8x128xf32>, i32 -> vector<8x128xf32>
    %c97 = arith.constant 97 : index
    %c0_342 = arith.constant 0 : index
    %c0_343 = arith.constant 0 : index
    %607 = vector.load %arg4[%c97, %c0_342, %c0_343] : memref<100x8x128xf32, #tpu.memory_space<vmem>>, vector<1x8x128xf32>
    %608 = vector.shape_cast %607 : vector<1x8x128xf32> to vector<8x128xf32>
    %609 = arith.mulf %608, %606 : vector<8x128xf32>
    %610 = arith.addf %605, %609 : vector<8x128xf32>
    %c111_i32_344 = arith.constant 111 : i32
    %611 = tpu.dynamic_rotate %495 by %c111_i32_344 dim 1 : vector<8x128xf32>, i32 -> vector<8x128xf32>
    %c98 = arith.constant 98 : index
    %c0_345 = arith.constant 0 : index
    %c0_346 = arith.constant 0 : index
    %612 = vector.load %arg4[%c98, %c0_345, %c0_346] : memref<100x8x128xf32, #tpu.memory_space<vmem>>, vector<1x8x128xf32>
    %613 = vector.shape_cast %612 : vector<1x8x128xf32> to vector<8x128xf32>
    %614 = arith.mulf %613, %611 : vector<8x128xf32>
    %615 = arith.addf %610, %614 : vector<8x128xf32>
    %c110_i32_347 = arith.constant 110 : i32
    %616 = tpu.dynamic_rotate %495 by %c110_i32_347 dim 1 : vector<8x128xf32>, i32 -> vector<8x128xf32>
    %c99 = arith.constant 99 : index
    %c0_348 = arith.constant 0 : index
    %c0_349 = arith.constant 0 : index
    %617 = vector.load %arg4[%c99, %c0_348, %c0_349] : memref<100x8x128xf32, #tpu.memory_space<vmem>>, vector<1x8x128xf32>
    %618 = vector.shape_cast %617 : vector<1x8x128xf32> to vector<8x128xf32>
    %619 = arith.mulf %618, %616 : vector<8x128xf32>
    %620 = arith.addf %615, %619 : vector<8x128xf32>
    %c3_350 = arith.constant 3 : index
    %c0_351 = arith.constant 0 : index
    %c0_352 = arith.constant 0 : index
    %621 = vector.load %arg5[%c3_350, %c0_351, %c0_352] : memref<4x8x1xf32, #tpu.memory_space<vmem>>, vector<1x8x1xf32>
    %622 = vector.shape_cast %621 : vector<1x8x1xf32> to vector<8x1xf32>
    %623 = vector.broadcast %622 : vector<8x1xf32> to vector<8x128xf32>
    %624 = arith.addf %620, %623 : vector<8x128xf32>
    %cst_353 = arith.constant dense<0.000000e+00> : vector<128x128xf32>
    %625 = tpu.matmul %624, %496, %cst_353 {dimension_numbers = #tpu.dot_dimension_numbers<[0], [0], [1], [1], [0, 1, 1, 1], [], []>} : vector<8x128xf32>, vector<8x128xf32>, vector<128x128xf32> -> vector<128x128xf32>
    %cst_354 = arith.constant 0.353553385 : f32
    %626 = vector.broadcast %cst_354 : f32 to vector<128x128xf32>
    %627 = arith.mulf %625, %626 : vector<128x128xf32>
    %c3_355 = arith.constant 3 : index
    %c0_356 = arith.constant 0 : index
    %c0_357 = arith.constant 0 : index
    %628 = vector.load %arg6[%c3_355, %c0_356, %c0_357] : memref<4x128x128xf32, #tpu.memory_space<vmem>>, vector<1x128x128xf32>
    %629 = vector.shape_cast %628 : vector<1x128x128xf32> to vector<128x128xf32>
    %630 = arith.addf %627, %629 : vector<128x128xf32>
    %cst_358 = arith.constant dense<0xFF800000> : vector<128xf32>
    %631 = vector.multi_reduction <maximumf>, %630, %cst_358 [1] : vector<128x128xf32> to vector<128xf32>
    %632 = vector.shape_cast %631 : vector<128xf32> to vector<128x1xf32>
    %633 = vector.broadcast %632 : vector<128x1xf32> to vector<128x128xf32>
    %634 = arith.subf %630, %633 : vector<128x128xf32>
    %635 = math.exp %634 : vector<128x128xf32>
    %cst_359 = arith.constant dense<0.000000e+00> : vector<128xf32>
    %636 = vector.multi_reduction <add>, %635, %cst_359 [1] : vector<128x128xf32> to vector<128xf32>
    %637 = vector.shape_cast %636 : vector<128xf32> to vector<128x1xf32>
    %638 = tpu.reciprocal %637 {approx = true} : vector<128x1xf32> -> vector<128x1xf32>
    %639 = vector.broadcast %638 : vector<128x1xf32> to vector<128x128xf32>
    %640 = arith.mulf %635, %639 : vector<128x128xf32>
    %cst_360 = arith.constant dense<0.000000e+00> : vector<8x128xf32>
    %641 = tpu.matmul %497, %640, %cst_360 {dimension_numbers = #tpu.dot_dimension_numbers<[1], [1], [0], [0], [0, 0, 1, 0], [], []>} : vector<8x128xf32>, vector<128x128xf32>, vector<8x128xf32> -> vector<8x128xf32>
    %c3_361 = arith.constant 3 : index
    %c0_362 = arith.constant 0 : index
    %c0_363 = arith.constant 0 : index
    %642 = vector.load %arg7[%c3_361, %c0_362, %c0_363] : memref<4x32x8xf32, #tpu.memory_space<vmem>>, vector<1x32x8xf32>
    %643 = vector.shape_cast %642 : vector<1x32x8xf32> to vector<32x8xf32>
    %cst_364 = arith.constant 0.000000e+00 : f32
    %644 = vector.broadcast %cst_364 : f32 to vector<8x128xf32>
    %645 = arith.maximumf %641, %644 : vector<8x128xf32>
    %cst_365 = arith.constant dense<0.000000e+00> : vector<32x128xf32>
    %646 = tpu.matmul %643, %645, %cst_365 {dimension_numbers = #tpu.dot_dimension_numbers<[1], [0], [0], [1], [0, 0, 1, 1], [], []>} : vector<32x8xf32>, vector<8x128xf32>, vector<32x128xf32> -> vector<32x128xf32>
    %647 = arith.addf %485, %646 : vector<32x128xf32>
    %c0_366 = arith.constant 0 : index
    %c0_367 = arith.constant 0 : index
    %648 = vector.load %arg8[%c0_366, %c0_367] : memref<32x1xf32, #tpu.memory_space<vmem>>, vector<32x1xf32>
    %649 = vector.broadcast %648 : vector<32x1xf32> to vector<32x128xf32>
    %650 = arith.addf %647, %649 : vector<32x128xf32>
    %c0_368 = arith.constant 0 : index
    %c0_369 = arith.constant 0 : index
    %c0_370 = arith.constant 0 : index
    %651 = vector.load %arg9[%c0_368, %c0_369, %c0_370] : memref<1x32x128xf32, #tpu.memory_space<vmem>>, vector<1x32x128xf32>
    %652 = vector.shape_cast %651 : vector<1x32x128xf32> to vector<32x128xf32>
    %653 = vector.shape_cast %650 : vector<32x128xf32> to vector<1x32x128xf32>
    tpu.vector_store %arg9[%c0_368, %c0_369, %c0_370], %653 {strides = array<i32>} : memref<1x32x128xf32, #tpu.memory_space<vmem>>, vector<1x32x128xf32>,
    return
  }
  func.func @transform_0(%arg0: i32) -> (i32, i32, i32) {
    %c0_i32 = arith.constant 0 : i32
    %c0_i32_0 = arith.constant 0 : i32
    %c0_i32_1 = arith.constant 0 : i32
    return %arg0, %c0_i32, %c0_i32_0 : i32, i32, i32
  }
  func.func @transform_1(%arg0: i32) -> (i32, i32, i32) {
    %c0_i32 = arith.constant 0 : i32
    %c0_i32_0 = arith.constant 0 : i32
    %c0_i32_1 = arith.constant 0 : i32
    %c0_i32_2 = arith.constant 0 : i32
    return %c0_i32, %c0_i32_0, %c0_i32_1 : i32, i32, i32
  }
  func.func @transform_2(%arg0: i32) -> (i32, i32, i32) {
    %c0_i32 = arith.constant 0 : i32
    %c0_i32_0 = arith.constant 0 : i32
    %c0_i32_1 = arith.constant 0 : i32
    %c0_i32_2 = arith.constant 0 : i32
    return %c0_i32, %c0_i32_0, %c0_i32_1 : i32, i32, i32
  }
  func.func @transform_3(%arg0: i32) -> (i32, i32, i32) {
    %c0_i32 = arith.constant 0 : i32
    %c0_i32_0 = arith.constant 0 : i32
    %c0_i32_1 = arith.constant 0 : i32
    %c0_i32_2 = arith.constant 0 : i32
    return %c0_i32, %c0_i32_0, %c0_i32_1 : i32, i32, i32
  }
  func.func @transform_4(%arg0: i32) -> (i32, i32, i32) {
    %c0_i32 = arith.constant 0 : i32
    %c0_i32_0 = arith.constant 0 : i32
    %c0_i32_1 = arith.constant 0 : i32
    %c0_i32_2 = arith.constant 0 : i32
    return %c0_i32, %c0_i32_0, %c0_i32_1 : i32, i32, i32
  }
  func.func @transform_5(%arg0: i32) -> (i32, i32, i32) {
    %c0_i32 = arith.constant 0 : i32
    %c0_i32_0 = arith.constant 0 : i32
    %c0_i32_1 = arith.constant 0 : i32
    %c0_i32_2 = arith.constant 0 : i32
    return %c0_i32, %c0_i32_0, %c0_i32_1 : i32, i32, i32
  }
  func.func @transform_6(%arg0: i32) -> (i32, i32, i32) {
    %c0_i32 = arith.constant 0 : i32
    %c0_i32_0 = arith.constant 0 : i32
    %c0_i32_1 = arith.constant 0 : i32
    %c0_i32_2 = arith.constant 0 : i32
    return %c0_i32, %c0_i32_0, %c0_i32_1 : i32, i32, i32
  }
  func.func @transform_7(%arg0: i32) -> (i32, i32) {
    %c0_i32 = arith.constant 0 : i32
    %c0_i32_0 = arith.constant 0 : i32
    %c0_i32_1 = arith.constant 0 : i32
    return %c0_i32, %c0_i32_0 : i32, i32
  }
  func.func @transform_8(%arg0: i32) -> (i32, i32, i32) {
    %c0_i32 = arith.constant 0 : i32
    %c0_i32_0 = arith.constant 0 : i32
    %c0_i32_1 = arith.constant 0 : i32
    return %arg0, %c0_i32, %c0_i32_0 : i32, i32, i32
  }
}

</mosaic_0001>

<bundles_post_ra>
// kernel: tpu_custom_call.1
= control target key start
LH: loop header
LB: loop body
LE: loop exit
PB: predicated region body
PF: predicated region fallthrough
CT: control target
= control target key end

     0   :  { %s6344_s0 = inlined_call_operand.vmem [shape: f32[4,32,128], index: 0, kind: input, shape index: {}]   ;;  %s6345_s1 = inlined_call_operand.vmem [shape: f32[4,24,8], index: 1, kind: input, shape index: {}]   ;;  %s6346_s2 = inlined_call_operand.vmem [shape: f32[4,24,1], index: 2, kind: input, shape index: {}]   ;;  %s6347_s3 = inlined_call_operand.hbm [shape: f32[100,8,128], index: 3, kind: input, shape index: {}]   ;;  %s6348_s4 = inlined_call_operand.vmem [shape: f32[4,8,1], index: 4, kind: input, shape index: {}]   ;;  %s6349_s5 = inlined_call_operand.hbm [shape: f32[4,128,128], index: 5, kind: input, shape index: {}]   ;;  %s6350_s6 = inlined_call_operand.vmem [shape: f32[4,32,8], index: 6, kind: input, shape index: {}]   ;;  %s6351_s7 = inlined_call_operand.vmem [shape: f32[32,1], index: 7, kind: input, shape index: {}]   ;;  %s6352_s8 = inlined_call_operand.hbm [shape: f32[4,32,128], index: 8, kind: output, shape index: {}]  }
   0x1   :  { %6417 = sst [smem:[#allocation20_spill]] %s6344_s0 }
   0x2   :  { %6418 = sst [smem:[#allocation21_spill]] %s6346_s2 }
   0x3   :  { %6419 = sst [smem:[#allocation22_spill]] %s6347_s3 }
   0x4   :  { %6420 = sst [smem:[#allocation23_spill]] %s6349_s5 }
   0x5   :  { %6421 = sst [smem:[#allocation24_spill]] %s6351_s7 }
   0x6   :  { %6422 = sst [smem:[#allocation25_spill]] %s6352_s8 }
   0x7   :  { %13 = vsyncpa [#allocation3], 0 }
   0x8   :  { %14 = vsyncpa [#allocation6], 0 }
   0x9   :  { %15 = vsyncpa [#allocation4], 0 }
   0xa   :  { %17 = vsyncpa [#allocation4 + $0x1], 0  ;;  %s5091_s27 = smov 0   ;;  %s5093_s28 = smov 0  }
   0xb   :  { %s5095_s29 = smov 0   ;;  %s5097_s30 = smov 0  }
   0xc LB: > { %6423 = sst [smem:[#allocation11_spill]] %s4999_s27  ;;  %s5112_s9 = sadd.s32 4294967295, %s5011_s30   ;;  %s5011_s30 = sphi %s5097_s30, %s6482_s30   ;;  %s5007_s29 = sphi %s5095_s29, %s6485_s29   ;;  %s5003_s28 = sphi %s5093_s28, %s6484_s28   ;;  %s4999_s27 = sphi %s5091_s27, %s6483_s27  }
   0xd   : > { %6424 = sst [smem:[#allocation12_spill]] %s5003_s28  ;;  %s3906_s10 = sadd.s32 4294967294, %s5011_s30  }
   0xe   : > { %6425 = sst [smem:[#allocation13_spill]] %s5007_s29  ;;  %s5116_s11 = sadd.s32 1, %s5011_s30  }
   0xf   : > { %6426 = sst [smem:[#allocation14_spill]] %s5011_s30  ;;  %s203_s12 = sadd.s32 1, %s5007_s29 }
  0x10   : > { %6427 = sst [smem:[#allocation15_spill]] %s5112_s9  ;;  %s200_s13 = ssub.s32 %s5011_s30, %s5116_s11 }
  0x11   : > { %6428 = sst [smem:[#allocation16_spill]] %s5116_s11  ;;  %p213_p0 = scmp.ne.s32.totalorder %s5007_s29, %s5003_s28 }
  0x12   : > { %p201_p1 = scmp.eq.s32.totalorder %s200_s13, 0  ;;  %p214_p2 = scmp.eq.s32.totalorder %s5112_s9, 3 }
  0x13   : > { %p219_p3 = scmp.ne.s32.totalorder %s5003_s28, %s4999_s27  ;;  %p220_p4 = scmp.eq.s32.totalorder %s3906_s10, 3 }
  0x14   : > { %s5127_s14 = scalar_select %p201_p1, %s5007_s29, %s203_s12  }
  0x15   : > { %p5129_p5 = por %p214_p2, %p213_p0  ;;  %p5133_p6 = por %p220_p4, %p219_p3 }
  0x16   : > { %6429 = sst [smem:[#allocation17_spill]] %s5127_s14  ;;  %p3907_p7 = scmp.ge.s32.totalorder %s5011_s30, 1 }
  0x17   : > { %s6430_s15 = scalar_select %p5129_p5, 1, 0 }
  0x18   : > { %s6432_s16 = scalar_select %p5133_p6, 1, 0 }
  0x19   : > { %6431 = sst [smem:[#allocation18_spill]] %s6430_s15  ;;  %p227_p8 = scmp.lt.s32.totalorder %s5011_s30, 5 }
  0x1a   : > { %6433 = sst [smem:[#allocation19_spill]] %s6432_s16  ;;  %p6353_p9 = scmp.eq.s32.totalorder %s5112_s9, 0 }
  0x1b   : > { %p5140_p10 = pnand %p3907_p7, %p227_p8  ;;  %s5013_s18 = smov [#allocation2]  }
  0x1c   : > { %s245_s19 = sshll.u32 %s5013_s18, 4  ;;  %s5014_s21 = smov [#allocation5]   ;;  %s246_s19 = int_to_ptr.vmem [resolvable:$true] %s245_s19 }
  0x1d   : > { %p4553_p11 = pneg %p5140_p10  ;;  %s261_s22 = sshll.u32 %s5014_s21, 4  ;;  %s262_s22 = int_to_ptr.vmem [resolvable:$true] %s261_s22 }
  0x1e   : > { %s4902_s23 = scalar_lea.vmem %s246_s19, 12800  ;;  %p4910_p3 = scmp.lt.s32.totalorder %s246_s19, %s246_s19 }
  0x1f   : > { %p5148_p12 = pnand %p6353_p9, %p4553_p11  ;;  %p4903_p0 = scmp.ne.s32.totalorder %s246_s19, %s4902_s23 }
  0x20   : > { %p4911_p4 = scmp.lt.s32.totalorder %s4902_s23, %s4902_s23 }
  0x21   : > { %p4893_p13 = pneg %p5148_p12 }
  0x22   : > { %p4912_p7 = por %p4911_p4, %p4910_p3 }
  0x23   : > { %p4905_p1 = pnand %p4903_p0, %p4893_p13 }
  0x25   : > { %p4906_p2 = pneg %p4905_p1 }
  0x27   : > { %p4913_p8 = pnand %p4912_p7, %p4906_p2 }
  0x29   : > { %4916 = shalt.err (!%p4913_p8)
}
  0x2a   : > { %s5015_s24 = smov 128   ;;  %s5016_s25 = smov 8  }
  0x2b   : > { %s6436_s3 = sld [smem:[#allocation22_spill]]  ;;  %s4928_s12 = scalar_lea.vmem %s262_s22, 8192 }
  0x2c   : > { %p4929_p11 = scmp.ne.s32.totalorder %s262_s22, %s4928_s12  ;;  %p4936_p9 = scmp.lt.s32.totalorder %s262_s22, %s262_s22 }
  0x2d   : > { %p4937_p6 = scmp.lt.s32.totalorder %s4928_s12, %s4928_s12 }
  0x2e   : > { %p4931_p0 = pnand %p4929_p11, %p4893_p13 }
  0x2f   : > { %p4938_p3 = por %p4937_p6, %p4936_p9 }
  0x30   : > { %p4932_p1 = pneg %p4931_p0 }
  0x31   : > { %4556 = dma.hbm_to_vmem [thread:$0]  (!%p5148_p12), %s6436_s3, 12800, %s246_s19, [#allocation3], %s5015_s24, %s5015_s24, %s5016_s25  }
  0x32   : > { %p4939_p2 = pnand %p4938_p3, %p4932_p1 }
  0x34   : > { %4942 = shalt.err (!%p4939_p2)
}
  0x35   : > { %s6437_s5 = sld [smem:[#allocation23_spill]]  ;;  %p6438_p4 = scmp.eq.s32.totalorder (!%p5140_p10), %s5112_s9, 0 }
  0x37   : > { %291 = sbr.rel (%p5140_p10) target bundleno = 5581 (0x15cd), region = 52 }
  0x3b   : > { %4559 = dma.hbm_to_vmem [thread:$0]  (!%p5148_p12), %s6437_s5, 8192, %s262_s22, [#allocation6], %s5015_s24, %s5015_s24, %s5016_s25  }
  0x3c   : > { %4986 = dma.done.wait (%p6438_p4), [#allocation3], 12800   ;;  %p6439_p13 = pmov %p6438_p4 }
  0x3d   : > { %p6440_p7 = pmov %p6438_p4 }
  0x3e   : > { %4988 = vsyncadd (%p6439_p13), [#allocation3], 4294954496 }
  0x3f   : > { %4990 = dma.done.wait (%p6440_p7), [#allocation6], 8192   ;;  %p6441_p6 = pmov %p6438_p4 }
  0x40   : > { %p329_p9 = scmp.lt.s32.totalorder %s5112_s9, 3  ;;  %v5017_v0 = vmov 0.0   ;;  %vm5018_vm0 = vmmov 0   ;;  %v5019_v1 = vmov 0   ;;  %s6442_s0 = sld [smem:[#allocation20_spill]]  ;;  %vm359_vm1 = vcmask 64512  }
  0x41   : > { %4992 = vsyncadd (%p6441_p6), [#allocation6], 4294959104  ;;  %4221 = vmatprep.subr.mxu0 %v5017_v0  ;;  %4223 = vmatprep.mubr.msk.f32.mxu0 %vm5018_vm0, %v5017_v0  ;;  %v338_v3 = vld [vmem:[%s6345_s1] sm:$0xff]  ;;  %s6443_s2 = sld [smem:[#allocation21_spill]]  ;;  %v339_v5 = vld [vmem:[%s6345_s1 + $0x8] sm:$0xff]  ;;  %s6396_s13 = smov 17  }
  0x42   : > { %s330_s17 = scalar_select %p329_p9, %s5112_s9, 3  ;;  %4633 = vset.pattern.permute.xlu0 %v5019_v1  ;;  %4541 = vmatprep.subr.mxu1 %v5017_v0  ;;  %v595_v10 = vld [vmem:[%s6348_s4] sm:$0xff]  ;;  %v456_v14 = vld [vmem:[#allocation2 + $0x8] sm:$0xff]  ;;  %v462_v20 = vld [vmem:[#allocation2 + $0x10] sm:$0xff] }
  0x43   : > { %4226 = vmatprep.mubr.msk.f32.mxu1 %vm5018_vm0, %v5017_v0  ;;  %s6394_s18 = smov 18   ;;  %s6376_s20 = smov 14   ;;  %v451_v15 = vld [vmem:[#allocation2] sm:$0xff]  ;;  %v468_v22 = vld [vmem:[#allocation2 + $0x18] sm:$0xff]  ;;  %v480_v30 = vld [vmem:[#allocation2 + $0x28] sm:$0xff] }
  0x44   : > { %s4047_s19 = sshll.u32 %s330_s17, 5  ;;  %s6390_s17 = smov 16   ;;  %v474_v26 = vld [vmem:[#allocation2 + $0x20] sm:$0xff]  ;;  %v486_v34 = vld [vmem:[#allocation2 + $0x30] sm:$0xff]  ;;  %v492_v38 = vld [vmem:[#allocation2 + $0x38] sm:$0xff] }
  0x45   : > { %s6392_s21 = smov 10   ;;  %s6354_s23 = smov 9   ;;  %v498_v42 = vld [vmem:[#allocation2 + $0x40] sm:$0xff]  ;;  %v504_v46 = vld [vmem:[#allocation2 + $0x48] sm:$0xff]  ;;  %v510_v50 = vld [vmem:[#allocation2 + $0x50] sm:$0xff] }
  0x46   : > { %s5192_s22 = scalar_lea.vmem %s6442_s0, %s4047_s19  ;;  %s6388_s19 = smov 15   ;;  %v516_v54 = vld [vmem:[#allocation2 + $0x58] sm:$0xff]  ;;  %v520_v58 = vld [vmem:[#allocation2 + $0x60] sm:$0xff]  ;;  %v526_v61 = vld [vmem:[#allocation2 + $0x68] sm:$0xff] }
  0x47   : > { %v334_v2 = vld [vmem:[%s5192_s22] sm:$0xff]  ;;  %s6356_s24 = smov 8   ;;  %s6358_s25 = smov 7   ;;  %v342_v13 = vld [vmem:[%s6443_s2 + $0x8] sm:$0xff] }
  0x48   : > { %v341_v4 = vld [vmem:[%s6443_s2] sm:$0xff]  ;;  %4222 = vmatpush3.msra.mxu0 %v334_v2  ;;  %4542 = vmatpush3.msra.mxu1 %v334_v2  ;;  %s6360_s26 = smov 6   ;;  %s6362_s10 = smov 2  }
  0x49   : > { %346 = vperm.xlu0 %4633, %v341_v4   ;;  %4224 = vmatmul.mubr.msk.f32.vlgmr.msra.gmra.mxu0 %vm359_vm1, %v338_v3  ;;  %s6364_s12 = smov 1   ;;  %v532_v4 = vld [vmem:[#allocation2 + $0x70] sm:$0xff]  ;;  %s6456_s0 = smov 120  }
  0x4a   : > { %4227 = vmatmul.mubr.msk.f32.vlgmr.msra.gmra.mxu1 %vm359_vm1, %v339_v5  ;;  %4293 = vmatprep.subr.mxu1 %v5017_v0  ;;  %s6457_s3 = smov 114   ;;  %s6458_s5 = smov 118  }
  0x4b   : > { %4229 = vmatprep.mubr.msk.f32.mxu1 %vm5018_vm0, %v5017_v0  ;;  %s6459_s14 = smov 112   ;;  %s6460_s29 = smov 113  }
  0x4c   : > { %s6461_s27 = smov 111   ;;  %s6462_s15 = smov 110  }
  0x4d   : > { %s6463_s28 = smov 17   ;;  %s6464_s9 = smov 18  }
  0x4e   : > { %s6465_s11 = smov 15   ;;  %s6466_s16 = smov 16  }
  0x4f   : > { %s6467_s8 = smov 10  }
  0xc4   : > { %v347_v6 = vpop.permute.xlu0 %346 }
 0x109   : > { %v435_v7 = vpop.f32.mrf.mxu0 }
 0x10a   : > { %v5209_v8 = vadd.f32 %v435_v7, %v347_v6  ;;  %v5258_v11 = vpop.f32.mrf.mxu1  ;;  %v538_v7 = vld [vmem:[#allocation2 + $0x78] sm:$0xff] }
 0x10b   : > { %v4225_v9 = vpop.f32.mrf.mxu0 }
 0x10c   : > { %453 = vrot.lane.b32.xlu1 %v5209_v8, %s6396_s13  ;;  %449 = vrot.lane.b32.xlu0 %v5209_v8, %s6394_s18  ;;  %v4228_v12 = vpop.f32.mrf.mxu1  ;;  %v521_v3 = vmul.f32 %v520_v58, %v5209_v8 }
 0x110   : > { %459 = vrot.lane.b32.xlu1 %v5209_v8, %s6390_s17  ;;  %465 = vrot.lane.b32.xlu0 %v5209_v8, %s6388_s19 }
 0x114   : > { %471 = vrot.lane.b32.xlu1 %v5209_v8, %s6376_s20  ;;  %477 = vrot.lane.b32.xlu0 %v5209_v8, %s6392_s21  ;;  %s6448_s20 = smov 7  }
 0x118   : > { %483 = vrot.lane.b32.xlu1 %v5209_v8, %s6354_s23  ;;  %489 = vrot.lane.b32.xlu0 %v5209_v8, %s6356_s24  ;;  %s6366_s23 = smov 127   ;;  %s6368_s24 = smov 126  }
 0x11c   : > { %495 = vrot.lane.b32.xlu1 %v5209_v8, %s6358_s25  ;;  %501 = vrot.lane.b32.xlu0 %v5209_v8, %s6360_s26  ;;  %s6370_s25 = smov 122   ;;  %s6372_s26 = smov 121  }
 0x120   : > { %507 = vrot.lane.b32.xlu1 %v5209_v8, %s6362_s10  ;;  %513 = vrot.lane.b32.xlu0 %v5209_v8, %s6364_s12  ;;  %s6374_s10 = smov 120   ;;  %s6378_s12 = smov 119  }
 0x124   : > { %523 = vrot.lane.b32.xlu1 %v5209_v8, %s6366_s23  ;;  %529 = vrot.lane.b32.xlu0 %v5209_v8, %s6368_s24  ;;  %s6380_s23 = smov 118   ;;  %s6382_s24 = smov 114  }
 0x128   : > { %535 = vrot.lane.b32.xlu1 %v5209_v8, %s6370_s25  ;;  %541 = vrot.lane.b32.xlu0 %v5209_v8, %s6372_s26  ;;  %s6384_s25 = smov 113   ;;  %s6400_s26 = smov 112  }
 0x12c   : > { %547 = vrot.lane.b32.xlu1 %v5209_v8, %s6374_s10  ;;  %553 = vrot.lane.b32.xlu0 %v5209_v8, %s6378_s12  ;;  %s6398_s12 = smov 111   ;;  %s6447_s10 = smov 6  }
 0x130   : > { %559 = vrot.lane.b32.xlu1 %v5209_v8, %s6380_s23  ;;  %565 = vrot.lane.b32.xlu0 %v5209_v8, %s6382_s24  ;;  %s6445_s23 = smov 8   ;;  %s6446_s24 = smov 9  }
 0x134   : > { %571 = vrot.lane.b32.xlu1 %v5209_v8, %s6384_s25  ;;  %577 = vrot.lane.b32.xlu0 %v5209_v8, %s6400_s26  ;;  %s6386_s25 = smov 110   ;;  %s6455_s26 = smov 119  }
 0x138   : > { %583 = vrot.lane.b32.xlu1 %v5209_v8, %s6398_s12  ;;  %598 = vperm.xlu0 %4633, %v595_v10   ;;  %s6454_s12 = smov 122  }
 0x13c   : > { %589 = vrot.lane.b32.xlu1 %v5209_v8, %s6386_s25  ;;  %351 = vperm.xlu0 %4633, %v342_v13   ;;  %v562_v8 = vld [vmem:[#allocation2 + $0x98] sm:$0xff]  ;;  %s6444_s25 = smov 14  }
 0x17e   : > { %v454_v16 = vpop.permute.xlu1 %453  ;;  %v450_v17 = vpop.permute.xlu0 %449 }
 0x17f   : > { %v457_v18 = vmul.f32 %v456_v14, %v454_v16  ;;  %v452_v19 = vmul.f32 %v451_v15, %v450_v17  ;;  %v544_v14 = vld [vmem:[#allocation2 + $0x80] sm:$0xff]  ;;  %v550_v17 = vld [vmem:[#allocation2 + $0x88] sm:$0xff] }
 0x181   : > { %v458_v24 = vadd.f32 %v457_v18, %v452_v19 }
 0x182   : > { %v460_v21 = vpop.permute.xlu1 %459  ;;  %v466_v23 = vpop.permute.xlu0 %465 }
 0x183   : > { %v463_v25 = vmul.f32 %v462_v20, %v460_v21  ;;  %v469_v28 = vmul.f32 %v468_v22, %v466_v23  ;;  %v556_v22 = vld [vmem:[#allocation2 + $0x90] sm:$0xff] }
 0x185   : > { %v464_v27 = vadd.f32 %v463_v25, %v458_v24 }
 0x186   : > { %v472_v29 = vpop.permute.xlu1 %471  ;;  %v478_v31 = vpop.permute.xlu0 %477 }
 0x187   : > { %v470_v32 = vadd.f32 %v469_v28, %v464_v27  ;;  %v475_v33 = vmul.f32 %v474_v26, %v472_v29  ;;  %v481_v36 = vmul.f32 %v480_v30, %v478_v31  ;;  %v568_v29 = vld [vmem:[#allocation2 + $0xa0] sm:$0xff] }
 0x189   : > { %v476_v35 = vadd.f32 %v475_v33, %v470_v32  ;;  %v574_v32 = vld [vmem:[#allocation2 + $0xa8] sm:$0xff] }
 0x18a   : > { %v484_v37 = vpop.permute.xlu1 %483  ;;  %v490_v39 = vpop.permute.xlu0 %489 }
 0x18b   : > { %v482_v40 = vadd.f32 %v481_v36, %v476_v35  ;;  %v487_v41 = vmul.f32 %v486_v34, %v484_v37  ;;  %v493_v44 = vmul.f32 %v492_v38, %v490_v39  ;;  %v580_v36 = vld [vmem:[#allocation2 + $0xb0] sm:$0xff] }
 0x18d   : > { %v488_v43 = vadd.f32 %v487_v41, %v482_v40  ;;  %v586_v40 = vld [vmem:[#allocation2 + $0xb8] sm:$0xff] }
 0x18e   : > { %v496_v45 = vpop.permute.xlu1 %495  ;;  %v502_v47 = vpop.permute.xlu0 %501 }
 0x18f   : > { %v494_v48 = vadd.f32 %v493_v44, %v488_v43  ;;  %v499_v49 = vmul.f32 %v498_v42, %v496_v45  ;;  %v505_v52 = vmul.f32 %v504_v46, %v502_v47  ;;  %v592_v44 = vld [vmem:[#allocation2 + $0xc0] sm:$0xff] }
 0x191   : > { %v500_v51 = vadd.f32 %v499_v49, %v494_v48 }
 0x192   : > { %v508_v53 = vpop.permute.xlu1 %507  ;;  %v514_v55 = vpop.permute.xlu0 %513 }
 0x193   : > { %v506_v56 = vadd.f32 %v505_v52, %v500_v51  ;;  %v511_v57 = vmul.f32 %v510_v50, %v508_v53  ;;  %v517_v60 = vmul.f32 %v516_v54, %v514_v55 }
 0x195   : > { %v512_v59 = vadd.f32 %v511_v57, %v506_v56 }
 0x196   : > { %v524_v62 = vpop.permute.xlu1 %523  ;;  %v530_v63 = vpop.permute.xlu0 %529 }
 0x197   : > { %v518_v2 = vadd.f32 %v517_v60, %v512_v59  ;;  %v527_v6 = vmul.f32 %v526_v61, %v524_v62  ;;  %v533_v13 = vmul.f32 %v532_v4, %v530_v63 }
 0x199   : > { %v522_v5 = vadd.f32 %v521_v3, %v518_v2 }
 0x19a   : > { %v536_v9 = vpop.permute.xlu1 %535  ;;  %v542_v10 = vpop.permute.xlu0 %541 }
 0x19b   : > { %v528_v12 = vadd.f32 %v527_v6, %v522_v5  ;;  %v539_v16 = vmul.f32 %v538_v7, %v536_v9  ;;  %v545_v21 = vmul.f32 %v544_v14, %v542_v10 }
 0x19d   : > { %v534_v15 = vadd.f32 %v533_v13, %v528_v12 }
 0x19e   : > { %v548_v18 = vpop.permute.xlu1 %547  ;;  %v554_v19 = vpop.permute.xlu0 %553 }
 0x19f   : > { %v540_v20 = vadd.f32 %v539_v16, %v534_v15  ;;  %v551_v24 = vmul.f32 %v550_v17, %v548_v18  ;;  %v557_v28 = vmul.f32 %v556_v22, %v554_v19 }
 0x1a1   : > { %v546_v23 = vadd.f32 %v545_v21, %v540_v20 }
 0x1a2   : > { %v560_v25 = vpop.permute.xlu1 %559  ;;  %v566_v26 = vpop.permute.xlu0 %565 }
 0x1a3   : > { %v552_v27 = vadd.f32 %v551_v24, %v546_v23  ;;  %v563_v31 = vmul.f32 %v562_v8, %v560_v25  ;;  %v569_v35 = vmul.f32 %v568_v29, %v566_v26  ;;  %v855_v23 = vld [vmem:[#allocation5 + $0x60] sm:$0xff]  ;;  %v858_v26 = vld [vmem:[#allocation5 + $0x78] sm:$0xff] }
 0x1a5   : > { %v558_v30 = vadd.f32 %v557_v28, %v552_v27 }
 0x1a6   : > { %v572_v33 = vpop.permute.xlu1 %571  ;;  %v578_v37 = vpop.permute.xlu0 %577 }
 0x1a7   : > { %v564_v34 = vadd.f32 %v563_v31, %v558_v30  ;;  %v575_v39 = vmul.f32 %v574_v32, %v572_v33  ;;  %v581_v43 = vmul.f32 %v580_v36, %v578_v37  ;;  %v857_v31 = vld [vmem:[#allocation5 + $0x70] sm:$0xff]  ;;  %v854_v37 = vld [vmem:[#allocation5 + $0x58] sm:$0xff] }
 0x1a9   : > { %v570_v38 = vadd.f32 %v569_v35, %v564_v34  ;;  %v856_v34 = vld [vmem:[#allocation5 + $0x68] sm:$0xff] }
 0x1aa   : > { %v584_v41 = vpop.permute.xlu1 %583 }
 0x1ab   : > { %v576_v42 = vadd.f32 %v575_v39, %v570_v38  ;;  %v587_v46 = vmul.f32 %v586_v40, %v584_v41  ;;  %v853_v40 = vld [vmem:[#allocation5 + $0x50] sm:$0xff] }
 0x1ad   : > { %v582_v45 = vadd.f32 %v581_v43, %v576_v42  ;;  %v852_v43 = vld [vmem:[#allocation5 + $0x48] sm:$0xff] }
 0x1ae   : > { %v590_v47 = vpop.permute.xlu1 %589 }
 0x1af   : > { %v588_v48 = vadd.f32 %v587_v46, %v582_v45  ;;  %v593_v49 = vmul.f32 %v592_v44, %v590_v47  ;;  %v851_v46 = vld [vmem:[#allocation5 + $0x40] sm:$0xff] }
 0x1b1   : > { %v594_v50 = vadd.f32 %v593_v49, %v588_v48  ;;  %v850_v49 = vld [vmem:[#allocation5 + $0x38] sm:$0xff] }
 0x1b3   : > { %v599_v51 = vpop.permute.xlu0 %598 }
 0x1b4   : > { %v601_v52 = vadd.f32 %v599_v51, %v594_v50 }
 0x1b6   : > { %602 = vxpose.xlu1.b32.start.end [1/1] (short) %v601_v52, 128  ;;  %v849_v52 = vld [vmem:[#allocation5 + $0x30] sm:$0xff] }
 0x1b7   : > { %v352_v53 = vpop.permute.xlu0 %351 }
 0x1b8   : > { %v441_v54 = vadd.f32 %v5258_v11, %v352_v53 }
 0x1ba   : > { %4232 = vmatprep.subr.mxu0 %v441_v54 }
 0x1bb   : > { %4233 = vmatpush3.msra.mxu0 %v441_v54 }
 0x1bc   : > { %4258 = vmatprep.subr.mxu0 %v5017_v0 }
 0x1d4   : > { %4634 = vset.pattern.permute.xlu1 %v5019_v1 }
 0x232   : > { %v618_v55 = vpop.trf.xlu1 }
 0x233   : > { %4234 = vmatprep.mubr.msk.f32.mxu0 %vm359_vm1, %v618_v55  ;;  %v848_v55 = vld [vmem:[#allocation5 + $0x28] sm:$0xff] }
 0x236   : > { %v619_v56 = vpop.trf.xlu1 }
 0x237   : > { %4235 = vmatmul.mubr.msk.f32.vlgmr.msra.gmra.mxu0 %vm359_vm1, %v619_v56  ;;  %v340_v56 = vld [vmem:[%s6345_s1 + $0x10] sm:$0xff] }
 0x238   : > { %4230 = vmatmul.mubr.msk.f32.gmra.mxu1 %vm359_vm1, %v340_v56 }
 0x239   : > { %4295 = vmatprep.mubr.msk.f32.mxu1 %vm5018_vm0, %v5017_v0 }
 0x23a   : > { %v620_v57 = vpop.trf.xlu1 }
 0x23b   : > { %4237 = vmatprep.mubr.msk.f32.mxu0 %vm359_vm1, %v620_v57 }
 0x23e   : > { %v621_v58 = vpop.trf.xlu1 }
 0x23f   : > { %4238 = vmatmul.mubr.msk.f32.gmra.mxu0 %vm359_vm1, %v621_v58 }
 0x242   : > { %v622_v59 = vpop.trf.xlu1 }
 0x243   : > { %4240 = vmatprep.mubr.msk.f32.mxu0 %vm359_vm1, %v622_v59  ;;  %v847_v59 = vld [vmem:[#allocation5 + $0x20] sm:$0xff] }
 0x246   : > { %v623_v11 = vpop.trf.xlu1 }
 0x247   : > { %4241 = vmatmul.mubr.msk.f32.gmra.mxu0 %vm359_vm1, %v623_v11 }
 0x24a   : > { %v624_v60 = vpop.trf.xlu1 }
 0x24b   : > { %4243 = vmatprep.mubr.msk.f32.mxu0 %vm359_vm1, %v624_v60 }
 0x24e   : > { %v625_v1 = vpop.trf.xlu1 }
 0x24f   : > { %4244 = vmatmul.mubr.msk.f32.gmra.mxu0 %vm359_vm1, %v625_v1  ;;  %v846_v1 = vld [vmem:[#allocation5 + $0x18] sm:$0xff] }
 0x252   : > { %v626_v61 = vpop.trf.xlu1 }
 0x253   : > { %4246 = vmatprep.mubr.msk.f32.mxu0 %vm359_vm1, %v626_v61 }
 0x256   : > { %v627_v62 = vpop.trf.xlu1 }
 0x257   : > { %4247 = vmatmul.mubr.msk.f32.gmra.mxu0 %vm359_vm1, %v627_v62 }
 0x25a   : > { %v628_v63 = vpop.trf.xlu1 }
 0x25b   : > { %4249 = vmatprep.mubr.msk.f32.mxu0 %vm359_vm1, %v628_v63  ;;  %v845_v63 = vld [vmem:[#allocation5 + $0x10] sm:$0xff] }
 0x25e   : > { %v629_v2 = vpop.trf.xlu1 }
 0x25f   : > { %4250 = vmatmul.mubr.msk.f32.gmra.mxu0 %vm359_vm1, %v629_v2 }
 0x262   : > { %v630_v3 = vpop.trf.xlu1 }
 0x263   : > { %4252 = vmatprep.mubr.msk.f32.mxu0 %vm359_vm1, %v630_v3 }
 0x266   : > { %v631_v4 = vpop.trf.xlu1 }
 0x267   : > { %4253 = vmatmul.mubr.msk.f32.gmra.mxu0 %vm359_vm1, %v631_v4  ;;  %v844_v4 = vld [vmem:[#allocation5 + $0x8] sm:$0xff] }
 0x26a   : > { %v632_v5 = vpop.trf.xlu1 }
 0x26b   : > { %4255 = vmatprep.mubr.msk.f32.mxu0 %vm359_vm1, %v632_v5 }
 0x26e   : > { %v633_v6 = vpop.trf.xlu1 }
 0x26f   : > { %4256 = vmatmul.mubr.msk.f32.gmra.mxu0 %vm359_vm1, %v633_v6 }
 0x270   : > { %4290 = vmatprep.mubr.msk.f32.mxu0 %vm5018_vm0, %v5017_v0 }
 0x2f7   : > { %v5289_v7 = vpop.f32.mrf.mxu0 }
 0x2f8   : > { %v828_v2 = vmul.f32 0.35355338, %v5289_v7 }
 0x2f9   : > { %v5291_v9 = vpop.f32.mrf.mxu0 }
 0x2fa   : > { %v827_v5 = vmul.f32 0.35355338, %v5291_v9  ;;  %v5343_v6 = vadd.f32 %v844_v4, %v828_v2 }
 0x2ff   : > { %v4239_v10 = vpop.f32.mrf.mxu0 }
 0x300   : > { %v830_v11 = vmul.f32 0.35355338, %v4239_v10  ;;  %v843_v10 = vld [vmem:[#allocation5] sm:$0xff] }
 0x301   : > { %v5293_v12 = vpop.f32.mrf.mxu0 }
 0x302   : > { %v829_v61 = vmul.f32 0.35355338, %v5293_v12  ;;  %v5335_v62 = vadd.f32 %v846_v1, %v830_v11  ;;  %v5346_v12 = vadd.f32 %v843_v10, %v827_v5 }
 0x304   : > { %v5339_v3 = vadd.f32 %v845_v63, %v829_v61 }
 0x307   : > { %v4242_v13 = vpop.f32.mrf.mxu0 }
 0x308   : > { %v832_v53 = vmul.f32 0.35355338, %v4242_v13 }
 0x309   : > { %v768_v14 = vpop.f32.mrf.mxu0 }
 0x30a   : > { %v831_v57 = vmul.f32 0.35355338, %v768_v14  ;;  %v5326_v58 = vadd.f32 %v848_v55, %v832_v53 }
 0x30c   : > { %v5331_v60 = vadd.f32 %v847_v59, %v831_v57 }
 0x30f   : > { %v4245_v15 = vpop.f32.mrf.mxu0 }
 0x310   : > { %v834_v47 = vmul.f32 0.35355338, %v4245_v15 }
 0x311   : > { %v778_v16 = vpop.f32.mrf.mxu0 }
 0x312   : > { %v833_v50 = vmul.f32 0.35355338, %v778_v16  ;;  %v5316_v51 = vadd.f32 %v850_v49, %v834_v47 }
 0x314   : > { %v5319_v54 = vadd.f32 %v849_v52, %v833_v50 }
 0x317   : > { %v4248_v17 = vpop.f32.mrf.mxu0 }
 0x318   : > { %v836_v41 = vmul.f32 0.35355338, %v4248_v17 }
 0x319   : > { %v788_v18 = vpop.f32.mrf.mxu0 }
 0x31a   : > { %v835_v44 = vmul.f32 0.35355338, %v788_v18  ;;  %v5310_v45 = vadd.f32 %v852_v43, %v836_v41 }
 0x31c   : > { %v5313_v48 = vadd.f32 %v851_v46, %v835_v44 }
 0x31f   : > { %v4251_v19 = vpop.f32.mrf.mxu0 }
 0x320   : > { %v838_v35 = vmul.f32 0.35355338, %v4251_v19 }
 0x321   : > { %v798_v20 = vpop.f32.mrf.mxu0 }
 0x322   : > { %v837_v38 = vmul.f32 0.35355338, %v798_v20  ;;  %v5304_v39 = vadd.f32 %v854_v37, %v838_v35 }
 0x324   : > { %v5307_v42 = vadd.f32 %v853_v40, %v837_v38 }
 0x327   : > { %v4254_v21 = vpop.f32.mrf.mxu0 }
 0x328   : > { %v840_v32 = vmul.f32 0.35355338, %v4254_v21 }
 0x329   : > { %v808_v22 = vpop.f32.mrf.mxu0 }
 0x32a   : > { %v839_v24 = vmul.f32 0.35355338, %v808_v22  ;;  %v5301_v36 = vadd.f32 %v856_v34, %v840_v32 }
 0x32c   : > { %v5295_v8 = vadd.f32 %v855_v23, %v839_v24 }
 0x32e   : > { %899 = vmax.xlane.f32.xlu1 %v5295_v8 }
 0x32f   : > { %v4257_v25 = vpop.f32.mrf.mxu0 }
 0x330   : > { %v842_v27 = vmul.f32 0.35355338, %v4257_v25 }
 0x331   : > { %v818_v28 = vpop.f32.mrf.mxu0 }
 0x332   : > { %v841_v29 = vmul.f32 0.35355338, %v818_v28  ;;  %v874_v30 = vadd.f32 %v858_v26, %v842_v27 }
 0x334   : > { %905 = vmax.xlane.f32.xlu0 %v874_v30  ;;  %v5298_v33 = vadd.f32 %v857_v31, %v841_v29 }
 0x338   : > { %903 = vmax.xlane.f32.xlu0 %v5298_v33 }
 0x33c   : > { %901 = vmax.xlane.f32.xlu0 %v5301_v36 }
 0x340   : > { %897 = vmax.xlane.f32.xlu0 %v5304_v39 }
 0x344   : > { %895 = vmax.xlane.f32.xlu0 %v5307_v42 }
 0x348   : > { %893 = vmax.xlane.f32.xlu0 %v5310_v45 }
 0x34c   : > { %891 = vmax.xlane.f32.xlu0 %v5313_v48 }
 0x350   : > { %889 = vmax.xlane.f32.xlu0 %v5316_v51 }
 0x354   : > { %887 = vmax.xlane.f32.xlu0 %v5319_v54 }
 0x358   : > { %885 = vmax.xlane.f32.xlu0 %v5326_v58 }
 0x35c   : > { %883 = vmax.xlane.f32.xlu0 %v5331_v60 }
 0x360   : > { %881 = vmax.xlane.f32.xlu0 %v5335_v62 }
 0x364   : > { %879 = vmax.xlane.f32.xlu0 %v5339_v3 }
 0x368   : > { %877 = vmax.xlane.f32.xlu0 %v5343_v6 }
 0x36c   : > { %875 = vmax.xlane.f32.xlu0 %v5346_v12 }
 0x3b7   : > { %v900_v17 = vpop.xlane.xlu1 %899 }
 0x3b8   : > { %v919_v9 = vsub.f32 %v5295_v8, %v900_v17 }
 0x3ba   : > { %v947_v23 = vmul.f32 1.442695, %v919_v9 }
 0x3bd   : > { %v906_v13 = vpop.xlane.xlu0 %905 }
 0x3be   : > { %v922_v14 = vsub.f32 %v874_v30, %v906_v13 }
 0x3c0   : > { %v953_v15 = vmul.f32 1.442695, %v922_v14  ;;  %v5412_v14 = vpop.f32.mrf.mxu1 }
 0x3c1   : > { %v904_v7 = vpop.xlane.xlu0 %903 }
 0x3c2   : > { %4635 = vpow2.f32 %v953_v15  ;;  %v921_v16 = vsub.f32 %v5298_v33, %v904_v7  ;;  %v343_v15 = vld [vmem:[%s6443_s2 + $0x10] sm:$0xff]  ;;  %v4231_v7 = vpop.f32.mrf.mxu1 }
 0x3c4   : > { %v951_v18 = vmul.f32 1.442695, %v921_v16 }
 0x3c5   : > { %v902_v19 = vpop.xlane.xlu0 %901 }
 0x3c6   : > { %4637 = vpow2.f32 %v951_v18  ;;  %v920_v20 = vsub.f32 %v5301_v36, %v902_v19 }
 0x3c8   : > { %v949_v21 = vmul.f32 1.442695, %v920_v20 }
 0x3c9   : > { %v898_v22 = vpop.xlane.xlu0 %897 }
 0x3ca   : > { %4639 = vpow2.f32 %v949_v21  ;;  %v918_v24 = vsub.f32 %v5304_v39, %v898_v22 }
 0x3cb   : > { %4641 = vpow2.f32 %v947_v23 }
 0x3cc   : > { %v945_v26 = vmul.f32 1.442695, %v918_v24 }
 0x3cd   : > { %v896_v25 = vpop.xlane.xlu0 %895 }
 0x3ce   : > { %v917_v27 = vsub.f32 %v5307_v42, %v896_v25  ;;  %4643 = vpow2.f32 %v945_v26 }
 0x3cf   : > { %v5354_v28 = vpop.eup %4635 }
 0x3d0   : > { %985 = vadd.xlane.f32.xlu0 %v5354_v28  ;;  %v943_v8 = vmul.f32 1.442695, %v917_v27 }
 0x3d1   : > { %v894_v29 = vpop.xlane.xlu0 %893 }
 0x3d2   : > { %v916_v30 = vsub.f32 %v5310_v45, %v894_v29  ;;  %4645 = vpow2.f32 %v943_v8 }
 0x3d3   : > { %v5358_v31 = vpop.eup %4637 }
 0x3d4   : > { %983 = vadd.xlane.f32.xlu0 %v5358_v31  ;;  %v941_v33 = vmul.f32 1.442695, %v916_v30 }
 0x3d5   : > { %v892_v32 = vpop.xlane.xlu0 %891 }
 0x3d6   : > { %v915_v34 = vsub.f32 %v5313_v48, %v892_v32  ;;  %4647 = vpow2.f32 %v941_v33 }
 0x3d7   : > { %v5362_v35 = vpop.eup %4639 }
 0x3d8   : > { %981 = vadd.xlane.f32.xlu0 %v5362_v35  ;;  %v939_v37 = vmul.f32 1.442695, %v915_v34  ;;  %v5366_v39 = vpop.eup %4641 }
 0x3d9   : > { %v890_v36 = vpop.xlane.xlu0 %889 }
 0x3da   : > { %v914_v38 = vsub.f32 %v5316_v51, %v890_v36  ;;  %4649 = vpow2.f32 %v939_v37 }
 0x3db   : > { %v5370_v43 = vpop.eup %4643 }
 0x3dc   : > { %979 = vadd.xlane.f32.xlu0 %v5366_v39  ;;  %v937_v41 = vmul.f32 1.442695, %v914_v38 }
 0x3dd   : > { %v888_v40 = vpop.xlane.xlu0 %887 }
 0x3de   : > { %v913_v42 = vsub.f32 %v5319_v54, %v888_v40  ;;  %4651 = vpow2.f32 %v937_v41 }
 0x3df   : > { %v5374_v47 = vpop.eup %4645 }
 0x3e0   : > { %977 = vadd.xlane.f32.xlu0 %v5370_v43  ;;  %v935_v45 = vmul.f32 1.442695, %v913_v42 }
 0x3e1   : > { %v886_v44 = vpop.xlane.xlu0 %885 }
 0x3e2   : > { %v912_v46 = vsub.f32 %v5326_v58, %v886_v44  ;;  %4653 = vpow2.f32 %v935_v45 }
 0x3e3   : > { %v5378_v51 = vpop.eup %4647 }
 0x3e4   : > { %975 = vadd.xlane.f32.xlu0 %v5374_v47  ;;  %v933_v49 = vmul.f32 1.442695, %v912_v46 }
 0x3e5   : > { %v884_v48 = vpop.xlane.xlu0 %883 }
 0x3e6   : > { %v911_v50 = vsub.f32 %v5331_v60, %v884_v48  ;;  %4655 = vpow2.f32 %v933_v49 }
 0x3e7   : > { %v5382_v55 = vpop.eup %4649 }
 0x3e8   : > { %973 = vadd.xlane.f32.xlu0 %v5378_v51  ;;  %v931_v53 = vmul.f32 1.442695, %v911_v50 }
 0x3e9   : > { %v882_v52 = vpop.xlane.xlu0 %881 }
 0x3ea   : > { %v910_v54 = vsub.f32 %v5335_v62, %v882_v52  ;;  %4657 = vpow2.f32 %v931_v53 }
 0x3eb   : > { %v5386_v59 = vpop.eup %4651 }
 0x3ec   : > { %971 = vadd.xlane.f32.xlu0 %v5382_v55  ;;  %v929_v56 = vmul.f32 1.442695, %v910_v54 }
 0x3ed   : > { %v880_v57 = vpop.xlane.xlu0 %879 }
 0x3ee   : > { %v909_v58 = vsub.f32 %v5339_v3, %v880_v57  ;;  %4659 = vpow2.f32 %v929_v56 }
 0x3ef   : > { %v5390_v61 = vpop.eup %4653 }
 0x3f0   : > { %v927_v11 = vmul.f32 1.442695, %v909_v58  ;;  %969 = vadd.xlane.f32.xlu0 %v5386_v59 }
 0x3f1   : > { %v878_v60 = vpop.xlane.xlu0 %877 }
 0x3f2   : > { %4661 = vpow2.f32 %v927_v11  ;;  %v908_v1 = vsub.f32 %v5343_v6, %v878_v60 }
 0x3f3   : > { %v5394_v3 = vpop.eup %4655 }
 0x3f4   : > { %v925_v62 = vmul.f32 1.442695, %v908_v1  ;;  %967 = vadd.xlane.f32.xlu0 %v5390_v61 }
 0x3f5   : > { %v876_v63 = vpop.xlane.xlu0 %875 }
 0x3f6   : > { %4663 = vpow2.f32 %v925_v62  ;;  %v907_v2 = vsub.f32 %v5346_v12, %v876_v63  ;;  %v3939_v62 = vld [vmem:[%s6443_s2 + $0x18] sm:$0xff]  ;;  %v335_v63 = vld [vmem:[%s5192_s22 + $0x8] sm:$0xff] }
 0x3f7   : > { %v5397_v5 = vpop.eup %4657 }
 0x3f8   : > { %v923_v4 = vmul.f32 1.442695, %v907_v2  ;;  %965 = vadd.xlane.f32.xlu0 %v5394_v3 }
 0x3fa   : > { %4665 = vpow2.f32 %v923_v4  ;;  %v3936_v4 = vld [vmem:[%s6345_s1 + $0x18] sm:$0xff] }
 0x3fb   : > { %v5400_v6 = vpop.eup %4659 }
 0x3fc   : > { %963 = vadd.xlane.f32.xlu0 %v5397_v5 }
 0x3ff   : > { %v5402_v10 = vpop.eup %4661 }
 0x400   : > { %961 = vadd.xlane.f32.xlu0 %v5400_v6  ;;  %959 = vadd.xlane.f32.xlu1 %v5402_v10 }
 0x403   : > { %v5406_v13 = vpop.eup %4663 }
 0x404   : > { %957 = vadd.xlane.f32.xlu0 %v5406_v13 }
 0x407   : > { %v5409_v12 = vpop.eup %4665 }
 0x408   : > { %955 = vadd.xlane.f32.xlu1 %v5409_v12 }
 0x419   : > { %1105 = vperm.xlu1 %4634, %v3939_v62   ;;  %v1285_v62 = vld [vmem:[#allocation2 + $0x130] sm:$0xff] }
 0x41a   : > { %356 = vperm.xlu0 %4633, %v343_v15   ;;  %v3945_v15 = vld [vmem:[%s6348_s4 + $0x8] sm:$0xff] }
 0x459   : > { %v986_v16 = vpop.xlane.xlu0 %985 }
 0x45a   : > { %4667 = vrcp.f32 %v986_v16  ;;  %v3940_v16 = vld [vmem:[%s6443_s2 + $0x20] sm:$0xff] }
 0x45d   : > { %v984_v17 = vpop.xlane.xlu0 %983 }
 0x45e   : > { %4669 = vrcp.f32 %v984_v17 }
 0x461   : > { %v982_v18 = vpop.xlane.xlu0 %981 }
 0x462   : > { %4671 = vrcp.f32 %v982_v18  ;;  %v1215_v18 = vld [vmem:[#allocation2 + $0xd0] sm:$0xff] }
 0x465   : > { %v980_v19 = vpop.xlane.xlu0 %979 }
 0x466   : > { %4673 = vrcp.f32 %v980_v19  ;;  %v1210_v19 = vld [vmem:[#allocation2 + $0xc8] sm:$0xff] }
 0x467   : > { %v4668_v9 = vpop.eup %4667 }
 0x468   : > { %v1018_v20 = vmul.f32 %v4668_v9, %v5354_v28 }
 0x469   : > { %v978_v21 = vpop.xlane.xlu0 %977 }
 0x46a   : > { %4675 = vrcp.f32 %v978_v21  ;;  %4259 = vmatpush3.xpose.msra.mxu0 %v1018_v20 }
 0x46b   : > { %v4670_v22 = vpop.eup %4669  ;;  %4260 = vmatprep.subr.mxu0 %v5017_v0 }
 0x46c   : > { %v1017_v23 = vmul.f32 %v4670_v22, %v5358_v31 }
 0x46d   : > { %v976_v24 = vpop.xlane.xlu0 %975 }
 0x46e   : > { %4677 = vrcp.f32 %v976_v24  ;;  %4261 = vmatpush3.xpose.msra.mxu0 %v1017_v23  ;;  %v1221_v23 = vld [vmem:[#allocation2 + $0xd8] sm:$0xff]  ;;  %v1227_v24 = vld [vmem:[#allocation2 + $0xe0] sm:$0xff] }
 0x46f   : > { %v4672_v25 = vpop.eup %4671  ;;  %4262 = vmatprep.subr.mxu0 %v5017_v0 }
 0x470   : > { %v1016_v26 = vmul.f32 %v4672_v25, %v5362_v35 }
 0x471   : > { %v974_v27 = vpop.xlane.xlu0 %973 }
 0x472   : > { %4679 = vrcp.f32 %v974_v27  ;;  %4263 = vmatpush3.xpose.msra.mxu0 %v1016_v26 }
 0x473   : > { %v4674_v28 = vpop.eup %4673  ;;  %4264 = vmatprep.subr.mxu0 %v5017_v0 }
 0x474   : > { %v1015_v29 = vmul.f32 %v4674_v28, %v5366_v39 }
 0x475   : > { %v972_v8 = vpop.xlane.xlu0 %971 }
 0x476   : > { %4681 = vrcp.f32 %v972_v8  ;;  %4265 = vmatpush3.xpose.msra.mxu0 %v1015_v29  ;;  %v1233_v29 = vld [vmem:[#allocation2 + $0xe8] sm:$0xff] }
 0x477   : > { %v4676_v30 = vpop.eup %4675  ;;  %4266 = vmatprep.subr.mxu0 %v5017_v0 }
 0x478   : > { %v1014_v31 = vmul.f32 %v4676_v30, %v5370_v43 }
 0x479   : > { %v970_v32 = vpop.xlane.xlu0 %969 }
 0x47a   : > { %4683 = vrcp.f32 %v970_v32  ;;  %4267 = vmatpush3.xpose.msra.mxu0 %v1014_v31  ;;  %v1239_v31 = vld [vmem:[#allocation2 + $0xf0] sm:$0xff] }
 0x47b   : > { %v4678_v33 = vpop.eup %4677  ;;  %4268 = vmatprep.subr.mxu0 %v5017_v0 }
 0x47c   : > { %v1013_v34 = vmul.f32 %v4678_v33, %v5374_v47 }
 0x47d   : > { %v968_v35 = vpop.xlane.xlu0 %967 }
 0x47e   : > { %4685 = vrcp.f32 %v968_v35  ;;  %4269 = vmatpush3.xpose.msra.mxu0 %v1013_v34 }
 0x47f   : > { %v4680_v36 = vpop.eup %4679  ;;  %4270 = vmatprep.subr.mxu0 %v5017_v0 }
 0x480   : > { %v1012_v37 = vmul.f32 %v4680_v36, %v5378_v51  ;;  %v1245_v36 = vld [vmem:[#allocation2 + $0xf8] sm:$0xff] }
 0x481   : > { %v966_v38 = vpop.xlane.xlu0 %965 }
 0x482   : > { %4687 = vrcp.f32 %v966_v38  ;;  %4271 = vmatpush3.xpose.msra.mxu0 %v1012_v37 }
 0x483   : > { %v4682_v39 = vpop.eup %4681  ;;  %4272 = vmatprep.subr.mxu0 %v5017_v0 }
 0x484   : > { %v1011_v40 = vmul.f32 %v4682_v39, %v5382_v55  ;;  %v1251_v39 = vld [vmem:[#allocation2 + $0x100] sm:$0xff] }
 0x485   : > { %v964_v41 = vpop.xlane.xlu0 %963 }
 0x486   : > { %4689 = vrcp.f32 %v964_v41  ;;  %4273 = vmatpush3.xpose.msra.mxu0 %v1011_v40 }
 0x487   : > { %v4684_v42 = vpop.eup %4683  ;;  %4274 = vmatprep.subr.mxu0 %v5017_v0 }
 0x488   : > { %v1010_v43 = vmul.f32 %v4684_v42, %v5386_v59 }
 0x489   : > { %v962_v44 = vpop.xlane.xlu0 %961  ;;  %v960_v45 = vpop.xlane.xlu1 %959 }
 0x48a   : > { %4275 = vmatpush3.xpose.msra.mxu0 %v1010_v43  ;;  %4691 = vrcp.f32 %v962_v44  ;;  %v1257_v44 = vld [vmem:[#allocation2 + $0x108] sm:$0xff] }
 0x48b   : > { %v4686_v46 = vpop.eup %4685  ;;  %4276 = vmatprep.subr.mxu0 %v5017_v0  ;;  %4693 = vrcp.f32 %v960_v45 }
 0x48c   : > { %v1009_v47 = vmul.f32 %v4686_v46, %v5390_v61 }
 0x48d   : > { %v958_v48 = vpop.xlane.xlu0 %957 }
 0x48e   : > { %4277 = vmatpush3.xpose.msra.mxu0 %v1009_v47  ;;  %4695 = vrcp.f32 %v958_v48  ;;  %v1263_v47 = vld [vmem:[#allocation2 + $0x110] sm:$0xff] }
 0x48f   : > { %v4688_v49 = vpop.eup %4687  ;;  %4278 = vmatprep.subr.mxu0 %v5017_v0 }
 0x490   : > { %v1008_v50 = vmul.f32 %v4688_v49, %v5394_v3 }
 0x491   : > { %v956_v51 = vpop.xlane.xlu1 %955 }
 0x492   : > { %4279 = vmatpush3.xpose.msra.mxu0 %v1008_v50  ;;  %4697 = vrcp.f32 %v956_v51 }
 0x493   : > { %v4690_v52 = vpop.eup %4689  ;;  %4280 = vmatprep.subr.mxu0 %v5017_v0 }
 0x494   : > { %v1007_v53 = vmul.f32 %v4690_v52, %v5397_v5  ;;  %v1269_v52 = vld [vmem:[#allocation2 + $0x118] sm:$0xff] }
 0x495   : > { %v357_v60 = vpop.permute.xlu0 %356 }
 0x496   : > { %4281 = vmatpush3.xpose.msra.mxu0 %v1007_v53  ;;  %v446_v61 = vadd.f32 %v5412_v14, %v357_v60 }
 0x497   : > { %4282 = vmatprep.subr.mxu0 %v5017_v0  ;;  %v4692_v54 = vpop.eup %4691 }
 0x498   : > { %v1006_v55 = vmul.f32 %v4692_v54, %v5400_v6  ;;  %v4694_v56 = vpop.eup %4693  ;;  %v3937_v6 = vld [vmem:[%s6345_s1 + $0x20] sm:$0xff] }
 0x499   : > { %v1005_v57 = vmul.f32 %v4694_v56, %v5402_v10  ;;  %v1106_v10 = vpop.permute.xlu1 %1105 }
 0x49a   : > { %4283 = vmatpush3.xpose.msra.mxu0 %v1006_v55  ;;  %v1275_v55 = vld [vmem:[#allocation2 + $0x120] sm:$0xff] }
 0x49b   : > { %4284 = vmatprep.subr.mxu0 %v5017_v0  ;;  %v4696_v58 = vpop.eup %4695 }
 0x49c   : > { %v1004_v59 = vmul.f32 %v4696_v58, %v5406_v13 }
 0x49e   : > { %4285 = vmatpush3.xpose.msra.mxu0 %v1005_v57 }
 0x49f   : > { %4286 = vmatprep.subr.mxu0 %v5017_v0  ;;  %v4698_v11 = vpop.eup %4697 }
 0x4a0   : > { %v1003_v1 = vmul.f32 %v4698_v11, %v5409_v12  ;;  %v1279_v11 = vld [vmem:[#allocation2 + $0x128] sm:$0xff] }
 0x4a2   : > { %4287 = vmatpush3.xpose.msra.mxu0 %v1004_v59 }
 0x4a3   : > { %4288 = vmatprep.subr.mxu0 %v5017_v0 }
 0x4a6   : > { %4289 = vmatpush3.xpose.msra.mxu0 %v1003_v1 }
 0x4a9   : > { %4291 = vmatmul.mubr.f32.vlgmr.msra.gmra.mxu0 %v446_v61 }
 0x569   : > { %v5453_v2 = vpop.f32.mrf.mxu0 }
 0x56a   : > { %v1094_v3 = vadd.f32 %v5453_v2, %v335_v63 }
 0x56b   : > { %v4292_v5 = vpop.f32.mrf.mxu0 }
 0x56c   : > { %4294 = vmatpush3.msra.mxu1 %v1094_v3  ;;  %v1291_v5 = vld [vmem:[#allocation2 + $0x138] sm:$0xff] }
 0x56d   : > { %4296 = vmatmul.mubr.msk.f32.vlgmr.msra.gmra.mxu1 %vm359_vm1, %v3936_v4 }
 0x56e   : > { %4298 = vmatprep.mubr.msk.f32.mxu1 %vm5018_vm0, %v5017_v0 }
 0x571   : > { %4299 = vmatmul.mubr.msk.f32.gmra.mxu1 %vm359_vm1, %v3937_v6 }
 0x572   : > { %4301 = vmatprep.mubr.msk.f32.mxu1 %vm5018_vm0, %v5017_v0 }
 0x62d   : > { %v1193_v13 = vpop.f32.mrf.mxu1 }
 0x62e   : > { %v5468_v12 = vadd.f32 %v1193_v13, %v1106_v10 }
 0x62f   : > { %v4297_v14 = vpop.f32.mrf.mxu1 }
 0x630   : > { %1212 = vrot.lane.b32.xlu0 %v5468_v12, %s6396_s13  ;;  %1207 = vrot.lane.b32.xlu1 %v5468_v12, %s6394_s18  ;;  %s6452_s18 = smov 127   ;;  %s6453_s13 = smov 121   ;;  %v1280_v4 = vmul.f32 %v1279_v11, %v5468_v12  ;;  %v1297_v14 = vld [vmem:[#allocation2 + $0x140] sm:$0xff] }
 0x631   : > { %v5517_v7 = vpop.f32.mrf.mxu1 }
 0x633   : > { %v4300_v17 = vpop.f32.mrf.mxu1 }
 0x634   : > { %1224 = vrot.lane.b32.xlu0 %v5468_v12, %s6388_s19  ;;  %1218 = vrot.lane.b32.xlu1 %v5468_v12, %s6390_s17  ;;  %s6449_s19 = smov 1   ;;  %s6450_s17 = smov 2  }
 0x638   : > { %1236 = vrot.lane.b32.xlu0 %v5468_v12, %s6392_s21  ;;  %1230 = vrot.lane.b32.xlu1 %v5468_v12, %s6444_s25  ;;  %s6451_s21 = smov 126  }
 0x63c   : > { %1248 = vrot.lane.b32.xlu0 %v5468_v12, %s6445_s23  ;;  %1242 = vrot.lane.b32.xlu1 %v5468_v12, %s6446_s24 }
 0x640   : > { %1260 = vrot.lane.b32.xlu0 %v5468_v12, %s6447_s10  ;;  %1254 = vrot.lane.b32.xlu1 %v5468_v12, %s6448_s20 }
 0x644   : > { %1272 = vrot.lane.b32.xlu0 %v5468_v12, %s6449_s19  ;;  %1266 = vrot.lane.b32.xlu1 %v5468_v12, %s6450_s17 }
 0x648   : > { %1288 = vrot.lane.b32.xlu0 %v5468_v12, %s6451_s21  ;;  %1282 = vrot.lane.b32.xlu1 %v5468_v12, %s6452_s18 }
 0x64c   : > { %1300 = vrot.lane.b32.xlu0 %v5468_v12, %s6453_s13  ;;  %1294 = vrot.lane.b32.xlu1 %v5468_v12, %s6454_s12 }
 0x650   : > { %1312 = vrot.lane.b32.xlu0 %v5468_v12, %s6455_s26  ;;  %1306 = vrot.lane.b32.xlu1 %v5468_v12, %s6456_s0 }
 0x654   : > { %1324 = vrot.lane.b32.xlu0 %v5468_v12, %s6457_s3  ;;  %1318 = vrot.lane.b32.xlu1 %v5468_v12, %s6458_s5 }
 0x658   : > { %1336 = vrot.lane.b32.xlu0 %v5468_v12, %s6459_s14  ;;  %1330 = vrot.lane.b32.xlu1 %v5468_v12, %s6460_s29 }
 0x65c   : > { %1358 = vperm.xlu0 %4633, %v3945_v15   ;;  %1342 = vrot.lane.b32.xlu1 %v5468_v12, %s6461_s27 }
 0x660   : > { %1110 = vperm.xlu0 %4633, %v3940_v16   ;;  %1348 = vrot.lane.b32.xlu1 %v5468_v12, %s6462_s15 }
 0x6a2   : > { %v1213_v9 = vpop.permute.xlu0 %1212  ;;  %v1208_v20 = vpop.permute.xlu1 %1207 }
 0x6a3   : > { %v1216_v21 = vmul.f32 %v1215_v18, %v1213_v9  ;;  %v1211_v22 = vmul.f32 %v1210_v19, %v1208_v20  ;;  %v1303_v18 = vld [vmem:[#allocation2 + $0x148] sm:$0xff] }
 0x6a5   : > { %v1217_v27 = vadd.f32 %v1216_v21, %v1211_v22  ;;  %v1309_v21 = vld [vmem:[#allocation2 + $0x150] sm:$0xff] }
 0x6a6   : > { %v1225_v25 = vpop.permute.xlu0 %1224  ;;  %v1219_v26 = vpop.permute.xlu1 %1218 }
 0x6a7   : > { %v1222_v28 = vmul.f32 %v1221_v23, %v1219_v26  ;;  %v1228_v8 = vmul.f32 %v1227_v24, %v1225_v25  ;;  %v1315_v25 = vld [vmem:[#allocation2 + $0x158] sm:$0xff] }
 0x6a9   : > { %v1223_v30 = vadd.f32 %v1222_v28, %v1217_v27  ;;  %v1321_v28 = vld [vmem:[#allocation2 + $0x160] sm:$0xff] }
 0x6aa   : > { %v1237_v32 = vpop.permute.xlu0 %1236  ;;  %v1231_v33 = vpop.permute.xlu1 %1230 }
 0x6ab   : > { %v1229_v34 = vadd.f32 %v1228_v8, %v1223_v30  ;;  %v1234_v35 = vmul.f32 %v1233_v29, %v1231_v33  ;;  %v1240_v37 = vmul.f32 %v1239_v31, %v1237_v32  ;;  %v1327_v31 = vld [vmem:[#allocation2 + $0x168] sm:$0xff] }
 0x6ad   : > { %v1235_v38 = vadd.f32 %v1234_v35, %v1229_v34  ;;  %v1333_v34 = vld [vmem:[#allocation2 + $0x170] sm:$0xff] }
 0x6ae   : > { %v1249_v40 = vpop.permute.xlu0 %1248  ;;  %v1243_v41 = vpop.permute.xlu1 %1242 }
 0x6af   : > { %v1241_v42 = vadd.f32 %v1240_v37, %v1235_v38  ;;  %v1246_v43 = vmul.f32 %v1245_v36, %v1243_v41  ;;  %v1252_v45 = vmul.f32 %v1251_v39, %v1249_v40  ;;  %v1339_v38 = vld [vmem:[#allocation2 + $0x178] sm:$0xff] }
 0x6b1   : > { %v1247_v46 = vadd.f32 %v1246_v43, %v1241_v42  ;;  %v1345_v42 = vld [vmem:[#allocation2 + $0x180] sm:$0xff] }
 0x6b2   : > { %v1261_v48 = vpop.permute.xlu0 %1260  ;;  %v1255_v49 = vpop.permute.xlu1 %1254 }
 0x6b3   : > { %v1253_v50 = vadd.f32 %v1252_v45, %v1247_v46  ;;  %v1258_v51 = vmul.f32 %v1257_v44, %v1255_v49  ;;  %v1264_v53 = vmul.f32 %v1263_v47, %v1261_v48  ;;  %v1351_v46 = vld [vmem:[#allocation2 + $0x188] sm:$0xff] }
 0x6b5   : > { %v1259_v54 = vadd.f32 %v1258_v51, %v1253_v50 }
 0x6b6   : > { %v1273_v56 = vpop.permute.xlu0 %1272  ;;  %v1267_v57 = vpop.permute.xlu1 %1266 }
 0x6b7   : > { %v1265_v58 = vadd.f32 %v1264_v53, %v1259_v54  ;;  %v1270_v59 = vmul.f32 %v1269_v52, %v1267_v57  ;;  %v1276_v60 = vmul.f32 %v1275_v55, %v1273_v56  ;;  %v3938_v53 = vld [vmem:[%s6345_s1 + $0x28] sm:$0xff] }
 0x6b8   : > { %4302 = vmatmul.mubr.msk.f32.gmra.mxu1 %vm359_vm1, %v3938_v53 }
 0x6b9   : > { %v1271_v1 = vadd.f32 %v1270_v59, %v1265_v58 }
 0x6ba   : > { %v1289_v61 = vpop.permute.xlu0 %1288  ;;  %v1283_v63 = vpop.permute.xlu1 %1282 }
 0x6bb   : > { %v1277_v3 = vadd.f32 %v1276_v60, %v1271_v1  ;;  %v1286_v10 = vmul.f32 %v1285_v62, %v1283_v63  ;;  %v1292_v16 = vmul.f32 %v1291_v5, %v1289_v61 }
 0x6bd   : > { %v1281_v6 = vadd.f32 %v1280_v4, %v1277_v3 }
 0x6be   : > { %v1301_v13 = vpop.permute.xlu0 %1300  ;;  %v1295_v15 = vpop.permute.xlu1 %1294 }
 0x6bf   : > { %v1287_v17 = vadd.f32 %v1286_v10, %v1281_v6  ;;  %v1298_v9 = vmul.f32 %v1297_v14, %v1295_v15  ;;  %v1304_v23 = vmul.f32 %v1303_v18, %v1301_v13 }
 0x6c1   : > { %v1293_v19 = vadd.f32 %v1292_v16, %v1287_v17 }
 0x6c2   : > { %v1313_v20 = vpop.permute.xlu0 %1312  ;;  %v1307_v22 = vpop.permute.xlu1 %1306 }
 0x6c3   : > { %v1299_v24 = vadd.f32 %v1298_v9, %v1293_v19  ;;  %v1310_v27 = vmul.f32 %v1309_v21, %v1307_v22  ;;  %v1316_v8 = vmul.f32 %v1315_v25, %v1313_v20 }
 0x6c5   : > { %v1305_v26 = vadd.f32 %v1304_v23, %v1299_v24 }
 0x6c6   : > { %v1325_v12 = vpop.permute.xlu0 %1324  ;;  %v1319_v29 = vpop.permute.xlu1 %1318 }
 0x6c7   : > { %v1311_v30 = vadd.f32 %v1310_v27, %v1305_v26  ;;  %v1322_v33 = vmul.f32 %v1321_v28, %v1319_v29  ;;  %v1328_v36 = vmul.f32 %v1327_v31, %v1325_v12  ;;  %v1616_v29 = vld [vmem:[#allocation5 + $0xe0] sm:$0xff] }
 0x6c9   : > { %v1317_v32 = vadd.f32 %v1316_v8, %v1311_v30 }
 0x6ca   : > { %v1331_v35 = vpop.permute.xlu1 %1330  ;;  %v1337_v39 = vpop.permute.xlu0 %1336 }
 0x6cb   : > { %v1323_v37 = vadd.f32 %v1322_v33, %v1317_v32  ;;  %v1334_v41 = vmul.f32 %v1333_v34, %v1331_v35  ;;  %v1340_v44 = vmul.f32 %v1339_v38, %v1337_v39  ;;  %v1619_v32 = vld [vmem:[#allocation5 + $0xf8] sm:$0xff] }
 0x6cd   : > { %v1329_v40 = vadd.f32 %v1328_v36, %v1323_v37  ;;  %v1618_v37 = vld [vmem:[#allocation5 + $0xf0] sm:$0xff] }
 0x6ce   : > { %v1343_v43 = vpop.permute.xlu1 %1342 }
 0x6cf   : > { %v1335_v45 = vadd.f32 %v1334_v41, %v1329_v40  ;;  %v1346_v48 = vmul.f32 %v1345_v42, %v1343_v43  ;;  %v1617_v40 = vld [vmem:[#allocation5 + $0xe8] sm:$0xff]  ;;  %v1615_v43 = vld [vmem:[#allocation5 + $0xd8] sm:$0xff] }
 0x6d1   : > { %v1341_v47 = vadd.f32 %v1340_v44, %v1335_v45 }
 0x6d2   : > { %v1349_v49 = vpop.permute.xlu1 %1348 }
 0x6d3   : > { %v1347_v50 = vadd.f32 %v1346_v48, %v1341_v47  ;;  %v1352_v51 = vmul.f32 %v1351_v46, %v1349_v49  ;;  %v1614_v46 = vld [vmem:[#allocation5 + $0xd0] sm:$0xff]  ;;  %v1613_v49 = vld [vmem:[#allocation5 + $0xc8] sm:$0xff] }
 0x6d5   : > { %v1353_v52 = vadd.f32 %v1352_v51, %v1347_v50 }
 0x6d7   : > { %v1359_v54 = vpop.permute.xlu0 %1358 }
 0x6d8   : > { %v1361_v55 = vadd.f32 %v1359_v54, %v1353_v52  ;;  %v1612_v52 = vld [vmem:[#allocation5 + $0xc0] sm:$0xff] }
 0x6da   : > { %1362 = vxpose.xlu1.b32.start.end [1/1] (short) %v1361_v55, 128  ;;  %v1611_v55 = vld [vmem:[#allocation5 + $0xb8] sm:$0xff] }
 0x6db   : > { %v1111_v56 = vpop.permute.xlu0 %1110 }
 0x6dc   : > { %v1199_v57 = vadd.f32 %v5517_v7, %v1111_v56 }
 0x6de   : > { %4304 = vmatprep.subr.mxu1 %v1199_v57 }
 0x6df   : > { %4305 = vmatpush3.msra.mxu1 %v1199_v57 }
 0x6e0   : > { %4330 = vmatprep.subr.mxu1 %v5017_v0 }
 0x756   : > { %v1378_v58 = vpop.trf.xlu1 }
 0x757   : > { %4306 = vmatprep.mubr.msk.f32.mxu1 %vm359_vm1, %v1378_v58  ;;  %v1610_v58 = vld [vmem:[#allocation5 + $0xb0] sm:$0xff] }
 0x75a   : > { %v1379_v59 = vpop.trf.xlu1 }
 0x75b   : > { %4307 = vmatmul.mubr.msk.f32.vlgmr.msra.gmra.mxu1 %vm359_vm1, %v1379_v59 }
 0x75e   : > { %v1380_v11 = vpop.trf.xlu1 }
 0x75f   : > { %4309 = vmatprep.mubr.msk.f32.mxu1 %vm359_vm1, %v1380_v11 }
 0x762   : > { %v1381_v60 = vpop.trf.xlu1 }
 0x763   : > { %4310 = vmatmul.mubr.msk.f32.gmra.mxu1 %vm359_vm1, %v1381_v60  ;;  %v1609_v60 = vld [vmem:[#allocation5 + $0xa8] sm:$0xff] }
 0x766   : > { %v1382_v1 = vpop.trf.xlu1 }
 0x767   : > { %4312 = vmatprep.mubr.msk.f32.mxu1 %vm359_vm1, %v1382_v1 }
 0x76a   : > { %v1383_v7 = vpop.trf.xlu1 }
 0x76b   : > { %4313 = vmatmul.mubr.msk.f32.gmra.mxu1 %vm359_vm1, %v1383_v7 }
 0x76e   : > { %v1384_v61 = vpop.trf.xlu1 }
 0x76f   : > { %4315 = vmatprep.mubr.msk.f32.mxu1 %vm359_vm1, %v1384_v61  ;;  %v1608_v61 = vld [vmem:[#allocation5 + $0xa0] sm:$0xff] }
 0x772   : > { %v1385_v62 = vpop.trf.xlu1 }
 0x773   : > { %4316 = vmatmul.mubr.msk.f32.gmra.mxu1 %vm359_vm1, %v1385_v62 }
 0x776   : > { %v1386_v63 = vpop.trf.xlu1 }
 0x777   : > { %4318 = vmatprep.mubr.msk.f32.mxu1 %vm359_vm1, %v1386_v63 }
 0x778   : > { %v5551_v15 = vpop.f32.mrf.mxu1 }
 0x77a   : > { %v1387_v3 = vpop.trf.xlu1  ;;  %v4303_v16 = vpop.f32.mrf.mxu1 }
 0x77b   : > { %4319 = vmatmul.mubr.msk.f32.gmra.mxu1 %vm359_vm1, %v1387_v3  ;;  %v1607_v3 = vld [vmem:[#allocation5 + $0x98] sm:$0xff] }
 0x77e   : > { %v1388_v4 = vpop.trf.xlu1 }
 0x77f   : > { %4321 = vmatprep.mubr.msk.f32.mxu1 %vm359_vm1, %v1388_v4 }
 0x782   : > { %v1389_v5 = vpop.trf.xlu1 }
 0x783   : > { %4322 = vmatmul.mubr.msk.f32.gmra.mxu1 %vm359_vm1, %v1389_v5 }
 0x786   : > { %v1390_v6 = vpop.trf.xlu1 }
 0x787   : > { %4324 = vmatprep.mubr.msk.f32.mxu1 %vm359_vm1, %v1390_v6  ;;  %v1606_v6 = vld [vmem:[#allocation5 + $0x90] sm:$0xff] }
 0x78a   : > { %v1391_v10 = vpop.trf.xlu1 }
 0x78b   : > { %4325 = vmatmul.mubr.msk.f32.gmra.mxu1 %vm359_vm1, %v1391_v10 }
 0x78e   : > { %v1392_v13 = vpop.trf.xlu1 }
 0x78f   : > { %4327 = vmatprep.mubr.msk.f32.mxu1 %vm359_vm1, %v1392_v13 }
 0x792   : > { %v1393_v14 = vpop.trf.xlu1 }
 0x793   : > { %4328 = vmatmul.mubr.msk.f32.gmra.mxu1 %vm359_vm1, %v1393_v14  ;;  %v1605_v14 = vld [vmem:[#allocation5 + $0x88] sm:$0xff] }
 0x794   : > { %4362 = vmatprep.mubr.msk.f32.mxu1 %vm5018_vm0, %v5017_v0 }
 0x81b   : > { %v5553_v17 = vpop.f32.mrf.mxu1 }
 0x81c   : > { %v1588_v10 = vmul.f32 0.35355338, %v5553_v17 }
 0x81d   : > { %v5555_v18 = vpop.f32.mrf.mxu1 }
 0x81e   : > { %v5594_v16 = vadd.f32 %v1605_v14, %v1588_v10 }
 0x823   : > { %v4311_v19 = vpop.f32.mrf.mxu1 }
 0x824   : > { %v1590_v62 = vmul.f32 0.35355338, %v4311_v19  ;;  %v1587_v19 = vmul.f32 0.35355338, %v5555_v18 }
 0x825   : > { %v5557_v9 = vpop.f32.mrf.mxu1 }
 0x826   : > { %v5586_v4 = vadd.f32 %v1607_v3, %v1590_v62  ;;  %v1589_v5 = vmul.f32 0.35355338, %v5557_v9 }
 0x828   : > { %v5591_v13 = vadd.f32 %v1606_v6, %v1589_v5 }
 0x82b   : > { %v4314_v20 = vpop.f32.mrf.mxu1 }
 0x82c   : > { %v1592_v59 = vmul.f32 0.35355338, %v4314_v20  ;;  %v1604_v20 = vld [vmem:[#allocation5 + $0x80] sm:$0xff] }
 0x82d   : > { %v1528_v21 = vpop.f32.mrf.mxu1 }
 0x82e   : > { %v5580_v1 = vadd.f32 %v1609_v60, %v1592_v59  ;;  %v1591_v7 = vmul.f32 0.35355338, %v1528_v21  ;;  %v5598_v21 = vadd.f32 %v1604_v20, %v1587_v19 }
 0x830   : > { %v5583_v63 = vadd.f32 %v1608_v61, %v1591_v7 }
 0x833   : > { %v4317_v22 = vpop.f32.mrf.mxu1 }
 0x834   : > { %v1594_v53 = vmul.f32 0.35355338, %v4317_v22 }
 0x835   : > { %v1538_v23 = vpop.f32.mrf.mxu1 }
 0x836   : > { %v5574_v56 = vadd.f32 %v1611_v55, %v1594_v53  ;;  %v1593_v57 = vmul.f32 0.35355338, %v1538_v23 }
 0x838   : > { %v5577_v11 = vadd.f32 %v1610_v58, %v1593_v57 }
 0x83b   : > { %v4320_v24 = vpop.f32.mrf.mxu1 }
 0x83c   : > { %v1596_v47 = vmul.f32 0.35355338, %v4320_v24 }
 0x83d   : > { %v1548_v25 = vpop.f32.mrf.mxu1 }
 0x83e   : > { %v5568_v50 = vadd.f32 %v1613_v49, %v1596_v47  ;;  %v1595_v51 = vmul.f32 0.35355338, %v1548_v25 }
 0x840   : > { %v5571_v54 = vadd.f32 %v1612_v52, %v1595_v51 }
 0x843   : > { %v4323_v26 = vpop.f32.mrf.mxu1 }
 0x844   : > { %v1598_v41 = vmul.f32 0.35355338, %v4323_v26 }
 0x845   : > { %v1558_v27 = vpop.f32.mrf.mxu1 }
 0x846   : > { %v5562_v44 = vadd.f32 %v1615_v43, %v1598_v41  ;;  %v1597_v45 = vmul.f32 0.35355338, %v1558_v27 }
 0x848   : > { %v5565_v48 = vadd.f32 %v1614_v46, %v1597_v45 }
 0x84b   : > { %v4326_v12 = vpop.f32.mrf.mxu1 }
 0x84c   : > { %v1600_v38 = vmul.f32 0.35355338, %v4326_v12 }
 0x84d   : > { %v1568_v28 = vpop.f32.mrf.mxu1 }
 0x84e   : > { %v1599_v8 = vmul.f32 0.35355338, %v1568_v28  ;;  %v1633_v42 = vadd.f32 %v1617_v40, %v1600_v38 }
 0x850   : > { %v5559_v30 = vadd.f32 %v1616_v29, %v1599_v8 }
 0x852   : > { %1660 = vmax.xlane.f32.xlu1 %v5559_v30 }
 0x853   : > { %v4329_v31 = vpop.f32.mrf.mxu1 }
 0x854   : > { %v1602_v33 = vmul.f32 0.35355338, %v4329_v31 }
 0x855   : > { %v1578_v34 = vpop.f32.mrf.mxu1 }
 0x856   : > { %v1635_v35 = vadd.f32 %v1619_v32, %v1602_v33  ;;  %v1601_v36 = vmul.f32 0.35355338, %v1578_v34 }
 0x858   : > { %1666 = vmax.xlane.f32.xlu0 %v1635_v35  ;;  %v1634_v39 = vadd.f32 %v1618_v37, %v1601_v36 }
 0x85c   : > { %1664 = vmax.xlane.f32.xlu0 %v1634_v39 }
 0x860   : > { %1662 = vmax.xlane.f32.xlu0 %v1633_v42 }
 0x864   : > { %1658 = vmax.xlane.f32.xlu0 %v5562_v44 }
 0x868   : > { %1656 = vmax.xlane.f32.xlu0 %v5565_v48 }
 0x86c   : > { %1654 = vmax.xlane.f32.xlu0 %v5568_v50 }
 0x870   : > { %1652 = vmax.xlane.f32.xlu0 %v5571_v54 }
 0x874   : > { %1650 = vmax.xlane.f32.xlu0 %v5574_v56 }
 0x878   : > { %1648 = vmax.xlane.f32.xlu0 %v5577_v11 }
 0x87c   : > { %1646 = vmax.xlane.f32.xlu0 %v5580_v1 }
 0x880   : > { %1644 = vmax.xlane.f32.xlu0 %v5583_v63 }
 0x884   : > { %1642 = vmax.xlane.f32.xlu0 %v5586_v4 }
 0x888   : > { %1640 = vmax.xlane.f32.xlu0 %v5591_v13 }
 0x88c   : > { %1638 = vmax.xlane.f32.xlu0 %v5594_v16 }
 0x890   : > { %1636 = vmax.xlane.f32.xlu0 %v5598_v21 }
 0x8db   : > { %v1661_v25 = vpop.xlane.xlu1 %1660 }
 0x8dc   : > { %v1680_v12 = vsub.f32 %v5559_v30, %v1661_v25 }
 0x8de   : > { %v1708_v8 = vmul.f32 1.442695, %v1680_v12 }
 0x8e1   : > { %v1667_v9 = vpop.xlane.xlu0 %1666 }
 0x8e2   : > { %v1683_v22 = vsub.f32 %v1635_v35, %v1667_v9 }
 0x8e4   : > { %v1714_v23 = vmul.f32 1.442695, %v1683_v22 }
 0x8e5   : > { %v1665_v17 = vpop.xlane.xlu0 %1664 }
 0x8e6   : > { %4699 = vpow2.f32 %v1714_v23  ;;  %v1682_v24 = vsub.f32 %v1634_v39, %v1665_v17  ;;  %v3977_v17 = vld [vmem:[%s6443_s2 + $0x30] sm:$0xff] }
 0x8e8   : > { %v1712_v26 = vmul.f32 1.442695, %v1682_v24  ;;  %v3941_v24 = vld [vmem:[%s6443_s2 + $0x28] sm:$0xff] }
 0x8e9   : > { %v1663_v27 = vpop.xlane.xlu0 %1662 }
 0x8ea   : > { %4701 = vpow2.f32 %v1712_v26  ;;  %v1681_v18 = vsub.f32 %v1633_v42, %v1663_v27 }
 0x8ec   : > { %v1710_v28 = vmul.f32 1.442695, %v1681_v18 }
 0x8ed   : > { %v1659_v29 = vpop.xlane.xlu0 %1658 }
 0x8ee   : > { %4703 = vpow2.f32 %v1710_v28  ;;  %v1679_v31 = vsub.f32 %v5562_v44, %v1659_v29 }
 0x8ef   : > { %4705 = vpow2.f32 %v1708_v8 }
 0x8f0   : > { %v1706_v33 = vmul.f32 1.442695, %v1679_v31 }
 0x8f1   : > { %v1657_v32 = vpop.xlane.xlu0 %1656 }
 0x8f2   : > { %v1678_v34 = vsub.f32 %v5565_v48, %v1657_v32  ;;  %4707 = vpow2.f32 %v1706_v33 }
 0x8f3   : > { %v5604_v35 = vpop.eup %4699 }
 0x8f4   : > { %1746 = vadd.xlane.f32.xlu0 %v5604_v35  ;;  %v1704_v30 = vmul.f32 1.442695, %v1678_v34 }
 0x8f5   : > { %v1655_v36 = vpop.xlane.xlu0 %1654 }
 0x8f6   : > { %v1677_v37 = vsub.f32 %v5568_v50, %v1655_v36  ;;  %4709 = vpow2.f32 %v1704_v30 }
 0x8f7   : > { %v5608_v38 = vpop.eup %4701 }
 0x8f8   : > { %1744 = vadd.xlane.f32.xlu0 %v5608_v38  ;;  %v1702_v40 = vmul.f32 1.442695, %v1677_v37 }
 0x8f9   : > { %v1653_v39 = vpop.xlane.xlu0 %1652 }
 0x8fa   : > { %v1676_v41 = vsub.f32 %v5571_v54, %v1653_v39  ;;  %4711 = vpow2.f32 %v1702_v40 }
 0x8fb   : > { %v5612_v42 = vpop.eup %4703 }
 0x8fc   : > { %1742 = vadd.xlane.f32.xlu0 %v5612_v42  ;;  %v1700_v44 = vmul.f32 1.442695, %v1676_v41  ;;  %v5616_v46 = vpop.eup %4705 }
 0x8fd   : > { %v1651_v43 = vpop.xlane.xlu0 %1650 }
 0x8fe   : > { %v1675_v45 = vsub.f32 %v5574_v56, %v1651_v43  ;;  %4713 = vpow2.f32 %v1700_v44 }
 0x8ff   : > { %v5620_v50 = vpop.eup %4707 }
 0x900   : > { %1740 = vadd.xlane.f32.xlu0 %v5616_v46  ;;  %v1698_v48 = vmul.f32 1.442695, %v1675_v45 }
 0x901   : > { %v1649_v47 = vpop.xlane.xlu0 %1648 }
 0x902   : > { %v1674_v49 = vsub.f32 %v5577_v11, %v1649_v47  ;;  %4715 = vpow2.f32 %v1698_v48 }
 0x903   : > { %v5624_v54 = vpop.eup %4709 }
 0x904   : > { %1738 = vadd.xlane.f32.xlu0 %v5620_v50  ;;  %v1696_v52 = vmul.f32 1.442695, %v1674_v49 }
 0x905   : > { %v1647_v51 = vpop.xlane.xlu0 %1646 }
 0x906   : > { %v1673_v53 = vsub.f32 %v5580_v1, %v1647_v51  ;;  %4717 = vpow2.f32 %v1696_v52 }
 0x907   : > { %v5628_v58 = vpop.eup %4711 }
 0x908   : > { %1736 = vadd.xlane.f32.xlu0 %v5624_v54  ;;  %v1694_v56 = vmul.f32 1.442695, %v1673_v53 }
 0x909   : > { %v1645_v55 = vpop.xlane.xlu0 %1644 }
 0x90a   : > { %v1672_v57 = vsub.f32 %v5583_v63, %v1645_v55  ;;  %4719 = vpow2.f32 %v1694_v56 }
 0x90b   : > { %v5632_v7 = vpop.eup %4713 }
 0x90c   : > { %1734 = vadd.xlane.f32.xlu0 %v5628_v58  ;;  %v1692_v11 = vmul.f32 1.442695, %v1672_v57 }
 0x90d   : > { %v1643_v59 = vpop.xlane.xlu0 %1642 }
 0x90e   : > { %v1671_v60 = vsub.f32 %v5586_v4, %v1643_v59  ;;  %4721 = vpow2.f32 %v1692_v11 }
 0x90f   : > { %v5636_v3 = vpop.eup %4715 }
 0x910   : > { %1732 = vadd.xlane.f32.xlu0 %v5632_v7  ;;  %v1690_v1 = vmul.f32 1.442695, %v1671_v60 }
 0x911   : > { %v1641_v61 = vpop.xlane.xlu0 %1640 }
 0x912   : > { %v1670_v62 = vsub.f32 %v5591_v13, %v1641_v61  ;;  %4723 = vpow2.f32 %v1690_v1 }
 0x913   : > { %v5640_v4 = vpop.eup %4717 }
 0x914   : > { %v1688_v63 = vmul.f32 1.442695, %v1670_v62  ;;  %1730 = vadd.xlane.f32.xlu0 %v5636_v3 }
 0x915   : > { %v1639_v5 = vpop.xlane.xlu0 %1638 }
 0x916   : > { %4725 = vpow2.f32 %v1688_v63  ;;  %v1669_v6 = vsub.f32 %v5594_v16, %v1639_v5 }
 0x917   : > { %v5644_v13 = vpop.eup %4719 }
 0x918   : > { %v1686_v10 = vmul.f32 1.442695, %v1669_v6  ;;  %1728 = vadd.xlane.f32.xlu0 %v5640_v4 }
 0x919   : > { %v1637_v14 = vpop.xlane.xlu0 %1636 }
 0x91a   : > { %4727 = vpow2.f32 %v1686_v10  ;;  %v1668_v19 = vsub.f32 %v5598_v21, %v1637_v14  ;;  %v3962_v14 = vld [vmem:[%s6350_s6 + $0x20] sm:$0xff] }
 0x91b   : > { %v5647_v9 = vpop.eup %4721  ;;  %4367 = vmatprep.mubr.msk.f32.mxu0 %vm359_vm1, %v3962_v14 }
 0x91c   : > { %v1684_v20 = vmul.f32 1.442695, %v1668_v19  ;;  %1726 = vadd.xlane.f32.xlu0 %v5644_v13 }
 0x91e   : > { %4729 = vpow2.f32 %v1684_v20 }
 0x91f   : > { %v5650_v16 = vpop.eup %4723 }
 0x920   : > { %1724 = vadd.xlane.f32.xlu0 %v5647_v9 }
 0x923   : > { %v5652_v22 = vpop.eup %4725 }
 0x924   : > { %1722 = vadd.xlane.f32.xlu0 %v5650_v16  ;;  %1720 = vadd.xlane.f32.xlu1 %v5652_v22 }
 0x927   : > { %v5656_v23 = vpop.eup %4727 }
 0x928   : > { %1718 = vadd.xlane.f32.xlu0 %v5656_v23 }
 0x92b   : > { %v5659_v21 = vpop.eup %4729 }
 0x92c   : > { %1716 = vadd.xlane.f32.xlu1 %v5659_v21 }
 0x93d   : > { %2061 = vperm.xlu1 %4634, %v3977_v17   ;;  %v1091_v17 = vld [vmem:[%s6350_s6 + $0x10] sm:$0xff] }
 0x93e   : > { %1115 = vperm.xlu0 %4633, %v3941_v24  }
 0x97d   : > { %v1747_v25 = vpop.xlane.xlu0 %1746 }
 0x97e   : > { %4731 = vrcp.f32 %v1747_v25  ;;  %v1092_v25 = vld [vmem:[%s6350_s6 + $0x18] sm:$0xff] }
 0x981   : > { %v1745_v26 = vpop.xlane.xlu0 %1744 }
 0x982   : > { %4733 = vrcp.f32 %v1745_v26  ;;  %v3974_v26 = vld [vmem:[%s6345_s1 + $0x30] sm:$0xff] }
 0x985   : > { %v1743_v27 = vpop.xlane.xlu0 %1742 }
 0x986   : > { %4735 = vrcp.f32 %v1743_v27  ;;  %v3975_v27 = vld [vmem:[%s6345_s1 + $0x38] sm:$0xff] }
 0x989   : > { %v1741_v12 = vpop.xlane.xlu0 %1740 }
 0x98a   : > { %4737 = vrcp.f32 %v1741_v12 }
 0x98b   : > { %v4732_v18 = vpop.eup %4731 }
 0x98c   : > { %v1779_v28 = vmul.f32 %v4732_v18, %v5604_v35 }
 0x98d   : > { %v1739_v29 = vpop.xlane.xlu0 %1738 }
 0x98e   : > { %4739 = vrcp.f32 %v1739_v29  ;;  %4331 = vmatpush3.xpose.msra.mxu1 %v1779_v28 }
 0x98f   : > { %v4734_v8 = vpop.eup %4733  ;;  %4332 = vmatprep.subr.mxu1 %v5017_v0 }
 0x990   : > { %v1778_v31 = vmul.f32 %v4734_v8, %v5608_v38 }
 0x991   : > { %v1737_v32 = vpop.xlane.xlu0 %1736 }
 0x992   : > { %4741 = vrcp.f32 %v1737_v32  ;;  %4333 = vmatpush3.xpose.msra.mxu1 %v1778_v31 }
 0x993   : > { %v4736_v33 = vpop.eup %4735  ;;  %4334 = vmatprep.subr.mxu1 %v5017_v0 }
 0x994   : > { %v1777_v34 = vmul.f32 %v4736_v33, %v5612_v42 }
 0x995   : > { %v1735_v36 = vpop.xlane.xlu0 %1734 }
 0x996   : > { %4743 = vrcp.f32 %v1735_v36  ;;  %4335 = vmatpush3.xpose.msra.mxu1 %v1777_v34 }
 0x997   : > { %v4738_v35 = vpop.eup %4737  ;;  %4336 = vmatprep.subr.mxu1 %v5017_v0 }
 0x998   : > { %v1776_v30 = vmul.f32 %v4738_v35, %v5616_v46 }
 0x999   : > { %v1733_v37 = vpop.xlane.xlu0 %1732 }
 0x99a   : > { %4745 = vrcp.f32 %v1733_v37  ;;  %4337 = vmatpush3.xpose.msra.mxu1 %v1776_v30 }
 0x99b   : > { %v4740_v38 = vpop.eup %4739  ;;  %4338 = vmatprep.subr.mxu1 %v5017_v0 }
 0x99c   : > { %v1775_v39 = vmul.f32 %v4740_v38, %v5620_v50 }
 0x99d   : > { %v1731_v40 = vpop.xlane.xlu0 %1730 }
 0x99e   : > { %4747 = vrcp.f32 %v1731_v40  ;;  %4339 = vmatpush3.xpose.msra.mxu1 %v1775_v39 }
 0x99f   : > { %v4742_v41 = vpop.eup %4741  ;;  %4340 = vmatprep.subr.mxu1 %v5017_v0 }
 0x9a0   : > { %v1774_v42 = vmul.f32 %v4742_v41, %v5624_v54  ;;  %v3983_v41 = vld [vmem:[%s6348_s4 + $0x10] sm:$0xff] }
 0x9a1   : > { %v1729_v43 = vpop.xlane.xlu0 %1728 }
 0x9a2   : > { %4749 = vrcp.f32 %v1729_v43  ;;  %4341 = vmatpush3.xpose.msra.mxu1 %v1774_v42  ;;  %v3978_v43 = vld [vmem:[%s6443_s2 + $0x38] sm:$0xff] }
 0x9a3   : > { %v4744_v44 = vpop.eup %4743  ;;  %4342 = vmatprep.subr.mxu1 %v5017_v0 }
 0x9a4   : > { %v1773_v45 = vmul.f32 %v4744_v44, %v5628_v58 }
 0x9a5   : > { %v1727_v46 = vpop.xlane.xlu0 %1726 }
 0x9a6   : > { %4751 = vrcp.f32 %v1727_v46  ;;  %4343 = vmatpush3.xpose.msra.mxu1 %v1773_v45  ;;  %v2171_v45 = vld [vmem:[#allocation2 + $0x198] sm:$0xff]  ;;  %v2166_v46 = vld [vmem:[#allocation2 + $0x190] sm:$0xff] }
 0x9a7   : > { %v4746_v47 = vpop.eup %4745  ;;  %4344 = vmatprep.subr.mxu1 %v5017_v0 }
 0x9a8   : > { %v1772_v48 = vmul.f32 %v4746_v47, %v5632_v7 }
 0x9a9   : > { %v1725_v49 = vpop.xlane.xlu0 %1724 }
 0x9aa   : > { %4753 = vrcp.f32 %v1725_v49  ;;  %4345 = vmatpush3.xpose.msra.mxu1 %v1772_v48 }
 0x9ab   : > { %v4748_v50 = vpop.eup %4747  ;;  %4346 = vmatprep.subr.mxu1 %v5017_v0 }
 0x9ac   : > { %v1771_v51 = vmul.f32 %v4748_v50, %v5636_v3 }
 0x9ad   : > { %v1723_v52 = vpop.xlane.xlu0 %1722  ;;  %v1721_v53 = vpop.xlane.xlu1 %1720 }
 0x9ae   : > { %4347 = vmatpush3.xpose.msra.mxu1 %v1771_v51  ;;  %4755 = vrcp.f32 %v1723_v52  ;;  %v2177_v51 = vld [vmem:[#allocation2 + $0x1a0] sm:$0xff]  ;;  %v2183_v52 = vld [vmem:[#allocation2 + $0x1a8] sm:$0xff] }
 0x9af   : > { %v4750_v54 = vpop.eup %4749  ;;  %4348 = vmatprep.subr.mxu1 %v5017_v0  ;;  %4757 = vrcp.f32 %v1721_v53 }
 0x9b0   : > { %v1770_v55 = vmul.f32 %v4750_v54, %v5640_v4 }
 0x9b1   : > { %v1719_v56 = vpop.xlane.xlu0 %1718 }
 0x9b2   : > { %4349 = vmatpush3.xpose.msra.mxu1 %v1770_v55  ;;  %4759 = vrcp.f32 %v1719_v56 }
 0x9b3   : > { %v4752_v57 = vpop.eup %4751  ;;  %4350 = vmatprep.subr.mxu1 %v5017_v0 }
 0x9b4   : > { %v1769_v58 = vmul.f32 %v4752_v57, %v5644_v13  ;;  %v2189_v57 = vld [vmem:[#allocation2 + $0x1b0] sm:$0xff] }
 0x9b5   : > { %v1717_v59 = vpop.xlane.xlu1 %1716 }
 0x9b6   : > { %4351 = vmatpush3.xpose.msra.mxu1 %v1769_v58  ;;  %4761 = vrcp.f32 %v1717_v59 }
 0x9b7   : > { %v4754_v11 = vpop.eup %4753  ;;  %4352 = vmatprep.subr.mxu1 %v5017_v0 }
 0x9b8   : > { %v1768_v60 = vmul.f32 %v4754_v11, %v5647_v9  ;;  %v3963_v9 = vld [vmem:[%s6350_s6 + $0x28] sm:$0xff]  ;;  %v2195_v11 = vld [vmem:[#allocation2 + $0x1b8] sm:$0xff] }
 0x9b9   : > { %v1116_v6 = vpop.permute.xlu0 %1115  ;;  %v2062_v37 = vpop.permute.xlu1 %2061 }
 0x9ba   : > { %4353 = vmatpush3.xpose.msra.mxu1 %v1768_v60  ;;  %v1204_v10 = vadd.f32 %v5551_v15, %v1116_v6  ;;  %v3964_v15 = vld [vmem:[%s6350_s6 + $0x30] sm:$0xff] }
 0x9bb   : > { %4354 = vmatprep.subr.mxu1 %v5017_v0  ;;  %v4756_v7 = vpop.eup %4755 }
 0x9bc   : > { %v1767_v1 = vmul.f32 %v4756_v7, %v5650_v16  ;;  %v4758_v61 = vpop.eup %4757  ;;  %v1093_v16 = vmax.f32 %v5453_v2, 0.0  ;;  %v1089_v2 = vld [vmem:[%s6350_s6] sm:$0xff] }
 0x9bd   : > { %v1766_v62 = vmul.f32 %v4758_v61, %v5652_v22  ;;  %v3965_v22 = vld [vmem:[%s6350_s6 + $0x38] sm:$0xff] }
 0x9be   : > { %4355 = vmatpush3.xpose.msra.mxu1 %v1767_v1 }
 0x9bf   : > { %4356 = vmatprep.subr.mxu1 %v5017_v0  ;;  %v4760_v3 = vpop.eup %4759 }
 0x9c0   : > { %v1765_v63 = vmul.f32 %v4760_v3, %v5656_v23  ;;  %v336_v23 = vld [vmem:[%s5192_s22 + $0x10] sm:$0xff] }
 0x9c2   : > { %4357 = vmatpush3.xpose.msra.mxu1 %v1766_v62  ;;  %v2201_v62 = vld [vmem:[#allocation2 + $0x1c0] sm:$0xff] }
 0x9c3   : > { %4358 = vmatprep.subr.mxu1 %v5017_v0  ;;  %v4762_v5 = vpop.eup %4761 }
 0x9c4   : > { %v1764_v4 = vmul.f32 %v4762_v5, %v5659_v21  ;;  %v1090_v21 = vld [vmem:[%s6350_s6 + $0x8] sm:$0xff] }
 0x9c5   : > { %v2207_v5 = vld [vmem:[#allocation2 + $0x1c8] sm:$0xff] }
 0x9c6   : > { %4359 = vmatpush3.xpose.msra.mxu1 %v1765_v63 }
 0x9c7   : > { %4360 = vmatprep.subr.mxu1 %v5017_v0 }
 0x9ca   : > { %4361 = vmatpush3.xpose.msra.mxu1 %v1764_v4 }
 0x9cd   : > { %4363 = vmatmul.mubr.f32.vlgmr.msra.gmra.mxu1 %v1204_v10 }
 0xa8d   : > { %v1846_v19 = vpop.f32.mrf.mxu1 }
 0xa8e   : > { %v1855_v13 = vmax.f32 %v1846_v19, 0.0  ;;  %v2050_v24 = vadd.f32 %v1846_v19, %v336_v23  ;;  %v2213_v19 = vld [vmem:[#allocation2 + $0x1d0] sm:$0xff]  ;;  %v2225_v23 = vld [vmem:[#allocation2 + $0x1e0] sm:$0xff] }
 0xa8f   : > { %v4364_v20 = vpop.f32.mrf.mxu1 }
 0xa90   : > { %4365 = vmatprep.subr.mxu0 %v1855_v13 }
 0xa91   : > { %4366 = vmatpush3.msra.mxu0 %v1855_v13 }
 0xa92   : > { %4368 = vmatmul.mubr.msk.f32.vlgmr.msra.gmra.mxu0 %vm359_vm1, %v3963_v9  ;;  %4373 = vmatprep.subr.mxu0 %v1093_v16  ;;  %v2219_v9 = vld [vmem:[#allocation2 + $0x1d8] sm:$0xff] }
 0xa93   : > { %4374 = vmatpush3.msra.mxu0 %v1093_v16  ;;  %4370 = vmatprep.mubr.msk.f32.mxu0 %vm359_vm1, %v3964_v15 }
 0xa94   : > { %4381 = vmatprep.subr.mxu0 %v5017_v0 }
 0xa96   : > { %4371 = vmatmul.mubr.msk.f32.gmra.mxu0 %vm359_vm1, %v3965_v22 }
 0xa97   : > { %4375 = vmatprep.mubr.msk.f32.mxu0 %vm359_vm1, %v1089_v2 }
 0xa9a   : > { %4376 = vmatmul.mubr.msk.f32.vlgmr.msra.gmra.mxu0 %vm359_vm1, %v1090_v21 }
 0xa9b   : > { %4382 = vmatpush3.msra.mxu0 %v2050_v24  ;;  %4378 = vmatprep.mubr.msk.f32.mxu0 %vm359_vm1, %v1091_v17  ;;  %v2231_v24 = vld [vmem:[#allocation2 + $0x1e8] sm:$0xff] }
 0xa9e   : > { %4379 = vmatmul.mubr.msk.f32.gmra.mxu0 %vm359_vm1, %v1092_v25 }
 0xa9f   : > { %4383 = vmatprep.mubr.msk.f32.mxu0 %vm5018_vm0, %v5017_v0 }
 0xaa2   : > { %4384 = vmatmul.mubr.msk.f32.vlgmr.msra.gmra.mxu0 %vm359_vm1, %v3974_v26 }
 0xaa3   : > { %4386 = vmatprep.mubr.msk.f32.mxu0 %vm5018_vm0, %v5017_v0 }
 0xaa6   : > { %4387 = vmatmul.mubr.msk.f32.gmra.mxu0 %vm359_vm1, %v3975_v27 }
 0xaa7   : > { %4389 = vmatprep.mubr.msk.f32.mxu0 %vm5018_vm0, %v5017_v0 }
 0xb52   : > { %v4369_v12 = vpop.f32.mrf.mxu0 }
 0xb54   : > { %v1934_v18 = vpop.f32.mrf.mxu0 }
 0xb56   : > { %v4372_v28 = vpop.f32.mrf.mxu0 }
 0xb58   : > { %v1944_v29 = vpop.f32.mrf.mxu0 }
 0xb5a   : > { %v4377_v8 = vpop.f32.mrf.mxu0 }
 0xb5b   : > { %v5749_v31 = vadd.f32 %v4377_v8, %v4369_v12 }
 0xb5c   : > { %v2031_v32 = vpop.f32.mrf.mxu0 }
 0xb5d   : > { %v5751_v33 = vadd.f32 %v2031_v32, %v1934_v18  ;;  %v2235_v18 = vld [vmem:[#allocation2 + $0x1f0] sm:$0xff]  ;;  %v2241_v32 = vld [vmem:[#allocation2 + $0x1f8] sm:$0xff] }
 0xb5e   : > { %v4380_v34 = vpop.f32.mrf.mxu0 }
 0xb5f   : > { %v5753_v36 = vadd.f32 %v4380_v34, %v4372_v28 }
 0xb60   : > { %v2041_v35 = vpop.f32.mrf.mxu0 }
 0xb61   : > { %v5755_v30 = vadd.f32 %v2041_v35, %v1944_v29 }
 0xb62   : > { %v2149_v38 = vpop.f32.mrf.mxu0 }
 0xb63   : > { %v5757_v39 = vadd.f32 %v2149_v38, %v2062_v37  ;;  %v2247_v38 = vld [vmem:[#allocation2 + $0x200] sm:$0xff] }
 0xb64   : > { %v4385_v40 = vpop.f32.mrf.mxu0 }
 0xb65   : > { %2168 = vrot.lane.b32.xlu0 %v5757_v39, %s6463_s28  ;;  %2163 = vrot.lane.b32.xlu1 %v5757_v39, %s6464_s9  ;;  %v2236_v37 = vmul.f32 %v2235_v18, %v5757_v39 }
 0xb66   : > { %v5806_v42 = vpop.f32.mrf.mxu0 }
 0xb68   : > { %v4388_v44 = vpop.f32.mrf.mxu0 }
 0xb69   : > { %2180 = vrot.lane.b32.xlu0 %v5757_v39, %s6465_s11  ;;  %2174 = vrot.lane.b32.xlu1 %v5757_v39, %s6466_s16  ;;  %v2253_v44 = vld [vmem:[#allocation2 + $0x208] sm:$0xff] }
 0xb6d   : > { %2192 = vrot.lane.b32.xlu0 %v5757_v39, %s6467_s8  ;;  %2186 = vrot.lane.b32.xlu1 %v5757_v39, %s6444_s25 }
 0xb71   : > { %2204 = vrot.lane.b32.xlu0 %v5757_v39, %s6445_s23  ;;  %2198 = vrot.lane.b32.xlu1 %v5757_v39, %s6446_s24 }
 0xb75   : > { %2216 = vrot.lane.b32.xlu0 %v5757_v39, %s6447_s10  ;;  %2210 = vrot.lane.b32.xlu1 %v5757_v39, %s6448_s20 }
 0xb79   : > { %2228 = vrot.lane.b32.xlu0 %v5757_v39, %s6449_s19  ;;  %2222 = vrot.lane.b32.xlu1 %v5757_v39, %s6450_s17 }
 0xb7d   : > { %2244 = vrot.lane.b32.xlu0 %v5757_v39, %s6451_s21  ;;  %2238 = vrot.lane.b32.xlu1 %v5757_v39, %s6452_s18 }
 0xb81   : > { %2256 = vrot.lane.b32.xlu0 %v5757_v39, %s6453_s13  ;;  %2250 = vrot.lane.b32.xlu1 %v5757_v39, %s6454_s12 }
 0xb85   : > { %2268 = vrot.lane.b32.xlu0 %v5757_v39, %s6455_s26  ;;  %2262 = vrot.lane.b32.xlu1 %v5757_v39, %s6456_s0 }
 0xb89   : > { %2280 = vrot.lane.b32.xlu0 %v5757_v39, %s6457_s3  ;;  %2274 = vrot.lane.b32.xlu1 %v5757_v39, %s6458_s5 }
 0xb8d   : > { %2292 = vrot.lane.b32.xlu0 %v5757_v39, %s6459_s14  ;;  %2286 = vrot.lane.b32.xlu1 %v5757_v39, %s6460_s29  ;;  %s6468_s14 = smov 110  }
 0xb91   : > { %2314 = vperm.xlu0 %4633, %v3983_v41   ;;  %2298 = vrot.lane.b32.xlu1 %v5757_v39, %s6461_s27 }
 0xb95   : > { %2066 = vperm.xlu0 %4633, %v3978_v43   ;;  %2304 = vrot.lane.b32.xlu1 %v5757_v39, %s6468_s14 }
 0xbd7   : > { %v2169_v47 = vpop.permute.xlu0 %2168  ;;  %v2164_v48 = vpop.permute.xlu1 %2163 }
 0xbd8   : > { %v2172_v49 = vmul.f32 %v2171_v45, %v2169_v47  ;;  %v2167_v50 = vmul.f32 %v2166_v46, %v2164_v48  ;;  %v2259_v48 = vld [vmem:[#allocation2 + $0x210] sm:$0xff] }
 0xbda   : > { %v2173_v55 = vadd.f32 %v2172_v49, %v2167_v50 }
 0xbdb   : > { %v2181_v53 = vpop.permute.xlu0 %2180  ;;  %v2175_v54 = vpop.permute.xlu1 %2174 }
 0xbdc   : > { %v2178_v56 = vmul.f32 %v2177_v51, %v2175_v54  ;;  %v2184_v58 = vmul.f32 %v2183_v52, %v2181_v53  ;;  %v2265_v52 = vld [vmem:[#allocation2 + $0x218] sm:$0xff] }
 0xbde   : > { %v2179_v59 = vadd.f32 %v2178_v56, %v2173_v55  ;;  %v2271_v56 = vld [vmem:[#allocation2 + $0x220] sm:$0xff] }
 0xbdf   : > { %v2193_v60 = vpop.permute.xlu0 %2192  ;;  %v2187_v7 = vpop.permute.xlu1 %2186 }
 0xbe0   : > { %v2185_v1 = vadd.f32 %v2184_v58, %v2179_v59  ;;  %v2190_v61 = vmul.f32 %v2189_v57, %v2187_v7  ;;  %v2196_v3 = vmul.f32 %v2195_v11, %v2193_v60  ;;  %v2277_v59 = vld [vmem:[#allocation2 + $0x228] sm:$0xff] }
 0xbe2   : > { %v2191_v63 = vadd.f32 %v2190_v61, %v2185_v1  ;;  %v2283_v1 = vld [vmem:[#allocation2 + $0x230] sm:$0xff] }
 0xbe3   : > { %v2205_v6 = vpop.permute.xlu0 %2204  ;;  %v2199_v4 = vpop.permute.xlu1 %2198 }
 0xbe4   : > { %v2197_v10 = vadd.f32 %v2196_v3, %v2191_v63  ;;  %v2202_v14 = vmul.f32 %v2201_v62, %v2199_v4  ;;  %v2208_v13 = vmul.f32 %v2207_v5, %v2205_v6  ;;  %v2289_v3 = vld [vmem:[#allocation2 + $0x238] sm:$0xff]  ;;  %v2295_v4 = vld [vmem:[#allocation2 + $0x240] sm:$0xff] }
 0xbe6   : > { %v2203_v20 = vadd.f32 %v2202_v14, %v2197_v10 }
 0xbe7   : > { %v2217_v16 = vpop.permute.xlu0 %2216  ;;  %v2211_v15 = vpop.permute.xlu1 %2210 }
 0xbe8   : > { %v2209_v22 = vadd.f32 %v2208_v13, %v2203_v20  ;;  %v2214_v2 = vmul.f32 %v2213_v19, %v2211_v15  ;;  %v2220_v21 = vmul.f32 %v2219_v9, %v2217_v16  ;;  %v2301_v13 = vld [vmem:[#allocation2 + $0x248] sm:$0xff]  ;;  %v2307_v15 = vld [vmem:[#allocation2 + $0x250] sm:$0xff] }
 0xbea   : > { %v2215_v17 = vadd.f32 %v2214_v2, %v2209_v22 }
 0xbeb   : > { %v2229_v25 = vpop.permute.xlu0 %2228  ;;  %v2223_v26 = vpop.permute.xlu1 %2222 }
 0xbec   : > { %v2221_v27 = vadd.f32 %v2220_v21, %v2215_v17  ;;  %v2226_v12 = vmul.f32 %v2225_v23, %v2223_v26  ;;  %v2232_v28 = vmul.f32 %v2231_v24, %v2229_v25  ;;  %v3976_v25 = vld [vmem:[%s6345_s1 + $0x40] sm:$0xff] }
 0xbed   : > { %4390 = vmatmul.mubr.msk.f32.gmra.mxu0 %vm359_vm1, %v3976_v25 }
 0xbee   : > { %v2227_v29 = vadd.f32 %v2226_v12, %v2221_v27 }
 0xbef   : > { %v2245_v8 = vpop.permute.xlu0 %2244  ;;  %v2239_v34 = vpop.permute.xlu1 %2238 }
 0xbf0   : > { %v2233_v35 = vadd.f32 %v2232_v28, %v2227_v29  ;;  %v2242_v41 = vmul.f32 %v2241_v32, %v2239_v34  ;;  %v2248_v46 = vmul.f32 %v2247_v38, %v2245_v8 }
 0xbf2   : > { %v2237_v40 = vadd.f32 %v2236_v37, %v2233_v35 }
 0xbf3   : > { %v2257_v43 = vpop.permute.xlu0 %2256  ;;  %v2251_v45 = vpop.permute.xlu1 %2250 }
 0xbf4   : > { %v2243_v47 = vadd.f32 %v2242_v41, %v2237_v40  ;;  %v2254_v50 = vmul.f32 %v2253_v44, %v2251_v45  ;;  %v2260_v54 = vmul.f32 %v2259_v48, %v2257_v43 }
 0xbf6   : > { %v2249_v49 = vadd.f32 %v2248_v46, %v2243_v47 }
 0xbf7   : > { %v2269_v51 = vpop.permute.xlu0 %2268  ;;  %v2263_v53 = vpop.permute.xlu1 %2262 }
 0xbf8   : > { %v2255_v55 = vadd.f32 %v2254_v50, %v2249_v49  ;;  %v2266_v58 = vmul.f32 %v2265_v52, %v2263_v53  ;;  %v2272_v60 = vmul.f32 %v2271_v56, %v2269_v51 }
 0xbfa   : > { %v2261_v57 = vadd.f32 %v2260_v54, %v2255_v55 }
 0xbfb   : > { %v2281_v39 = vpop.permute.xlu0 %2280  ;;  %v2275_v11 = vpop.permute.xlu1 %2274 }
 0xbfc   : > { %v2267_v7 = vadd.f32 %v2266_v58, %v2261_v57  ;;  %v2278_v62 = vmul.f32 %v2277_v59, %v2275_v11  ;;  %v2284_v5 = vmul.f32 %v2283_v1, %v2281_v39  ;;  %v2572_v1 = vld [vmem:[#allocation5 + $0x160] sm:$0xff] }
 0xbfe   : > { %v2273_v61 = vadd.f32 %v2272_v60, %v2267_v7 }
 0xbff   : > { %v2287_v63 = vpop.permute.xlu1 %2286  ;;  %v2293_v10 = vpop.permute.xlu0 %2292 }
 0xc00   : > { %v2279_v6 = vadd.f32 %v2278_v62, %v2273_v61  ;;  %v2290_v19 = vmul.f32 %v2289_v3, %v2287_v63  ;;  %v2296_v9 = vmul.f32 %v2295_v4, %v2293_v10  ;;  %v2575_v63 = vld [vmem:[#allocation5 + $0x178] sm:$0xff] }
 0xc02   : > { %v2285_v14 = vadd.f32 %v2284_v5, %v2279_v6 }
 0xc03   : > { %v2299_v20 = vpop.permute.xlu1 %2298 }
 0xc04   : > { %v2291_v16 = vadd.f32 %v2290_v19, %v2285_v14  ;;  %v2302_v2 = vmul.f32 %v2301_v13, %v2299_v20  ;;  %v2574_v14 = vld [vmem:[#allocation5 + $0x170] sm:$0xff]  ;;  %v2573_v20 = vld [vmem:[#allocation5 + $0x168] sm:$0xff] }
 0xc06   : > { %v2297_v22 = vadd.f32 %v2296_v9, %v2291_v16 }
 0xc07   : > { %v2305_v23 = vpop.permute.xlu1 %2304 }
 0xc08   : > { %v2303_v21 = vadd.f32 %v2302_v2, %v2297_v22  ;;  %v2308_v17 = vmul.f32 %v2307_v15, %v2305_v23  ;;  %v2571_v15 = vld [vmem:[#allocation5 + $0x158] sm:$0xff]  ;;  %v2570_v23 = vld [vmem:[#allocation5 + $0x150] sm:$0xff] }
 0xc0a   : > { %v2309_v24 = vadd.f32 %v2308_v17, %v2303_v21 }
 0xc0c   : > { %v2315_v26 = vpop.permute.xlu0 %2314 }
 0xc0d   : > { %v2317_v27 = vadd.f32 %v2315_v26, %v2309_v24  ;;  %v2569_v24 = vld [vmem:[#allocation5 + $0x148] sm:$0xff] }
 0xc0f   : > { %2318 = vxpose.xlu1.b32.start.end [1/1] (short) %v2317_v27, 128  ;;  %v2568_v27 = vld [vmem:[#allocation5 + $0x140] sm:$0xff] }
 0xc10   : > { %v2067_v12 = vpop.permute.xlu0 %2066 }
 0xc11   : > { %v2155_v18 = vadd.f32 %v5806_v42, %v2067_v12 }
 0xc13   : > { %4392 = vmatprep.subr.mxu0 %v2155_v18 }
 0xc14   : > { %4393 = vmatpush3.msra.mxu0 %v2155_v18 }
 0xc15   : > { %4418 = vmatprep.subr.mxu0 %v5017_v0 }
 0xc8b   : > { %v2334_v28 = vpop.trf.xlu1 }
 0xc8c   : > { %4394 = vmatprep.mubr.msk.f32.mxu0 %vm359_vm1, %v2334_v28  ;;  %v2567_v28 = vld [vmem:[#allocation5 + $0x138] sm:$0xff] }
 0xc8f   : > { %v2335_v29 = vpop.trf.xlu1 }
 0xc90   : > { %4395 = vmatmul.mubr.msk.f32.vlgmr.msra.gmra.mxu0 %vm359_vm1, %v2335_v29 }
 0xc93   : > { %v2336_v8 = vpop.trf.xlu1 }
 0xc94   : > { %4397 = vmatprep.mubr.msk.f32.mxu0 %vm359_vm1, %v2336_v8 }
 0xc97   : > { %v2337_v32 = vpop.trf.xlu1 }
 0xc98   : > { %4398 = vmatmul.mubr.msk.f32.gmra.mxu0 %vm359_vm1, %v2337_v32  ;;  %v2566_v32 = vld [vmem:[#allocation5 + $0x130] sm:$0xff] }
 0xc9b   : > { %v2338_v34 = vpop.trf.xlu1 }
 0xc9c   : > { %4400 = vmatprep.mubr.msk.f32.mxu0 %vm359_vm1, %v2338_v34 }
 0xc9f   : > { %v2339_v42 = vpop.trf.xlu1 }
 0xca0   : > { %4401 = vmatmul.mubr.msk.f32.gmra.mxu0 %vm359_vm1, %v2339_v42 }
 0xca3   : > { %v2340_v35 = vpop.trf.xlu1 }
 0xca4   : > { %4403 = vmatprep.mubr.msk.f32.mxu0 %vm359_vm1, %v2340_v35  ;;  %v2565_v35 = vld [vmem:[#allocation5 + $0x128] sm:$0xff] }
 0xca7   : > { %v2341_v37 = vpop.trf.xlu1 }
 0xca8   : > { %4404 = vmatmul.mubr.msk.f32.gmra.mxu0 %vm359_vm1, %v2341_v37 }
 0xcab   : > { %v2342_v38 = vpop.trf.xlu1 }
 0xcac   : > { %4406 = vmatprep.mubr.msk.f32.mxu0 %vm359_vm1, %v2342_v38 }
 0xcad   : > { %v5840_v48 = vpop.f32.mrf.mxu0 }
 0xcaf   : > { %v2343_v40 = vpop.trf.xlu1  ;;  %v4391_v49 = vpop.f32.mrf.mxu0 }
 0xcb0   : > { %4407 = vmatmul.mubr.msk.f32.gmra.mxu0 %vm359_vm1, %v2343_v40  ;;  %v2564_v40 = vld [vmem:[#allocation5 + $0x120] sm:$0xff] }
 0xcb3   : > { %v2344_v41 = vpop.trf.xlu1 }
 0xcb4   : > { %4409 = vmatprep.mubr.msk.f32.mxu0 %vm359_vm1, %v2344_v41 }
 0xcb7   : > { %v2345_v43 = vpop.trf.xlu1 }
 0xcb8   : > { %4410 = vmatmul.mubr.msk.f32.gmra.mxu0 %vm359_vm1, %v2345_v43 }
 0xcbb   : > { %v2346_v44 = vpop.trf.xlu1 }
 0xcbc   : > { %4412 = vmatprep.mubr.msk.f32.mxu0 %vm359_vm1, %v2346_v44  ;;  %v2563_v44 = vld [vmem:[#allocation5 + $0x118] sm:$0xff] }
 0xcbf   : > { %v2347_v45 = vpop.trf.xlu1 }
 0xcc0   : > { %4413 = vmatmul.mubr.msk.f32.gmra.mxu0 %vm359_vm1, %v2347_v45 }
 0xcc3   : > { %v2348_v46 = vpop.trf.xlu1 }
 0xcc4   : > { %4415 = vmatprep.mubr.msk.f32.mxu0 %vm359_vm1, %v2348_v46 }
 0xcc7   : > { %v2349_v47 = vpop.trf.xlu1 }
 0xcc8   : > { %4416 = vmatmul.mubr.msk.f32.gmra.mxu0 %vm359_vm1, %v2349_v47  ;;  %v2562_v47 = vld [vmem:[#allocation5 + $0x110] sm:$0xff] }
 0xcc9   : > { %4450 = vmatprep.mubr.msk.f32.mxu0 %vm5018_vm0, %v5017_v0 }
 0xd50   : > { %v5842_v50 = vpop.f32.mrf.mxu0 }
 0xd51   : > { %v2544_v49 = vmul.f32 0.35355338, %v5842_v50 }
 0xd52   : > { %v5844_v51 = vpop.f32.mrf.mxu0 }
 0xd58   : > { %v4399_v52 = vpop.f32.mrf.mxu0 }
 0xd59   : > { %v2546_v41 = vmul.f32 0.35355338, %v4399_v52 }
 0xd5a   : > { %v5846_v53 = vpop.f32.mrf.mxu0 }
 0xd5b   : > { %v5875_v45 = vadd.f32 %v2563_v44, %v2546_v41  ;;  %v2545_v46 = vmul.f32 0.35355338, %v5846_v53 }
 0xd60   : > { %v4402_v54 = vpop.f32.mrf.mxu0 }
 0xd61   : > { %v2548_v34 = vmul.f32 0.35355338, %v4402_v54  ;;  %v5880_v54 = vadd.f32 %v2562_v47, %v2545_v46 }
 0xd62   : > { %v2484_v55 = vpop.f32.mrf.mxu0 }
 0xd63   : > { %v5869_v37 = vadd.f32 %v2565_v35, %v2548_v34  ;;  %v2547_v38 = vmul.f32 0.35355338, %v2484_v55  ;;  %v2561_v55 = vld [vmem:[#allocation5 + $0x108] sm:$0xff] }
 0xd64   : > { %v5883_v52 = vadd.f32 %v2561_v55, %v2544_v49 }
 0xd65   : > { %v5872_v43 = vadd.f32 %v2564_v40, %v2547_v38 }
 0xd68   : > { %v4405_v56 = vpop.f32.mrf.mxu0 }
 0xd69   : > { %v2550_v12 = vmul.f32 0.35355338, %v4405_v56  ;;  %v2543_v56 = vmul.f32 0.35355338, %v5844_v51 }
 0xd6a   : > { %v2494_v57 = vpop.f32.mrf.mxu0 }
 0xd6b   : > { %v5863_v29 = vadd.f32 %v2567_v28, %v2550_v12  ;;  %v2549_v8 = vmul.f32 0.35355338, %v2494_v57  ;;  %v2560_v57 = vld [vmem:[#allocation5 + $0x100] sm:$0xff] }
 0xd6d   : > { %v5866_v42 = vadd.f32 %v2566_v32, %v2549_v8 }
 0xd70   : > { %v4408_v58 = vpop.f32.mrf.mxu0 }
 0xd71   : > { %v2552_v21 = vmul.f32 0.35355338, %v4408_v58  ;;  %v5887_v58 = vadd.f32 %v2560_v57, %v2543_v56 }
 0xd72   : > { %v2504_v39 = vpop.f32.mrf.mxu0 }
 0xd73   : > { %v5857_v25 = vadd.f32 %v2569_v24, %v2552_v21  ;;  %v2551_v26 = vmul.f32 0.35355338, %v2504_v39 }
 0xd75   : > { %v5860_v18 = vadd.f32 %v2568_v27, %v2551_v26 }
 0xd78   : > { %v4411_v59 = vpop.f32.mrf.mxu0 }
 0xd79   : > { %v2554_v9 = vmul.f32 0.35355338, %v4411_v59 }
 0xd7a   : > { %v2514_v11 = vpop.f32.mrf.mxu0 }
 0xd7b   : > { %v5851_v22 = vadd.f32 %v2571_v15, %v2554_v9  ;;  %v2553_v2 = vmul.f32 0.35355338, %v2514_v11 }
 0xd7d   : > { %v5854_v17 = vadd.f32 %v2570_v23, %v2553_v2 }
 0xd80   : > { %v4414_v60 = vpop.f32.mrf.mxu0 }
 0xd81   : > { %v2556_v19 = vmul.f32 0.35355338, %v4414_v60 }
 0xd82   : > { %v2524_v7 = vpop.f32.mrf.mxu0 }
 0xd83   : > { %v2555_v61 = vmul.f32 0.35355338, %v2524_v7  ;;  %v2589_v16 = vadd.f32 %v2573_v20, %v2556_v19 }
 0xd85   : > { %v5848_v62 = vadd.f32 %v2572_v1, %v2555_v61 }
 0xd87   : > { %2616 = vmax.xlane.f32.xlu1 %v5848_v62 }
 0xd88   : > { %v4417_v3 = vpop.f32.mrf.mxu0 }
 0xd89   : > { %v2558_v5 = vmul.f32 0.35355338, %v4417_v3 }
 0xd8a   : > { %v2534_v6 = vpop.f32.mrf.mxu0 }
 0xd8b   : > { %v2591_v4 = vadd.f32 %v2575_v63, %v2558_v5  ;;  %v2557_v10 = vmul.f32 0.35355338, %v2534_v6 }
 0xd8d   : > { %2622 = vmax.xlane.f32.xlu0 %v2591_v4  ;;  %v2590_v13 = vadd.f32 %v2574_v14, %v2557_v10 }
 0xd91   : > { %2620 = vmax.xlane.f32.xlu0 %v2590_v13 }
 0xd95   : > { %2618 = vmax.xlane.f32.xlu0 %v2589_v16 }
 0xd99   : > { %2614 = vmax.xlane.f32.xlu0 %v5851_v22 }
 0xd9d   : > { %2612 = vmax.xlane.f32.xlu0 %v5854_v17 }
 0xda1   : > { %2610 = vmax.xlane.f32.xlu0 %v5857_v25 }
 0xda5   : > { %2608 = vmax.xlane.f32.xlu0 %v5860_v18 }
 0xda9   : > { %2606 = vmax.xlane.f32.xlu0 %v5863_v29 }
 0xdad   : > { %2604 = vmax.xlane.f32.xlu0 %v5866_v42 }
 0xdb1   : > { %2602 = vmax.xlane.f32.xlu0 %v5869_v37 }
 0xdb5   : > { %2600 = vmax.xlane.f32.xlu0 %v5872_v43 }
 0xdb9   : > { %2598 = vmax.xlane.f32.xlu0 %v5875_v45 }
 0xdbd   : > { %2596 = vmax.xlane.f32.xlu0 %v5880_v54 }
 0xdc1   : > { %2594 = vmax.xlane.f32.xlu0 %v5883_v52 }
 0xdc5   : > { %2592 = vmax.xlane.f32.xlu0 %v5887_v58 }
 0xe10   : > { %v2617_v60 = vpop.xlane.xlu1 %2616 }
 0xe11   : > { %v2636_v61 = vsub.f32 %v5848_v62, %v2617_v60 }
 0xe13   : > { %v2664_v5 = vmul.f32 1.442695, %v2636_v61 }
 0xe16   : > { %v2623_v53 = vpop.xlane.xlu0 %2622 }
 0xe17   : > { %v2639_v39 = vsub.f32 %v2591_v4, %v2623_v53 }
 0xe19   : > { %v2670_v59 = vmul.f32 1.442695, %v2639_v39 }
 0xe1a   : > { %v2621_v50 = vpop.xlane.xlu0 %2620 }
 0xe1b   : > { %4763 = vpow2.f32 %v2670_v59  ;;  %v2638_v11 = vsub.f32 %v2590_v13, %v2621_v50 }
 0xe1d   : > { %v2668_v7 = vmul.f32 1.442695, %v2638_v11 }
 0xe1e   : > { %v2619_v1 = vpop.xlane.xlu0 %2618 }
 0xe1f   : > { %4765 = vpow2.f32 %v2668_v7  ;;  %v2637_v51 = vsub.f32 %v2589_v16, %v2619_v1  ;;  %v4011_v7 = vld [vmem:[%s6443_s2 + $0x48] sm:$0xff]  ;;  %v3979_v1 = vld [vmem:[%s6443_s2 + $0x40] sm:$0xff] }
 0xe21   : > { %v2666_v3 = vmul.f32 1.442695, %v2637_v51 }
 0xe22   : > { %v2615_v63 = vpop.xlane.xlu0 %2614 }
 0xe23   : > { %4767 = vpow2.f32 %v2666_v3  ;;  %v2635_v6 = vsub.f32 %v5851_v22, %v2615_v63 }
 0xe24   : > { %4769 = vpow2.f32 %v2664_v5 }
 0xe25   : > { %v2662_v4 = vmul.f32 1.442695, %v2635_v6 }
 0xe26   : > { %v2613_v10 = vpop.xlane.xlu0 %2612 }
 0xe27   : > { %v2634_v14 = vsub.f32 %v5854_v17, %v2613_v10  ;;  %4771 = vpow2.f32 %v2662_v4 }
 0xe28   : > { %v5893_v19 = vpop.eup %4763 }
 0xe29   : > { %2702 = vadd.xlane.f32.xlu0 %v5893_v19  ;;  %v2660_v62 = vmul.f32 1.442695, %v2634_v14 }
 0xe2a   : > { %v2611_v13 = vpop.xlane.xlu0 %2610 }
 0xe2b   : > { %v2633_v20 = vsub.f32 %v5857_v25, %v2611_v13  ;;  %4773 = vpow2.f32 %v2660_v62 }
 0xe2c   : > { %v5897_v9 = vpop.eup %4765 }
 0xe2d   : > { %2700 = vadd.xlane.f32.xlu0 %v5897_v9  ;;  %v2658_v15 = vmul.f32 1.442695, %v2633_v20 }
 0xe2e   : > { %v2609_v16 = vpop.xlane.xlu0 %2608 }
 0xe2f   : > { %v2632_v22 = vsub.f32 %v5860_v18, %v2609_v16  ;;  %4775 = vpow2.f32 %v2658_v15 }
 0xe30   : > { %v5901_v2 = vpop.eup %4767 }
 0xe31   : > { %2698 = vadd.xlane.f32.xlu0 %v5901_v2  ;;  %v2656_v21 = vmul.f32 1.442695, %v2632_v22  ;;  %v5905_v24 = vpop.eup %4769 }
 0xe32   : > { %v2607_v23 = vpop.xlane.xlu0 %2606 }
 0xe33   : > { %v2631_v17 = vsub.f32 %v5863_v29, %v2607_v23  ;;  %4777 = vpow2.f32 %v2656_v21 }
 0xe34   : > { %v5909_v12 = vpop.eup %4771 }
 0xe35   : > { %2696 = vadd.xlane.f32.xlu0 %v5905_v24  ;;  %v2654_v26 = vmul.f32 1.442695, %v2631_v17 }
 0xe36   : > { %v2605_v25 = vpop.xlane.xlu0 %2604 }
 0xe37   : > { %v2630_v27 = vsub.f32 %v5866_v42, %v2605_v25  ;;  %4779 = vpow2.f32 %v2654_v26 }
 0xe38   : > { %v5913_v32 = vpop.eup %4773 }
 0xe39   : > { %2694 = vadd.xlane.f32.xlu0 %v5909_v12  ;;  %v2652_v28 = vmul.f32 1.442695, %v2630_v27 }
 0xe3a   : > { %v2603_v18 = vpop.xlane.xlu0 %2602 }
 0xe3b   : > { %v2629_v8 = vsub.f32 %v5869_v37, %v2603_v18  ;;  %4781 = vpow2.f32 %v2652_v28 }
 0xe3c   : > { %v5917_v38 = vpop.eup %4775 }
 0xe3d   : > { %2692 = vadd.xlane.f32.xlu0 %v5913_v32  ;;  %v2650_v34 = vmul.f32 1.442695, %v2629_v8 }
 0xe3e   : > { %v2601_v29 = vpop.xlane.xlu0 %2600 }
 0xe3f   : > { %v2628_v35 = vsub.f32 %v5872_v43, %v2601_v29  ;;  %4783 = vpow2.f32 %v2650_v34 }
 0xe40   : > { %v5921_v44 = vpop.eup %4777 }
 0xe41   : > { %2690 = vadd.xlane.f32.xlu0 %v5917_v38  ;;  %v2648_v40 = vmul.f32 1.442695, %v2628_v35 }
 0xe42   : > { %v2599_v42 = vpop.xlane.xlu0 %2598 }
 0xe43   : > { %v2627_v41 = vsub.f32 %v5875_v45, %v2599_v42  ;;  %4785 = vpow2.f32 %v2648_v40 }
 0xe44   : > { %v5925_v49 = vpop.eup %4779 }
 0xe45   : > { %2688 = vadd.xlane.f32.xlu0 %v5921_v44  ;;  %v2646_v37 = vmul.f32 1.442695, %v2627_v41 }
 0xe46   : > { %v2597_v46 = vpop.xlane.xlu0 %2596 }
 0xe47   : > { %v2626_v47 = vsub.f32 %v5880_v54, %v2597_v46  ;;  %4787 = vpow2.f32 %v2646_v37 }
 0xe48   : > { %v5929_v45 = vpop.eup %4781 }
 0xe49   : > { %v2644_v43 = vmul.f32 1.442695, %v2626_v47  ;;  %2686 = vadd.xlane.f32.xlu0 %v5925_v49 }
 0xe4a   : > { %v2595_v55 = vpop.xlane.xlu0 %2594 }
 0xe4b   : > { %4789 = vpow2.f32 %v2644_v43  ;;  %v2625_v56 = vsub.f32 %v5883_v52, %v2595_v55 }
 0xe4c   : > { %v5933_v54 = vpop.eup %4783 }
 0xe4d   : > { %v2642_v57 = vmul.f32 1.442695, %v2625_v56  ;;  %2684 = vadd.xlane.f32.xlu0 %v5929_v45 }
 0xe4e   : > { %v2593_v53 = vpop.xlane.xlu0 %2592 }
 0xe4f   : > { %4791 = vpow2.f32 %v2642_v57  ;;  %v2624_v39 = vsub.f32 %v5887_v58, %v2593_v53 }
 0xe50   : > { %v5936_v50 = vpop.eup %4785 }
 0xe51   : > { %v2640_v59 = vmul.f32 1.442695, %v2624_v39  ;;  %2682 = vadd.xlane.f32.xlu0 %v5933_v54 }
 0xe53   : > { %4793 = vpow2.f32 %v2640_v59  ;;  %v4000_v59 = vld [vmem:[%s6350_s6 + $0x40] sm:$0xff] }
 0xe54   : > { %v5939_v52 = vpop.eup %4787  ;;  %4455 = vmatprep.mubr.msk.f32.mxu1 %vm359_vm1, %v4000_v59  ;;  %v3088_v59 = vld [vmem:[#allocation2 + $0x2a8] sm:$0xff] }
 0xe55   : > { %2680 = vadd.xlane.f32.xlu0 %v5936_v50 }
 0xe58   : > { %v5941_v11 = vpop.eup %4789 }
 0xe59   : > { %2678 = vadd.xlane.f32.xlu0 %v5939_v52  ;;  %2676 = vadd.xlane.f32.xlu1 %v5941_v11 }
 0xe5c   : > { %v5945_v60 = vpop.eup %4791 }
 0xe5d   : > { %2674 = vadd.xlane.f32.xlu0 %v5945_v60 }
 0xe60   : > { %v5948_v58 = vpop.eup %4793 }
 0xe61   : > { %2672 = vadd.xlane.f32.xlu1 %v5948_v58 }
 0xe72   : > { %2924 = vperm.xlu1 %4634, %v4011_v7   ;;  %v4001_v7 = vld [vmem:[%s6350_s6 + $0x48] sm:$0xff] }
 0xe73   : > { %2071 = vperm.xlu0 %4633, %v3979_v1   ;;  %v4003_v1 = vld [vmem:[%s6350_s6 + $0x58] sm:$0xff] }
 0xeb2   : > { %v2703_v61 = vpop.xlane.xlu0 %2702 }
 0xeb3   : > { %4795 = vrcp.f32 %v2703_v61  ;;  %v4008_v61 = vld [vmem:[%s6345_s1 + $0x48] sm:$0xff] }
 0xeb6   : > { %v2701_v51 = vpop.xlane.xlu0 %2700 }
 0xeb7   : > { %4797 = vrcp.f32 %v2701_v51  ;;  %v4009_v51 = vld [vmem:[%s6345_s1 + $0x50] sm:$0xff] }
 0xeba   : > { %v2699_v3 = vpop.xlane.xlu0 %2698 }
 0xebb   : > { %4799 = vrcp.f32 %v2699_v3 }
 0xebe   : > { %v2697_v63 = vpop.xlane.xlu0 %2696 }
 0xebf   : > { %4801 = vrcp.f32 %v2697_v63 }
 0xec0   : > { %v4796_v5 = vpop.eup %4795 }
 0xec1   : > { %v2735_v6 = vmul.f32 %v4796_v5, %v5893_v19 }
 0xec2   : > { %v2695_v10 = vpop.xlane.xlu0 %2694 }
 0xec3   : > { %4803 = vrcp.f32 %v2695_v10  ;;  %4419 = vmatpush3.xpose.msra.mxu0 %v2735_v6 }
 0xec4   : > { %v4798_v4 = vpop.eup %4797  ;;  %4420 = vmatprep.subr.mxu0 %v5017_v0 }
 0xec5   : > { %v2734_v14 = vmul.f32 %v4798_v4, %v5897_v9 }
 0xec6   : > { %v2693_v13 = vpop.xlane.xlu0 %2692 }
 0xec7   : > { %4805 = vrcp.f32 %v2693_v13  ;;  %4421 = vmatpush3.xpose.msra.mxu0 %v2734_v14 }
 0xec8   : > { %v4800_v62 = vpop.eup %4799  ;;  %4422 = vmatprep.subr.mxu0 %v5017_v0 }
 0xec9   : > { %v2733_v20 = vmul.f32 %v4800_v62, %v5901_v2 }
 0xeca   : > { %v2691_v16 = vpop.xlane.xlu0 %2690 }
 0xecb   : > { %4807 = vrcp.f32 %v2691_v16  ;;  %4423 = vmatpush3.xpose.msra.mxu0 %v2733_v20 }
 0xecc   : > { %v4802_v19 = vpop.eup %4801  ;;  %4424 = vmatprep.subr.mxu0 %v5017_v0 }
 0xecd   : > { %v2732_v15 = vmul.f32 %v4802_v19, %v5905_v24 }
 0xece   : > { %v2689_v22 = vpop.xlane.xlu0 %2688 }
 0xecf   : > { %4809 = vrcp.f32 %v2689_v22  ;;  %4425 = vmatpush3.xpose.msra.mxu0 %v2732_v15  ;;  %v3034_v15 = vld [vmem:[#allocation2 + $0x260] sm:$0xff]  ;;  %v3029_v22 = vld [vmem:[#allocation2 + $0x258] sm:$0xff] }
 0xed0   : > { %v4804_v9 = vpop.eup %4803  ;;  %4426 = vmatprep.subr.mxu0 %v5017_v0 }
 0xed1   : > { %v2731_v23 = vmul.f32 %v4804_v9, %v5909_v12 }
 0xed2   : > { %v2687_v21 = vpop.xlane.xlu0 %2686 }
 0xed3   : > { %4811 = vrcp.f32 %v2687_v21  ;;  %4427 = vmatpush3.xpose.msra.mxu0 %v2731_v23 }
 0xed4   : > { %v4806_v2 = vpop.eup %4805  ;;  %4428 = vmatprep.subr.mxu0 %v5017_v0 }
 0xed5   : > { %v2730_v17 = vmul.f32 %v4806_v2, %v5913_v32 }
 0xed6   : > { %v2685_v25 = vpop.xlane.xlu0 %2684 }
 0xed7   : > { %4813 = vrcp.f32 %v2685_v25  ;;  %4429 = vmatpush3.xpose.msra.mxu0 %v2730_v17  ;;  %v3040_v17 = vld [vmem:[#allocation2 + $0x268] sm:$0xff]  ;;  %v3046_v25 = vld [vmem:[#allocation2 + $0x270] sm:$0xff] }
 0xed8   : > { %v4808_v24 = vpop.eup %4807  ;;  %4430 = vmatprep.subr.mxu0 %v5017_v0 }
 0xed9   : > { %v2729_v26 = vmul.f32 %v4808_v24, %v5917_v38 }
 0xeda   : > { %v2683_v27 = vpop.xlane.xlu0 %2682 }
 0xedb   : > { %4815 = vrcp.f32 %v2683_v27  ;;  %4431 = vmatpush3.xpose.msra.mxu0 %v2729_v26 }
 0xedc   : > { %v4810_v12 = vpop.eup %4809  ;;  %4432 = vmatprep.subr.mxu0 %v5017_v0 }
 0xedd   : > { %v2728_v18 = vmul.f32 %v4810_v12, %v5921_v44 }
 0xede   : > { %v2681_v28 = vpop.xlane.xlu0 %2680 }
 0xedf   : > { %4817 = vrcp.f32 %v2681_v28  ;;  %4433 = vmatpush3.xpose.msra.mxu0 %v2728_v18  ;;  %v3052_v18 = vld [vmem:[#allocation2 + $0x278] sm:$0xff] }
 0xee0   : > { %v4812_v8 = vpop.eup %4811  ;;  %4434 = vmatprep.subr.mxu0 %v5017_v0 }
 0xee1   : > { %v2727_v32 = vmul.f32 %v4812_v8, %v5925_v49 }
 0xee2   : > { %v2679_v29 = vpop.xlane.xlu0 %2678  ;;  %v2677_v34 = vpop.xlane.xlu1 %2676 }
 0xee3   : > { %4435 = vmatpush3.xpose.msra.mxu0 %v2727_v32  ;;  %4819 = vrcp.f32 %v2679_v29  ;;  %v3058_v32 = vld [vmem:[#allocation2 + $0x280] sm:$0xff] }
 0xee4   : > { %v4814_v35 = vpop.eup %4813  ;;  %4436 = vmatprep.subr.mxu0 %v5017_v0  ;;  %4821 = vrcp.f32 %v2677_v34 }
 0xee5   : > { %v2726_v38 = vmul.f32 %v4814_v35, %v5929_v45 }
 0xee6   : > { %v2675_v42 = vpop.xlane.xlu0 %2674 }
 0xee7   : > { %4437 = vmatpush3.xpose.msra.mxu0 %v2726_v38  ;;  %4823 = vrcp.f32 %v2675_v42  ;;  %v3064_v42 = vld [vmem:[#allocation2 + $0x288] sm:$0xff] }
 0xee8   : > { %v4816_v40 = vpop.eup %4815  ;;  %4438 = vmatprep.subr.mxu0 %v5017_v0 }
 0xee9   : > { %v2725_v41 = vmul.f32 %v4816_v40, %v5933_v54 }
 0xeea   : > { %v2673_v44 = vpop.xlane.xlu1 %2672 }
 0xeeb   : > { %4439 = vmatpush3.xpose.msra.mxu0 %v2725_v41  ;;  %4825 = vrcp.f32 %v2673_v44  ;;  %v3070_v44 = vld [vmem:[#allocation2 + $0x290] sm:$0xff] }
 0xeec   : > { %v4818_v37 = vpop.eup %4817  ;;  %4440 = vmatprep.subr.mxu0 %v5017_v0 }
 0xeed   : > { %v2724_v46 = vmul.f32 %v4818_v37, %v5936_v50 }
 0xeee   : > { %v2072_v53 = vpop.permute.xlu0 %2071  ;;  %v2925_v62 = vpop.permute.xlu1 %2924 }
 0xeef   : > { %4441 = vmatpush3.xpose.msra.mxu0 %v2724_v46  ;;  %v2160_v54 = vadd.f32 %v5840_v48, %v2072_v53  ;;  %v4002_v48 = vld [vmem:[%s6350_s6 + $0x50] sm:$0xff] }
 0xef0   : > { %4442 = vmatprep.subr.mxu0 %v5017_v0  ;;  %v4820_v47 = vpop.eup %4819 }
 0xef1   : > { %v2723_v49 = vmul.f32 %v4820_v47, %v5939_v52  ;;  %v4822_v43 = vpop.eup %4821  ;;  %v337_v52 = vld [vmem:[%s5192_s22 + $0x18] sm:$0xff]  ;;  %s6474_s22 = sld [smem:[#allocation12_spill]] }
 0xef2   : > { %v2722_v55 = vmul.f32 %v4822_v43, %v5941_v11  ;;  %v3076_v43 = vld [vmem:[#allocation2 + $0x298] sm:$0xff] }
 0xef3   : > { %4443 = vmatpush3.xpose.msra.mxu0 %v2723_v49 }
 0xef4   : > { %4444 = vmatprep.subr.mxu0 %v5017_v0  ;;  %v4824_v56 = vpop.eup %4823 }
 0xef5   : > { %v2721_v45 = vmul.f32 %v4824_v56, %v5945_v60 }
 0xef7   : > { %4445 = vmatpush3.xpose.msra.mxu0 %v2722_v55 }
 0xef8   : > { %4446 = vmatprep.subr.mxu0 %v5017_v0  ;;  %v4826_v57 = vpop.eup %4825 }
 0xef9   : > { %v2720_v39 = vmul.f32 %v4826_v57, %v5948_v58 }
 0xefb   : > { %4447 = vmatpush3.xpose.msra.mxu0 %v2721_v45  ;;  %v3082_v45 = vld [vmem:[#allocation2 + $0x2a0] sm:$0xff] }
 0xefc   : > { %4448 = vmatprep.subr.mxu0 %v5017_v0 }
 0xeff   : > { %4449 = vmatpush3.xpose.msra.mxu0 %v2720_v39 }
 0xf02   : > { %4451 = vmatmul.mubr.f32.vlgmr.msra.gmra.mxu0 %v2160_v54 }
 0xfc2   : > { %v2802_v50 = vpop.f32.mrf.mxu0 }
 0xfc3   : > { %v2811_v11 = vmax.f32 %v2802_v50, 0.0  ;;  %v2913_v58 = vadd.f32 %v2802_v50, %v337_v52 }
 0xfc4   : > { %v4452_v60 = vpop.f32.mrf.mxu0 }
 0xfc5   : > { %4453 = vmatprep.subr.mxu1 %v2811_v11 }
 0xfc6   : > { %4454 = vmatpush3.msra.mxu1 %v2811_v11  ;;  %v3094_v11 = vld [vmem:[#allocation2 + $0x2b0] sm:$0xff] }
 0xfc7   : > { %4456 = vmatmul.mubr.msk.f32.vlgmr.msra.gmra.mxu1 %vm359_vm1, %v4001_v7  ;;  %4461 = vmatprep.subr.mxu1 %v5017_v0 }
 0xfc8   : > { %4462 = vmatpush3.msra.mxu1 %v2913_v58  ;;  %4458 = vmatprep.mubr.msk.f32.mxu1 %vm359_vm1, %v4002_v48 }
 0xfcb   : > { %4459 = vmatmul.mubr.msk.f32.gmra.mxu1 %vm359_vm1, %v4003_v1  ;;  %v3098_v1 = vld [vmem:[#allocation2 + $0x2b8] sm:$0xff] }
 0xfcc   : > { %4463 = vmatprep.mubr.msk.f32.mxu1 %vm5018_vm0, %v5017_v0 }
 0xfcf   : > { %4464 = vmatmul.mubr.msk.f32.vlgmr.msra.gmra.mxu1 %vm359_vm1, %v4008_v61 }
 0xfd0   : > { %4466 = vmatprep.mubr.msk.f32.mxu1 %vm5018_vm0, %v5017_v0 }
 0xfd3   : > { %4467 = vmatmul.mubr.msk.f32.gmra.mxu1 %vm359_vm1, %v4009_v51 }
 0xfd4   : > { %4469 = vmatprep.mubr.msk.f32.mxu1 %vm5018_vm0, %v5017_v0 }
0x1087   : > { %v4457_v3 = vpop.f32.mrf.mxu1 }
0x1088   : > { %v6022_v63 = vadd.f32 %v4457_v3, %v5749_v31  ;;  %v4017_v31 = vld [vmem:[%s6348_s4 + $0x18] sm:$0xff] }
0x1089   : > { %v2890_v5 = vpop.f32.mrf.mxu1 }
0x108a   : > { %v6025_v6 = vadd.f32 %v2890_v5, %v5751_v33  ;;  %v3104_v5 = vld [vmem:[#allocation2 + $0x2c0] sm:$0xff] }
0x108b   : > { %v4460_v10 = vpop.f32.mrf.mxu1 }
0x108c   : > { %v6028_v4 = vadd.f32 %v4460_v10, %v5753_v36 }
0x108d   : > { %v2900_v14 = vpop.f32.mrf.mxu1 }
0x108e   : > { %v6031_v13 = vadd.f32 %v2900_v14, %v5755_v30 }
0x108f   : > { %v3012_v20 = vpop.f32.mrf.mxu1 }
0x1090   : > { %v6033_v16 = vadd.f32 %v3012_v20, %v2925_v62  ;;  %v3110_v20 = vld [vmem:[#allocation2 + $0x2c8] sm:$0xff] }
0x1091   : > { %v4465_v19 = vpop.f32.mrf.mxu1 }
0x1092   : > { %3031 = vrot.lane.b32.xlu0 %v6033_v16, %s6463_s28  ;;  %3026 = vrot.lane.b32.xlu1 %v6033_v16, %s6464_s9  ;;  %v3099_v62 = vmul.f32 %v3098_v1, %v6033_v16 }
0x1093   : > { %v6082_v33 = vpop.f32.mrf.mxu1 }
0x1095   : > { %v4468_v30 = vpop.f32.mrf.mxu1 }
0x1096   : > { %3043 = vrot.lane.b32.xlu0 %v6033_v16, %s6465_s11  ;;  %3037 = vrot.lane.b32.xlu1 %v6033_v16, %s6466_s16  ;;  %v3116_v30 = vld [vmem:[#allocation2 + $0x2d0] sm:$0xff]  ;;  %s5044_s11 = smov [#allocation7]  }
0x1097   : > { %s4947_s16 = sshll.u32 %s5044_s11, 4  ;;  %s4948_s16 = int_to_ptr.vmem [resolvable:$false] %s4947_s16 }
0x109a   : > { %3055 = vrot.lane.b32.xlu0 %v6033_v16, %s6467_s8  ;;  %3049 = vrot.lane.b32.xlu1 %v6033_v16, %s6444_s25  ;;  %s4949_s8 = scalar_lea.vmem %s4948_s16, 1024 }
0x109e   : > { %3067 = vrot.lane.b32.xlu0 %v6033_v16, %s6445_s23  ;;  %3061 = vrot.lane.b32.xlu1 %v6033_v16, %s6446_s24  ;;  %s6473_s24 = sld [smem:[#allocation24_spill]] }
0x10a2   : > { %3079 = vrot.lane.b32.xlu0 %v6033_v16, %s6447_s10  ;;  %3073 = vrot.lane.b32.xlu1 %v6033_v16, %s6448_s20  ;;  %s6477_s10 = sld [smem:[#allocation25_spill]] }
0x10a6   : > { %3091 = vrot.lane.b32.xlu0 %v6033_v16, %s6449_s19  ;;  %3085 = vrot.lane.b32.xlu1 %v6033_v16, %s6450_s17  ;;  %s6469_s19 = smov 114   ;;  %s6470_s17 = smov 112  }
0x10aa   : > { %3107 = vrot.lane.b32.xlu0 %v6033_v16, %s6451_s21  ;;  %3101 = vrot.lane.b32.xlu1 %v6033_v16, %s6452_s18  ;;  %s326_s18 = sand.u32 1, %s6474_s22  }
0x10ab   : > { %s3914_s21 = sshll.u32 %s326_s18, 5  ;;  %s6303_s28 = scalar_lea.sflag [#allocation4], %s326_s18 }
0x10ae   : > { %3119 = vrot.lane.b32.xlu0 %v6033_v16, %s6453_s13  ;;  %3113 = vrot.lane.b32.xlu1 %v6033_v16, %s6454_s12 }
0x10b2   : > { %3131 = vrot.lane.b32.xlu0 %v6033_v16, %s6455_s26  ;;  %3125 = vrot.lane.b32.xlu1 %v6033_v16, %s6456_s0  ;;  %s6471_s26 = sld [smem:[#allocation21_spill]] }
0x10b3   : > { %s6475_s0 = sld [smem:[#allocation15_spill]] }
0x10b6   : > { %3143 = vrot.lane.b32.xlu0 %v6033_v16, %s6469_s19  ;;  %3137 = vrot.lane.b32.xlu1 %v6033_v16, %s6458_s5  ;;  %s6472_s5 = smov 110  }
0x10b8   : > { %v4012_v36 = vld [vmem:[%s6471_s26 + $0x50] sm:$0xff] }
0x10ba   : > { %3155 = vrot.lane.b32.xlu0 %v6033_v16, %s6470_s17  ;;  %3149 = vrot.lane.b32.xlu1 %v6033_v16, %s6460_s29  ;;  %s4048_s29 = sshll.u32 %s6475_s0, 9 }
0x10bb   : > { %s6301_s20 = scalar_lea.hbm %s6477_s10, %s4048_s29 }
0x10be   : > { %3177 = vperm.xlu0 %4633, %v4017_v31   ;;  %3161 = vrot.lane.b32.xlu1 %v6033_v16, %s6461_s27 }
0x10c2   : > { %2929 = vperm.xlu0 %4633, %v4012_v36   ;;  %3167 = vrot.lane.b32.xlu1 %v6033_v16, %s6472_s5 }
0x1104   : > { %v3032_v9 = vpop.permute.xlu0 %3031  ;;  %v3027_v23 = vpop.permute.xlu1 %3026 }
0x1105   : > { %v3035_v21 = vmul.f32 %v3034_v15, %v3032_v9  ;;  %v3030_v2 = vmul.f32 %v3029_v22, %v3027_v23  ;;  %v3122_v23 = vld [vmem:[#allocation2 + $0x2d8] sm:$0xff] }
0x1107   : > { %v3036_v27 = vadd.f32 %v3035_v21, %v3030_v2 }
0x1108   : > { %v3044_v24 = vpop.permute.xlu0 %3043  ;;  %v3038_v26 = vpop.permute.xlu1 %3037 }
0x1109   : > { %v3041_v12 = vmul.f32 %v3040_v17, %v3038_v26  ;;  %v3047_v28 = vmul.f32 %v3046_v25, %v3044_v24  ;;  %v3128_v25 = vld [vmem:[#allocation2 + $0x2e0] sm:$0xff] }
0x110b   : > { %v3042_v8 = vadd.f32 %v3041_v12, %v3036_v27  ;;  %v3134_v12 = vld [vmem:[#allocation2 + $0x2e8] sm:$0xff] }
0x110c   : > { %v3056_v29 = vpop.permute.xlu0 %3055  ;;  %v3050_v34 = vpop.permute.xlu1 %3049 }
0x110d   : > { %v3048_v35 = vadd.f32 %v3047_v28, %v3042_v8  ;;  %v3053_v38 = vmul.f32 %v3052_v18, %v3050_v34  ;;  %v3059_v40 = vmul.f32 %v3058_v32, %v3056_v29  ;;  %v3140_v8 = vld [vmem:[#allocation2 + $0x2f0] sm:$0xff] }
0x110f   : > { %v3054_v41 = vadd.f32 %v3053_v38, %v3048_v35  ;;  %v3146_v35 = vld [vmem:[#allocation2 + $0x2f8] sm:$0xff] }
0x1110   : > { %v3068_v37 = vpop.permute.xlu0 %3067  ;;  %v3062_v46 = vpop.permute.xlu1 %3061 }
0x1111   : > { %v3060_v47 = vadd.f32 %v3059_v40, %v3054_v41  ;;  %v3065_v49 = vmul.f32 %v3064_v42, %v3062_v46  ;;  %v3071_v55 = vmul.f32 %v3070_v44, %v3068_v37  ;;  %v3152_v40 = vld [vmem:[#allocation2 + $0x300] sm:$0xff]  ;;  %v3158_v46 = vld [vmem:[#allocation2 + $0x308] sm:$0xff] }
0x1113   : > { %v3066_v56 = vadd.f32 %v3065_v49, %v3060_v47 }
0x1114   : > { %v3080_v57 = vpop.permute.xlu0 %3079  ;;  %v3074_v53 = vpop.permute.xlu1 %3073 }
0x1115   : > { %v3072_v39 = vadd.f32 %v3071_v55, %v3066_v56  ;;  %v3077_v54 = vmul.f32 %v3076_v43, %v3074_v53  ;;  %v3083_v50 = vmul.f32 %v3082_v45, %v3080_v57  ;;  %v3164_v55 = vld [vmem:[#allocation2 + $0x310] sm:$0xff]  ;;  %v3170_v53 = vld [vmem:[#allocation2 + $0x318] sm:$0xff] }
0x1117   : > { %v3078_v52 = vadd.f32 %v3077_v54, %v3072_v39 }
0x1118   : > { %v3092_v60 = vpop.permute.xlu0 %3091  ;;  %v3086_v7 = vpop.permute.xlu1 %3085 }
0x1119   : > { %v3084_v48 = vadd.f32 %v3083_v50, %v3078_v52  ;;  %v3089_v58 = vmul.f32 %v3088_v59, %v3086_v7  ;;  %v3095_v61 = vmul.f32 %v3094_v11, %v3092_v60  ;;  %v4010_v60 = vld [vmem:[%s6345_s1 + $0x58] sm:$0xff] }
0x111a   : > { %4470 = vmatmul.mubr.msk.f32.gmra.mxu1 %vm359_vm1, %v4010_v60 }
0x111b   : > { %v3090_v51 = vadd.f32 %v3089_v58, %v3084_v48 }
0x111c   : > { %v3108_v3 = vpop.permute.xlu0 %3107  ;;  %v3102_v10 = vpop.permute.xlu1 %3101 }
0x111d   : > { %v3096_v14 = vadd.f32 %v3095_v61, %v3090_v51  ;;  %v3105_v31 = vmul.f32 %v3104_v5, %v3102_v10  ;;  %v3111_v22 = vmul.f32 %v3110_v20, %v3108_v3 }
0x111f   : > { %v3100_v19 = vadd.f32 %v3099_v62, %v3096_v14 }
0x1120   : > { %v3120_v36 = vpop.permute.xlu0 %3119  ;;  %v3114_v15 = vpop.permute.xlu1 %3113 }
0x1121   : > { %v3106_v9 = vadd.f32 %v3105_v31, %v3100_v19  ;;  %v3117_v2 = vmul.f32 %v3116_v30, %v3114_v15  ;;  %v3123_v26 = vmul.f32 %v3122_v23, %v3120_v36 }
0x1123   : > { %v3112_v21 = vadd.f32 %v3111_v22, %v3106_v9 }
0x1124   : > { %v3132_v17 = vpop.permute.xlu0 %3131  ;;  %v3126_v24 = vpop.permute.xlu1 %3125 }
0x1125   : > { %v3118_v27 = vadd.f32 %v3117_v2, %v3112_v21  ;;  %v3129_v28 = vmul.f32 %v3128_v25, %v3126_v24  ;;  %v3135_v29 = vmul.f32 %v3134_v12, %v3132_v17 }
0x1127   : > { %v3124_v18 = vadd.f32 %v3123_v26, %v3118_v27 }
0x1128   : > { %v3144_v16 = vpop.permute.xlu0 %3143  ;;  %v3138_v32 = vpop.permute.xlu1 %3137 }
0x1129   : > { %v3130_v34 = vadd.f32 %v3129_v28, %v3124_v18  ;;  %v3141_v42 = vmul.f32 %v3140_v8, %v3138_v32  ;;  %v3147_v44 = vmul.f32 %v3146_v35, %v3144_v16  ;;  %v3435_v35 = vld [vmem:[#allocation5 + $0x1e0] sm:$0xff] }
0x112b   : > { %v3136_v38 = vadd.f32 %v3135_v29, %v3130_v34 }
0x112c   : > { %v3150_v41 = vpop.permute.xlu1 %3149  ;;  %v3156_v47 = vpop.permute.xlu0 %3155 }
0x112d   : > { %v3142_v37 = vadd.f32 %v3141_v42, %v3136_v38  ;;  %v3153_v43 = vmul.f32 %v3152_v40, %v3150_v41  ;;  %v3159_v45 = vmul.f32 %v3158_v46, %v3156_v47  ;;  %v3438_v41 = vld [vmem:[#allocation5 + $0x1f8] sm:$0xff] }
0x112f   : > { %v3148_v49 = vadd.f32 %v3147_v44, %v3142_v37 }
0x1130   : > { %v3162_v56 = vpop.permute.xlu1 %3161 }
0x1131   : > { %v3154_v57 = vadd.f32 %v3153_v43, %v3148_v49  ;;  %v3165_v54 = vmul.f32 %v3164_v55, %v3162_v56  ;;  %v3437_v49 = vld [vmem:[#allocation5 + $0x1f0] sm:$0xff]  ;;  %v3436_v56 = vld [vmem:[#allocation5 + $0x1e8] sm:$0xff] }
0x1133   : > { %v3160_v39 = vadd.f32 %v3159_v45, %v3154_v57 }
0x1134   : > { %v3168_v59 = vpop.permute.xlu1 %3167 }
0x1135   : > { %v3166_v50 = vadd.f32 %v3165_v54, %v3160_v39  ;;  %v3171_v52 = vmul.f32 %v3170_v53, %v3168_v59  ;;  %v3434_v53 = vld [vmem:[#allocation5 + $0x1d8] sm:$0xff]  ;;  %v3433_v59 = vld [vmem:[#allocation5 + $0x1d0] sm:$0xff] }
0x1137   : > { %v3172_v11 = vadd.f32 %v3171_v52, %v3166_v50 }
0x1139   : > { %v3178_v7 = vpop.permute.xlu0 %3177 }
0x113a   : > { %v3180_v48 = vadd.f32 %v3178_v7, %v3172_v11  ;;  %v3432_v11 = vld [vmem:[#allocation5 + $0x1c8] sm:$0xff] }
0x113c   : > { %3181 = vxpose.xlu1.b32.start.end [1/1] (short) %v3180_v48, 128  ;;  %v3431_v48 = vld [vmem:[#allocation5 + $0x1c0] sm:$0xff] }
0x113d   : > { %v2930_v58 = vpop.permute.xlu0 %2929 }
0x113e   : > { %v3018_v1 = vadd.f32 %v6082_v33, %v2930_v58 }
0x1140   : > { %4472 = vmatprep.subr.mxu1 %v3018_v1 }
0x1141   : > { %4473 = vmatpush3.msra.mxu1 %v3018_v1 }
0x1142   : > { %4498 = vmatprep.subr.mxu1 %v5017_v0 }
0x11b8   : > { %v3197_v61 = vpop.trf.xlu1 }
0x11b9   : > { %4474 = vmatprep.mubr.msk.f32.mxu1 %vm359_vm1, %v3197_v61  ;;  %v3430_v61 = vld [vmem:[#allocation5 + $0x1b8] sm:$0xff] }
0x11bc   : > { %v3198_v51 = vpop.trf.xlu1 }
0x11bd   : > { %4475 = vmatmul.mubr.msk.f32.vlgmr.msra.gmra.mxu1 %vm359_vm1, %v3198_v51 }
0x11c0   : > { %v3199_v3 = vpop.trf.xlu1 }
0x11c1   : > { %4477 = vmatprep.mubr.msk.f32.mxu1 %vm359_vm1, %v3199_v3 }
0x11c4   : > { %v3200_v5 = vpop.trf.xlu1 }
0x11c5   : > { %4478 = vmatmul.mubr.msk.f32.gmra.mxu1 %vm359_vm1, %v3200_v5  ;;  %v3429_v5 = vld [vmem:[#allocation5 + $0x1b0] sm:$0xff] }
0x11c8   : > { %v3201_v10 = vpop.trf.xlu1 }
0x11c9   : > { %4480 = vmatprep.mubr.msk.f32.mxu1 %vm359_vm1, %v3201_v10 }
0x11cc   : > { %v3202_v33 = vpop.trf.xlu1 }
0x11cd   : > { %4481 = vmatmul.mubr.msk.f32.gmra.mxu1 %vm359_vm1, %v3202_v33 }
0x11d0   : > { %v3203_v14 = vpop.trf.xlu1 }
0x11d1   : > { %4483 = vmatprep.mubr.msk.f32.mxu1 %vm359_vm1, %v3203_v14  ;;  %v3428_v14 = vld [vmem:[#allocation5 + $0x1a8] sm:$0xff] }
0x11d4   : > { %v3204_v62 = vpop.trf.xlu1 }
0x11d5   : > { %4484 = vmatmul.mubr.msk.f32.gmra.mxu1 %vm359_vm1, %v3204_v62 }
0x11d8   : > { %v3205_v20 = vpop.trf.xlu1 }
0x11d9   : > { %4486 = vmatprep.mubr.msk.f32.mxu1 %vm359_vm1, %v3205_v20 }
0x11da   : > { %v6116_v23 = vpop.f32.mrf.mxu1 }
0x11dc   : > { %v3206_v19 = vpop.trf.xlu1  ;;  %v4471_v21 = vpop.f32.mrf.mxu1 }
0x11dd   : > { %4487 = vmatmul.mubr.msk.f32.gmra.mxu1 %vm359_vm1, %v3206_v19  ;;  %v3427_v19 = vld [vmem:[#allocation5 + $0x1a0] sm:$0xff] }
0x11e0   : > { %v3207_v31 = vpop.trf.xlu1 }
0x11e1   : > { %4489 = vmatprep.mubr.msk.f32.mxu1 %vm359_vm1, %v3207_v31 }
0x11e4   : > { %v3208_v36 = vpop.trf.xlu1 }
0x11e5   : > { %4490 = vmatmul.mubr.msk.f32.gmra.mxu1 %vm359_vm1, %v3208_v36 }
0x11e8   : > { %v3209_v30 = vpop.trf.xlu1 }
0x11e9   : > { %4492 = vmatprep.mubr.msk.f32.mxu1 %vm359_vm1, %v3209_v30  ;;  %v3426_v30 = vld [vmem:[#allocation5 + $0x198] sm:$0xff] }
0x11ec   : > { %v3210_v15 = vpop.trf.xlu1 }
0x11ed   : > { %4493 = vmatmul.mubr.msk.f32.gmra.mxu1 %vm359_vm1, %v3210_v15 }
0x11f0   : > { %v3211_v22 = vpop.trf.xlu1 }
0x11f1   : > { %4495 = vmatprep.mubr.msk.f32.mxu1 %vm359_vm1, %v3211_v22 }
0x11f4   : > { %v3212_v9 = vpop.trf.xlu1 }
0x11f5   : > { %4496 = vmatmul.mubr.msk.f32.gmra.mxu1 %vm359_vm1, %v3212_v9  ;;  %v3425_v9 = vld [vmem:[#allocation5 + $0x190] sm:$0xff] }
0x11f6   : > { %4530 = vmatprep.mubr.msk.f32.mxu1 %vm5018_vm0, %v5017_v0 }
0x127d   : > { %v6118_v2 = vpop.f32.mrf.mxu1 }
0x127e   : > { %v3407_v21 = vmul.f32 0.35355338, %v6118_v2 }
0x127f   : > { %v6120_v17 = vpop.f32.mrf.mxu1 }
0x1285   : > { %v4479_v25 = vpop.f32.mrf.mxu1 }
0x1286   : > { %v3409_v31 = vmul.f32 0.35355338, %v4479_v25 }
0x1287   : > { %v6122_v24 = vpop.f32.mrf.mxu1 }
0x1288   : > { %v6151_v15 = vadd.f32 %v3426_v30, %v3409_v31  ;;  %v3408_v22 = vmul.f32 0.35355338, %v6122_v24 }
0x128d   : > { %v4482_v26 = vpop.f32.mrf.mxu1 }
0x128e   : > { %v3411_v10 = vmul.f32 0.35355338, %v4482_v26  ;;  %v6156_v26 = vadd.f32 %v3425_v9, %v3408_v22 }
0x128f   : > { %v3347_v27 = vpop.f32.mrf.mxu1 }
0x1290   : > { %v6145_v62 = vadd.f32 %v3428_v14, %v3411_v10  ;;  %v3410_v20 = vmul.f32 0.35355338, %v3347_v27  ;;  %v3424_v27 = vld [vmem:[#allocation5 + $0x188] sm:$0xff] }
0x1291   : > { %v6159_v25 = vadd.f32 %v3424_v27, %v3407_v21 }
0x1292   : > { %v6148_v36 = vadd.f32 %v3427_v19, %v3410_v20 }
0x1295   : > { %v4485_v12 = vpop.f32.mrf.mxu1 }
0x1296   : > { %v3413_v58 = vmul.f32 0.35355338, %v4485_v12  ;;  %v3406_v12 = vmul.f32 0.35355338, %v6120_v17 }
0x1297   : > { %v3357_v18 = vpop.f32.mrf.mxu1 }
0x1298   : > { %v6139_v51 = vadd.f32 %v3430_v61, %v3413_v58  ;;  %v3412_v3 = vmul.f32 0.35355338, %v3357_v18  ;;  %v3423_v18 = vld [vmem:[#allocation5 + $0x180] sm:$0xff] }
0x129a   : > { %v6142_v33 = vadd.f32 %v3429_v5, %v3412_v3 }
0x129d   : > { %v4488_v28 = vpop.f32.mrf.mxu1 }
0x129e   : > { %v3415_v50 = vmul.f32 0.35355338, %v4488_v28  ;;  %v6163_v28 = vadd.f32 %v3423_v18, %v3406_v12 }
0x129f   : > { %v3367_v16 = vpop.f32.mrf.mxu1 }
0x12a0   : > { %v6133_v60 = vadd.f32 %v3432_v11, %v3415_v50  ;;  %v3414_v7 = vmul.f32 0.35355338, %v3367_v16 }
0x12a2   : > { %v6136_v1 = vadd.f32 %v3431_v48, %v3414_v7 }
0x12a5   : > { %v4491_v8 = vpop.f32.mrf.mxu1 }
0x12a6   : > { %v3417_v45 = vmul.f32 0.35355338, %v4491_v8 }
0x12a7   : > { %v3377_v32 = vpop.f32.mrf.mxu1 }
0x12a8   : > { %v6127_v39 = vadd.f32 %v3434_v53, %v3417_v45  ;;  %v3416_v54 = vmul.f32 0.35355338, %v3377_v32 }
0x12aa   : > { %v6130_v52 = vadd.f32 %v3433_v59, %v3416_v54 }
0x12ad   : > { %v4494_v29 = vpop.f32.mrf.mxu1 }
0x12ae   : > { %v3419_v43 = vmul.f32 0.35355338, %v4494_v29 }
0x12af   : > { %v3387_v34 = vpop.f32.mrf.mxu1 }
0x12b0   : > { %v3418_v38 = vmul.f32 0.35355338, %v3387_v34  ;;  %v3452_v57 = vadd.f32 %v3436_v56, %v3419_v43 }
0x12b2   : > { %v6124_v42 = vadd.f32 %v3435_v35, %v3418_v38 }
0x12b4   : > { %3479 = vmax.xlane.f32.xlu1 %v6124_v42 }
0x12b5   : > { %v4497_v40 = vpop.f32.mrf.mxu1 }
0x12b6   : > { %v3421_v44 = vmul.f32 0.35355338, %v4497_v40 }
0x12b7   : > { %v3397_v37 = vpop.f32.mrf.mxu1 }
0x12b8   : > { %v3454_v46 = vadd.f32 %v3438_v41, %v3421_v44  ;;  %v3420_v47 = vmul.f32 0.35355338, %v3397_v37 }
0x12ba   : > { %3485 = vmax.xlane.f32.xlu0 %v3454_v46  ;;  %v3453_v55 = vadd.f32 %v3437_v49, %v3420_v47 }
0x12be   : > { %3483 = vmax.xlane.f32.xlu0 %v3453_v55 }
0x12c2   : > { %3481 = vmax.xlane.f32.xlu0 %v3452_v57 }
0x12c6   : > { %3477 = vmax.xlane.f32.xlu0 %v6127_v39 }
0x12ca   : > { %3475 = vmax.xlane.f32.xlu0 %v6130_v52 }
0x12ce   : > { %3473 = vmax.xlane.f32.xlu0 %v6133_v60 }
0x12d2   : > { %3471 = vmax.xlane.f32.xlu0 %v6136_v1 }
0x12d6   : > { %3469 = vmax.xlane.f32.xlu0 %v6139_v51 }
0x12da   : > { %3467 = vmax.xlane.f32.xlu0 %v6142_v33 }
0x12de   : > { %3465 = vmax.xlane.f32.xlu0 %v6145_v62 }
0x12e2   : > { %3463 = vmax.xlane.f32.xlu0 %v6148_v36 }
0x12e6   : > { %3461 = vmax.xlane.f32.xlu0 %v6151_v15 }
0x12ea   : > { %3459 = vmax.xlane.f32.xlu0 %v6156_v26 }
0x12ee   : > { %3457 = vmax.xlane.f32.xlu0 %v6159_v25 }
0x12f2   : > { %3455 = vmax.xlane.f32.xlu0 %v6163_v28 }
0x133d   : > { %v3480_v29 = vpop.xlane.xlu1 %3479 }
0x133e   : > { %v3499_v38 = vsub.f32 %v6124_v42, %v3480_v29 }
0x1340   : > { %v3527_v44 = vmul.f32 1.442695, %v3499_v38  ;;  %v3777_v38 = vld [vmem:[%s6473_s24 + $0x8] sm:$0xff] }
0x1343   : > { %v3486_v24 = vpop.xlane.xlu0 %3485 }
0x1344   : > { %v3502_v16 = vsub.f32 %v3454_v46, %v3486_v24 }
0x1346   : > { %v3533_v8 = vmul.f32 1.442695, %v3502_v16 }
0x1347   : > { %v3484_v2 = vpop.xlane.xlu0 %3483 }
0x1348   : > { %4827 = vpow2.f32 %v3533_v8  ;;  %v3501_v32 = vsub.f32 %v3453_v55, %v3484_v2 }
0x134a   : > { %v3531_v34 = vmul.f32 1.442695, %v3501_v32 }
0x134b   : > { %v3482_v35 = vpop.xlane.xlu0 %3481 }
0x134c   : > { %4829 = vpow2.f32 %v3531_v34  ;;  %v3500_v17 = vsub.f32 %v3452_v57, %v3482_v35  ;;  %v3776_v34 = vld [vmem:[%s6473_s24] sm:$0xff]  ;;  %v4013_v35 = vld [vmem:[%s6471_s26 + $0x58] sm:$0xff]  ;;  %s328_s26 = scalar_lea.vmem [#allocation7], %s3914_s21 }
0x134d   : > { %s3822_s5 = sshll.u32 %s328_s26, 4  ;;  %s6296_s5 = int_to_ptr.vmem [resolvable:$true] %s3822_s5 }
0x134e   : > { %v3529_v40 = vmul.f32 1.442695, %v3500_v17  ;;  %v3778_v17 = vld [vmem:[%s6473_s24 + $0x10] sm:$0xff]  ;;  %s4943_s9 = scalar_lea.vmem %s6296_s5, 512  ;;  %p4950_p11 = scmp.lt.s32.totalorder %s6296_s5, %s4948_s16 }
0x134f   : > { %v3478_v41 = vpop.xlane.xlu0 %3477  ;;  %p4944_p10 = scmp.ne.s32.totalorder %s6296_s5, %s4943_s9  ;;  %p4951_p0 = scmp.lt.s32.totalorder %s4949_s8, %s4943_s9 }
0x1350   : > { %4831 = vpow2.f32 %v3529_v40  ;;  %v3498_v37 = vsub.f32 %v6127_v39, %v3478_v41  ;;  %v3779_v40 = vld [vmem:[%s6473_s24 + $0x18] sm:$0xff] }
0x1351   : > { %4833 = vpow2.f32 %v3527_v44  ;;  %p4945_p12 = pnand %p4944_p10, %p5129_p5  ;;  %p4952_p1 = por %p4951_p0, %p4950_p11 }
0x1352   : > { %v3525_v46 = vmul.f32 1.442695, %v3498_v37 }
0x1353   : > { %v3476_v47 = vpop.xlane.xlu0 %3475  ;;  %p4946_p8 = pneg %p4945_p12 }
0x1354   : > { %v3497_v49 = vsub.f32 %v6130_v52, %v3476_v47  ;;  %4835 = vpow2.f32 %v3525_v46 }
0x1355   : > { %v6169_v43 = vpop.eup %4827  ;;  %p4953_p3 = pnand %p4952_p1, %p4946_p8 }
0x1356   : > { %3565 = vadd.xlane.f32.xlu0 %v6169_v43  ;;  %v3523_v42 = vmul.f32 1.442695, %v3497_v49 }
0x1357   : > { %v3474_v55 = vpop.xlane.xlu0 %3473 }
0x1358   : > { %v3496_v56 = vsub.f32 %v6133_v60, %v3474_v55  ;;  %4837 = vpow2.f32 %v3523_v42 }
0x1359   : > { %v6173_v45 = vpop.eup %4829 }
0x135a   : > { %3563 = vadd.xlane.f32.xlu0 %v6173_v45  ;;  %v3521_v53 = vmul.f32 1.442695, %v3496_v56 }
0x135b   : > { %v3472_v57 = vpop.xlane.xlu0 %3471 }
0x135c   : > { %v3495_v39 = vsub.f32 %v6136_v1, %v3472_v57  ;;  %4839 = vpow2.f32 %v3521_v53 }
0x135d   : > { %v6177_v54 = vpop.eup %4831 }
0x135e   : > { %3561 = vadd.xlane.f32.xlu0 %v6177_v54  ;;  %v3519_v50 = vmul.f32 1.442695, %v3495_v39  ;;  %v6181_v11 = vpop.eup %4833 }
0x135f   : > { %v3470_v59 = vpop.xlane.xlu0 %3469 }
0x1360   : > { %v3494_v52 = vsub.f32 %v6139_v51, %v3470_v59  ;;  %4841 = vpow2.f32 %v3519_v50 }
0x1361   : > { %v6185_v58 = vpop.eup %4835 }
0x1362   : > { %3559 = vadd.xlane.f32.xlu0 %v6181_v11  ;;  %v3517_v7 = vmul.f32 1.442695, %v3494_v52 }
0x1363   : > { %v3468_v60 = vpop.xlane.xlu0 %3467 }
0x1364   : > { %v3493_v48 = vsub.f32 %v6142_v33, %v3468_v60  ;;  %4843 = vpow2.f32 %v3517_v7 }
0x1365   : > { %v6189_v5 = vpop.eup %4837 }
0x1366   : > { %3557 = vadd.xlane.f32.xlu0 %v6185_v58  ;;  %v3515_v61 = vmul.f32 1.442695, %v3493_v48 }
0x1367   : > { %v3466_v1 = vpop.xlane.xlu0 %3465 }
0x1368   : > { %v3492_v3 = vsub.f32 %v6145_v62, %v3466_v1  ;;  %4845 = vpow2.f32 %v3515_v61 }
0x1369   : > { %v6193_v20 = vpop.eup %4839 }
0x136a   : > { %3555 = vadd.xlane.f32.xlu0 %v6189_v5  ;;  %v3513_v10 = vmul.f32 1.442695, %v3492_v3 }
0x136b   : > { %v3464_v51 = vpop.xlane.xlu0 %3463 }
0x136c   : > { %v3491_v14 = vsub.f32 %v6148_v36, %v3464_v51  ;;  %4847 = vpow2.f32 %v3513_v10 }
0x136d   : > { %v6197_v30 = vpop.eup %4841 }
0x136e   : > { %3553 = vadd.xlane.f32.xlu0 %v6193_v20  ;;  %v3511_v19 = vmul.f32 1.442695, %v3491_v14 }
0x136f   : > { %v3462_v33 = vpop.xlane.xlu0 %3461 }
0x1370   : > { %v3490_v31 = vsub.f32 %v6151_v15, %v3462_v33  ;;  %4849 = vpow2.f32 %v3511_v19 }
0x1371   : > { %v6201_v21 = vpop.eup %4843 }
0x1372   : > { %3551 = vadd.xlane.f32.xlu0 %v6197_v30  ;;  %v3509_v62 = vmul.f32 1.442695, %v3490_v31 }
0x1373   : > { %v3460_v22 = vpop.xlane.xlu0 %3459 }
0x1374   : > { %v3489_v9 = vsub.f32 %v6156_v26, %v3460_v22  ;;  %4851 = vpow2.f32 %v3509_v62 }
0x1375   : > { %v6205_v15 = vpop.eup %4845 }
0x1376   : > { %v3507_v36 = vmul.f32 1.442695, %v3489_v9  ;;  %3549 = vadd.xlane.f32.xlu0 %v6201_v21 }
0x1377   : > { %v3458_v27 = vpop.xlane.xlu0 %3457 }
0x1378   : > { %4853 = vpow2.f32 %v3507_v36  ;;  %v3488_v12 = vsub.f32 %v6159_v25, %v3458_v27 }
0x1379   : > { %v6209_v26 = vpop.eup %4847 }
0x137a   : > { %v3505_v18 = vmul.f32 1.442695, %v3488_v12  ;;  %3547 = vadd.xlane.f32.xlu0 %v6205_v15 }
0x137b   : > { %v3456_v24 = vpop.xlane.xlu0 %3455 }
0x137c   : > { %4855 = vpow2.f32 %v3505_v18  ;;  %v3487_v16 = vsub.f32 %v6163_v28, %v3456_v24 }
0x137d   : > { %v6212_v2 = vpop.eup %4849 }
0x137e   : > { %v3503_v8 = vmul.f32 1.442695, %v3487_v16  ;;  %3545 = vadd.xlane.f32.xlu0 %v6209_v26 }
0x1380   : > { %4857 = vpow2.f32 %v3503_v8 }
0x1381   : > { %v6215_v25 = vpop.eup %4851 }
0x1382   : > { %3543 = vadd.xlane.f32.xlu0 %v6212_v2 }
0x1385   : > { %v6217_v32 = vpop.eup %4853 }
0x1386   : > { %3541 = vadd.xlane.f32.xlu0 %v6215_v25  ;;  %3539 = vadd.xlane.f32.xlu1 %v6217_v32 }
0x1389   : > { %v6221_v29 = vpop.eup %4855 }
0x138a   : > { %3537 = vadd.xlane.f32.xlu0 %v6221_v29 }
0x138d   : > { %v6224_v28 = vpop.eup %4857 }
0x138e   : > { %3535 = vadd.xlane.f32.xlu1 %v6224_v28 }
0x139f   : > { %3782 = vperm.xlu1 %4634, %v3776_v34  }
0x13a0   : > { %2934 = vperm.xlu0 %4633, %v4013_v35  }
0x13a3   : > { %3787 = vperm.xlu1 %4634, %v3777_v38  }
0x13a4   : > { %3792 = vperm.xlu0 %4633, %v3778_v17  }
0x13a7   : > { %3797 = vperm.xlu1 %4634, %v3779_v40  }
0x13df   : > { %v3566_v41 = vpop.xlane.xlu0 %3565 }
0x13e0   : > { %4859 = vrcp.f32 %v3566_v41 }
0x13e3   : > { %v3564_v44 = vpop.xlane.xlu0 %3563 }
0x13e4   : > { %4861 = vrcp.f32 %v3564_v44 }
0x13e7   : > { %v3562_v37 = vpop.xlane.xlu0 %3561 }
0x13e8   : > { %4863 = vrcp.f32 %v3562_v37 }
0x13eb   : > { %v3560_v47 = vpop.xlane.xlu0 %3559 }
0x13ec   : > { %4865 = vrcp.f32 %v3560_v47 }
0x13ed   : > { %v4860_v46 = vpop.eup %4859 }
0x13ee   : > { %v3598_v49 = vmul.f32 %v4860_v46, %v6169_v43 }
0x13ef   : > { %v3558_v55 = vpop.xlane.xlu0 %3557 }
0x13f0   : > { %4867 = vrcp.f32 %v3558_v55  ;;  %4499 = vmatpush3.xpose.msra.mxu1 %v3598_v49 }
0x13f1   : > { %v4862_v42 = vpop.eup %4861  ;;  %4500 = vmatprep.subr.mxu1 %v5017_v0 }
0x13f2   : > { %v3597_v56 = vmul.f32 %v4862_v42, %v6173_v45 }
0x13f3   : > { %v3556_v57 = vpop.xlane.xlu0 %3555 }
0x13f4   : > { %4869 = vrcp.f32 %v3556_v57  ;;  %4501 = vmatpush3.xpose.msra.mxu1 %v3597_v56 }
0x13f5   : > { %v4864_v53 = vpop.eup %4863  ;;  %4502 = vmatprep.subr.mxu1 %v5017_v0 }
0x13f6   : > { %v3596_v39 = vmul.f32 %v4864_v53, %v6177_v54 }
0x13f7   : > { %v3554_v59 = vpop.xlane.xlu0 %3553 }
0x13f8   : > { %4871 = vrcp.f32 %v3554_v59  ;;  %4503 = vmatpush3.xpose.msra.mxu1 %v3596_v39 }
0x13f9   : > { %v4866_v43 = vpop.eup %4865  ;;  %4504 = vmatprep.subr.mxu1 %v5017_v0 }
0x13fa   : > { %v3595_v50 = vmul.f32 %v4866_v43, %v6181_v11 }
0x13fb   : > { %v3552_v52 = vpop.xlane.xlu0 %3551 }
0x13fc   : > { %4873 = vrcp.f32 %v3552_v52  ;;  %4505 = vmatpush3.xpose.msra.mxu1 %v3595_v50 }
0x13fd   : > { %v4868_v45 = vpop.eup %4867  ;;  %4506 = vmatprep.subr.mxu1 %v5017_v0 }
0x13fe   : > { %v3594_v60 = vmul.f32 %v4868_v45, %v6185_v58 }
0x13ff   : > { %v3550_v7 = vpop.xlane.xlu0 %3549 }
0x1400   : > { %4875 = vrcp.f32 %v3550_v7  ;;  %4507 = vmatpush3.xpose.msra.mxu1 %v3594_v60 }
0x1401   : > { %v4870_v54 = vpop.eup %4869  ;;  %4508 = vmatprep.subr.mxu1 %v5017_v0 }
0x1402   : > { %v3593_v48 = vmul.f32 %v4870_v54, %v6189_v5 }
0x1403   : > { %v3548_v1 = vpop.xlane.xlu0 %3547 }
0x1404   : > { %4877 = vrcp.f32 %v3548_v1  ;;  %4509 = vmatpush3.xpose.msra.mxu1 %v3593_v48 }
0x1405   : > { %v4872_v11 = vpop.eup %4871  ;;  %4510 = vmatprep.subr.mxu1 %v5017_v0 }
0x1406   : > { %v3592_v61 = vmul.f32 %v4872_v11, %v6193_v20 }
0x1407   : > { %v3546_v3 = vpop.xlane.xlu0 %3545 }
0x1408   : > { %4879 = vrcp.f32 %v3546_v3  ;;  %4511 = vmatpush3.xpose.msra.mxu1 %v3592_v61 }
0x1409   : > { %v4874_v58 = vpop.eup %4873  ;;  %4512 = vmatprep.subr.mxu1 %v5017_v0 }
0x140a   : > { %v3591_v51 = vmul.f32 %v4874_v58, %v6197_v30 }
0x140b   : > { %v3544_v10 = vpop.xlane.xlu0 %3543 }
0x140c   : > { %4881 = vrcp.f32 %v3544_v10  ;;  %4513 = vmatpush3.xpose.msra.mxu1 %v3591_v51 }
0x140d   : > { %v4876_v5 = vpop.eup %4875  ;;  %4514 = vmatprep.subr.mxu1 %v5017_v0 }
0x140e   : > { %v3590_v14 = vmul.f32 %v4876_v5, %v6201_v21 }
0x140f   : > { %v3542_v33 = vpop.xlane.xlu0 %3541  ;;  %v3540_v19 = vpop.xlane.xlu1 %3539 }
0x1410   : > { %4515 = vmatpush3.xpose.msra.mxu1 %v3590_v14  ;;  %4883 = vrcp.f32 %v3542_v33 }
0x1411   : > { %v4878_v20 = vpop.eup %4877  ;;  %4516 = vmatprep.subr.mxu1 %v5017_v0  ;;  %4885 = vrcp.f32 %v3540_v19 }
0x1412   : > { %v3589_v31 = vmul.f32 %v4878_v20, %v6205_v15 }
0x1413   : > { %v3538_v62 = vpop.xlane.xlu0 %3537 }
0x1414   : > { %4517 = vmatpush3.xpose.msra.mxu1 %v3589_v31  ;;  %4887 = vrcp.f32 %v3538_v62 }
0x1415   : > { %v4880_v30 = vpop.eup %4879  ;;  %4518 = vmatprep.subr.mxu1 %v5017_v0 }
0x1416   : > { %v3588_v22 = vmul.f32 %v4880_v30, %v6209_v26 }
0x1417   : > { %v3536_v9 = vpop.xlane.xlu1 %3535 }
0x1418   : > { %4519 = vmatpush3.xpose.msra.mxu1 %v3588_v22  ;;  %4889 = vrcp.f32 %v3536_v9 }
0x1419   : > { %v4882_v21 = vpop.eup %4881  ;;  %4520 = vmatprep.subr.mxu1 %v5017_v0 }
0x141a   : > { %v3587_v36 = vmul.f32 %v4882_v21, %v6212_v2 }
0x141b   : > { %v2935_v8 = vpop.permute.xlu0 %2934  ;;  %v3783_v38 = vpop.permute.xlu1 %3782 }
0x141c   : > { %4521 = vmatpush3.xpose.msra.mxu1 %v3587_v36 }
0x141d   : > { %4522 = vmatprep.subr.mxu1 %v5017_v0  ;;  %v4884_v27 = vpop.eup %4883 }
0x141e   : > { %v3586_v12 = vmul.f32 %v4884_v27, %v6215_v25  ;;  %v4886_v15 = vpop.eup %4885  ;;  %v3023_v25 = vadd.f32 %v6116_v23, %v2935_v8  ;;  %v4036_v23 = vld [vmem:[%s6350_s6 + $0x70] sm:$0xff] }
0x141f   : > { %v3585_v18 = vmul.f32 %v4886_v15, %v6217_v32  ;;  %v4034_v32 = vld [vmem:[%s6350_s6 + $0x60] sm:$0xff]  ;;  %v3788_v17 = vpop.permute.xlu1 %3787 }
0x1420   : > { %4523 = vmatpush3.xpose.msra.mxu1 %v3586_v12  ;;  %4535 = vmatprep.mubr.msk.f32.mxu0 %vm359_vm1, %v4034_v32 }
0x1421   : > { %4524 = vmatprep.subr.mxu1 %v5017_v0  ;;  %v4888_v24 = vpop.eup %4887 }
0x1422   : > { %v3584_v16 = vmul.f32 %v4888_v24, %v6221_v29 }
0x1423   : > { %v3798_v42 = vpop.permute.xlu1 %3797 }
0x1424   : > { %4525 = vmatpush3.xpose.msra.mxu1 %v3585_v18 }
0x1425   : > { %4526 = vmatprep.subr.mxu1 %v5017_v0  ;;  %v4890_v26 = vpop.eup %4889 }
0x1426   : > { %v3583_v2 = vmul.f32 %v4890_v26, %v6224_v28  ;;  %v4037_v28 = vld [vmem:[%s6350_s6 + $0x78] sm:$0xff] }
0x1428   : > { %4527 = vmatpush3.xpose.msra.mxu1 %v3584_v16 }
0x1429   : > { %4528 = vmatprep.subr.mxu1 %v5017_v0  ;;  %v4035_v0 = vld [vmem:[%s6350_s6 + $0x68] sm:$0xff] }
0x142c   : > { %4529 = vmatpush3.xpose.msra.mxu1 %v3583_v2 }
0x142f   : > { %4531 = vmatmul.mubr.f32.vlgmr.msra.gmra.mxu1 %v3023_v25 }
0x14ef   : > { %v3665_v34 = vpop.f32.mrf.mxu1 }
0x14f0   : > { %v3674_v29 = vmax.f32 %v3665_v34, 0.0 }
0x14f1   : > { %v4532_v35 = vpop.f32.mrf.mxu1 }
0x14f2   : > { %4533 = vmatprep.subr.mxu0 %v3674_v29 }
0x14f3   : > { %4534 = vmatpush3.msra.mxu0 %v3674_v29 }
0x14f4   : > { %4536 = vmatmul.mubr.msk.f32.vlgmr.msra.gmra.mxu0 %vm359_vm1, %v4035_v0 }
0x14f5   : > { %4538 = vmatprep.mubr.msk.f32.mxu0 %vm359_vm1, %v4036_v23 }
0x14f8   : > { %4539 = vmatmul.mubr.msk.f32.gmra.mxu0 %vm359_vm1, %v4037_v28 }
0x15b4   : > { %v4537_v40 = vpop.f32.mrf.mxu0 }
0x15b5   : > { %v3773_v41 = vadd.f32 %v4537_v40, %v6022_v63  ;;  %v3793_v63 = vpop.permute.xlu0 %3792 }
0x15b6   : > { %v3753_v44 = vpop.f32.mrf.mxu0 }
0x15b7   : > { %v3801_v37 = vadd.f32 %v3788_v17, %v3773_v41  ;;  %v3772_v47 = vadd.f32 %v3753_v44, %v6025_v6 }
0x15b8   : > { %v4540_v46 = vpop.f32.mrf.mxu0 }
0x15b9   : > { %3805 = vst [vmem:[%s328_s26 + $0x8] sm:$0xff] %v3801_v37  ;;  %v3800_v49 = vadd.f32 %v3783_v38, %v3772_v47  ;;  %v3775_v55 = vadd.f32 %v4540_v46, %v6028_v4 }
0x15ba   : > { %v3763_v56 = vpop.f32.mrf.mxu0 }
0x15bb   : > { %3804 = vst [vmem:[%s328_s26] sm:$0xff] %v3800_v49  ;;  %v3803_v57 = vadd.f32 %v3798_v42, %v3775_v55  ;;  %v3774_v53 = vadd.f32 %v3763_v56, %v6031_v13 }
0x15bd   : > { %3807 = vst [vmem:[%s328_s26 + $0x18] sm:$0xff] %v3803_v57  ;;  %v3802_v6 = vadd.f32 %v3793_v63, %v3774_v53 }
0x15bf   : > { %3806 = vst [vmem:[%s328_s26 + $0x10] sm:$0xff] %v3802_v6 }
0x15c0   : > { %4956 = shalt.err (!%p4953_p3)
}
0x15c1   : > { %s4957_s30 = scalar_lea.hbm %s6301_s20, 512  ;;  %s4961_s2 = scalar_lea.hbm %s6477_s10, 2048 }
0x15c2   : > { %p4958_p2 = scmp.ne.s32.totalorder %s6301_s20, %s4957_s30  ;;  %p4962_p7 = scmp.lt.s32.totalorder %s6301_s20, %s6477_s10 }
0x15c3   : > { %p4963_p6 = scmp.lt.s32.totalorder %s4961_s2, %s4957_s30 }
0x15c4   : > { %p4959_p4 = pnand %p4958_p2, %p5129_p5 }
0x15c5   : > { %p4964_p9 = por %p4963_p6, %p4962_p7 }
0x15c6   : > { %p4960_p13 = pneg %p4959_p4 }
0x15c8   : > { %p4965_p10 = pnand %p4964_p9, %p4960_p13 }
0x15ca   : > { %4968 = shalt.err (!%p4965_p10)
}
0x15cb   : > { %s5045_s3 = smov 128  }
0x15cc   : > { %4551 = dma.vmem_to_hbm [thread:$0]  (%p5129_p5), %s6296_s5, 512, %s6301_s20, %s6303_s28, %s5045_s3, %s5045_s3, %s6445_s23  }
0x15cd PF: > { %s6478_s19 = sld [smem:[#allocation14_spill]] }
0x15ce   : > { %s6479_s17 = sld [smem:[#allocation11_spill]] }
0x15cf   : > { %s6480_s13 = sld [smem:[#allocation19_spill]] }
0x15d3   : > { %p4568_p12 = scmp.ge.s32.totalorder %s6478_s19, 2 }
0x15d4   : > { %s3837_s18 = sand.u32 1, %s6479_s17  }
0x15d5   : > { %p6481_p8 = scmp.ne.s32.totalorder %s6480_s13, 0  ;;  %s3838_s0 = scalar_lea.sflag [#allocation4], %s3837_s18 }
0x15d7   : > { %p4561_p11 = pnand %p4568_p12, %p6481_p8 }
0x15d9   : > { %p4562_p0 = pneg %p4561_p11 }
0x15db   : > { %4994 = dma.done.wait (%p4562_p0), %s3838_s0, 512  }
0x15dc   : > { %4996 = vsyncadd (%p4562_p0), %s3838_s0, 4294966784  ;;  %s6482_s30 = sld [smem:[#allocation16_spill]] }
0x15dd   : > { %s6483_s27 = sld [smem:[#allocation12_spill]] }
0x15de   : > { %s6484_s28 = sld [smem:[#allocation13_spill]] }
0x15df   : > { %s6485_s29 = sld [smem:[#allocation17_spill]] }
0x15e2   : > { %p20_p1 = scmp.ge.s32.totalorder %s6482_s30, 6  }
0x15e4   :  { %22 = sbr.rel (!%p20_p1) target bundleno = 12 (0xc), region = 210 }
0x15e9   :  { %3843 = vsyncpa [#allocation3], 1 }
0x15ea   :  { %3845 = vsyncpa [#allocation3 + $0x1], 1 }
0x15eb   :  { %3846 = vsyncpa [#allocation6], 1 }
0x15ec   :  { %3847 = vsyncpa [#allocation4], 1 }
0x15ed   :  { %3849 = vsyncpa [#allocation4 + $0x1], 1 }

</bundles_post_ra>
